<compile_context>
chip_gen: v7x
topology: tpu7x:2x2x1
jax: 0.10.0
libtpu: 0.0.40
codegen_flags: <defaults>
</compile_context>

<pallas_src>
import jax
import jax.numpy as jnp
from jax import lax
from jax.experimental import pallas as pl
from jax.experimental.pallas import tpu as pltpu

_LANES = 128
_EPS = 1e-5
_VMEM_LIMIT = 32 * 1024 * 1024


def _round_up(x, m):
    return (x + m - 1) // m * m


# ---------------------------------------------------------------------------
# Conv kernel: 3x3 conv (zero pad 1) with optional fused BN+ReLU prologue on
# the input, plus per-block partial (sum, sum-of-squares) for BN statistics.
# One grid step == one batch element; full H,W per block; channels lane-dense.
# ---------------------------------------------------------------------------
def _make_conv_kernel(H, W, Cin_p, Cout_p, fuse_bn_relu_prologue):
    def kernel(*refs):
        if fuse_bn_relu_prologue:
            x_ref, w_ref, sc_ref, sh_ref, y_ref, sum_ref, sq_ref, xp_ref = refs
        else:
            x_ref, w_ref, y_ref, sum_ref, sq_ref, xp_ref = refs

        # In-kernel zero halo (avoids a padded HBM copy of the input).
        xp_ref[...] = jnp.zeros_like(xp_ref)
        x = x_ref[0]                                        # (H, W, Cin_p) f32
        if fuse_bn_relu_prologue:
            scale = sc_ref[...].reshape(1, 1, Cin_p)
            shift = sh_ref[...].reshape(1, 1, Cin_p)
            x = jnp.maximum(x * scale + shift, 0.0)         # BN1 + ReLU1 of stage 1
        xp_ref[1:H + 1, 1:W + 1, :] = x

        # im2col -> (H*W, 9*Cin_p) bf16, single deep-K MXU matmul, f32 accum.
        xp = xp_ref[...]
        cols = [xp[dy:dy + H, dx:dx + W, :].astype(jnp.bfloat16)
                for dy in range(3) for dx in range(3)]
        patches = jnp.concatenate(cols, axis=-1).reshape(H * W, 9 * Cin_p)
        acc = jnp.dot(patches, w_ref[...],
                      preferred_element_type=jnp.float32)    # (H*W, Cout_p) f32

        # Conv bias intentionally dropped: training-mode BN cancels it exactly.
        y_ref[0] = acc.reshape(H, W, Cout_p)

        # Partial BN statistics (finalized outside, across the whole grid).
        s = jnp.sum(acc, axis=0, keepdims=True)              # (1, Cout_p)
        q = jnp.sum(acc * acc, axis=0, keepdims=True)
        sum_ref[0] = jnp.broadcast_to(s, (8, Cout_p))
        sq_ref[0] = jnp.broadcast_to(q, (8, Cout_p))

    return kernel


def _conv_stats(x_nhwc, w2d, scale_shift=None):
    """3x3 conv (pad=1) in NHWC. Returns (y_f32, partial_sum, partial_sumsq)."""
    N, H, W, Cin_p = x_nhwc.shape
    Cout_p = w2d.shape[-1]
    fuse = scale_shift is not None

    in_specs = [
        pl.BlockSpec((1, H, W, Cin_p), lambda n: (n, 0, 0, 0)),
        pl.BlockSpec((9 * Cin_p, Cout_p), lambda n: (0, 0)),
    ]
    args = [x_nhwc, w2d]
    if fuse:
        sc, sh = scale_shift
        in_specs += [pl.BlockSpec((1, Cin_p), lambda n: (0, 0)),
                     pl.BlockSpec((1, Cin_p), lambda n: (0, 0))]
        args += [sc, sh]

    out_shape = (jax.ShapeDtypeStruct((N, H, W, Cout_p), jnp.float32),
                 jax.ShapeDtypeStruct((N, 8, Cout_p), jnp.float32),
                 jax.ShapeDtypeStruct((N, 8, Cout_p), jnp.float32))
    out_specs = (pl.BlockSpec((1, H, W, Cout_p), lambda n: (n, 0, 0, 0)),
                 pl.BlockSpec((1, 8, Cout_p), lambda n: (n, 0, 0)),
                 pl.BlockSpec((1, 8, Cout_p), lambda n: (n, 0, 0)))

    # TODO(synk): for large H,W also tile rows with a 1-pixel halo (pl.Element
    # windows or manual DMA); the conv passes currently tile over batch only.
    return pl.pallas_call(
        _make_conv_kernel(H, W, Cin_p, Cout_p, fuse),
        grid=(N,),
        in_specs=in_specs,
        out_specs=out_specs,
        out_shape=out_shape,
        scratch_shapes=[pltpu.VMEM((H + 2, W + 2, Cin_p), jnp.float32)],
        compiler_params=pltpu.CompilerParams(
            dimension_semantics=("parallel",),
            vmem_limit_bytes=_VMEM_LIMIT),
    )(*args)


# ---------------------------------------------------------------------------
# Final elementwise BN + ReLU kernel (tiled over batch and row blocks).
# ---------------------------------------------------------------------------
def _bn_relu_kernel(y_ref, sc_ref, sh_ref, o_ref):
    C = o_ref.shape[-1]
    scale = sc_ref[...].reshape(1, 1, 1, C)
    shift = sh_ref[...].reshape(1, 1, 1, C)
    o_ref[...] = jnp.maximum(y_ref[...] * scale + shift, 0.0)


def _bn_relu(y, sc, sh):
    N, H, W, Cp = y.shape
    hb = 8 if H % 8 == 0 else H
    return pl.pallas_call(
        _bn_relu_kernel,
        grid=(N, H // hb),
        in_specs=[pl.BlockSpec((1, hb, W, Cp), lambda n, h: (n, h, 0, 0)),
                  pl.BlockSpec((1, Cp), lambda n, h: (0, 0)),
                  pl.BlockSpec((1, Cp), lambda n, h: (0, 0))],
        out_specs=pl.BlockSpec((1, hb, W, Cp), lambda n, h: (n, h, 0, 0)),
        out_shape=jax.ShapeDtypeStruct((N, H, W, Cp), jnp.float32),
        compiler_params=pltpu.CompilerParams(
            dimension_semantics=("parallel", "parallel"),
            vmem_limit_bytes=_VMEM_LIMIT),
    )(y, sc, sh)


# ---------------------------------------------------------------------------
# Glue: reduce partial sums across the grid, finalize per-channel scale/shift.
# ---------------------------------------------------------------------------
def _finalize_bn(psum, psq, gamma, beta, count):
    s = jnp.sum(psum[:, 0, :], axis=0)                       # (Cp,)
    q = jnp.sum(psq[:, 0, :], axis=0)
    mean = s / count
    var = jnp.maximum(q / count - mean * mean, 0.0)          # biased (train mode)
    scale = gamma * lax.rsqrt(var + _EPS)
    shift = beta - mean * scale
    return (scale.reshape(1, -1).astype(jnp.float32),
            shift.reshape(1, -1).astype(jnp.float32))


# ---------------------------------------------------------------------------
# Public forward: NCHW in / NCHW out, matching the PyTorch module.
# ---------------------------------------------------------------------------
def double_conv(x_nchw, params):
    w1, b1, g1, be1, w2, b2, g2, be2 = params
    # b1/b2 are mathematically cancelled by training-mode BN mean subtraction.
    del b1, b2

    N, Cin, H, W = x_nchw.shape
    Cout = w1.shape[-1]
    Cin_p = _round_up(Cin, _LANES)
    Cp = _round_up(Cout, _LANES)

    # Layout glue: NCHW -> NHWC, channels padded to 128-lane multiples.
    x = jnp.transpose(x_nchw, (0, 2, 3, 1))
    x = jnp.pad(x, ((0, 0), (0, 0), (0, 0), (0, Cin_p - Cin)))

    w1p = jnp.pad(w1, ((0, 0), (0, 0), (0, Cin_p - Cin), (0, Cp - Cout)))
    w1p = w1p.reshape(9 * Cin_p, Cp).astype(jnp.bfloat16)
    w2p = jnp.pad(w2, ((0, 0), (0, 0), (0, Cp - Cout), (0, Cp - Cout)))
    w2p = w2p.reshape(9 * Cp, Cp).astype(jnp.bfloat16)
    g1p, be1p = jnp.pad(g1, (0, Cp - Cout)), jnp.pad(be1, (0, Cp - Cout))
    g2p, be2p = jnp.pad(g2, (0, Cp - Cout)), jnp.pad(be2, (0, Cp - Cout))

    count = N * H * W

    # Stage 1: conv1 + partial BN stats.
    y1, s1, q1 = _conv_stats(x, w1p)
    sc1, sh1 = _finalize_bn(s1, q1, g1p, be1p, count)
    # Stage 2: fused BN1+ReLU1 prologue -> conv2 + partial BN stats.
    y2, s2, q2 = _conv_stats(y1, w2p, scale_shift=(sc1, sh1))
    sc2, sh2 = _finalize_bn(s2, q2, g2p, be2p, count)
    # Final BN2 + ReLU2.
    out = _bn_relu(y2, sc2, sh2)

    out = out[..., :Cout]
    return jnp.transpose(out, (0, 3, 1, 2))


def init_params(key, in_channels, out_channels):
    ks = jax.random.split(key, 4)
    w1 = 0.1 * jax.random.normal(ks[0], (3, 3, in_channels, out_channels), jnp.float32)
    b1 = 0.1 * jax.random.normal(ks[1], (out_channels,), jnp.float32)
    g1 = jnp.ones((out_channels,), jnp.float32)
    be1 = jnp.zeros((out_channels,), jnp.float32)
    w2 = 0.1 * jax.random.normal(ks[2], (3, 3, out_channels, out_channels), jnp.float32)
    b2 = 0.1 * jax.random.normal(ks[3], (out_channels,), jnp.float32)
    g2 = jnp.ones((out_channels,), jnp.float32)
    be2 = jnp.zeros((out_channels,), jnp.float32)
    return (w1, b1, g1, be1, w2, b2, g2, be2)


def _reference(x_nchw, params):
    """Pure-JAX reference mirroring the kernel numerics (bf16 conv operands,
    f32 accumulation, training-mode BN with batch stats, ReLU)."""
    w1, b1, g1, be1, w2, b2, g2, be2 = params

    def block(x, w, b, g, be):
        y = lax.conv_general_dilated(
            x.astype(jnp.bfloat16), w.astype(jnp.bfloat16),
            window_strides=(1, 1), padding=((1, 1), (1, 1)),
            dimension_numbers=("NCHW", "HWIO", "NCHW"),
            preferred_element_type=jnp.float32)
        y = y + b[None, :, None, None]              # bias (cancelled by BN below)
        mean = jnp.mean(y, axis=(0, 2, 3), keepdims=True)
        var = jnp.mean((y - mean) ** 2, axis=(0, 2, 3), keepdims=True)
        y = (y - mean) * lax.rsqrt(var + _EPS)
        y = y * g[None, :, None, None] + be[None, :, None, None]
        return jnp.maximum(y, 0.0)

    return block(block(x_nchw, w1, b1, g1, be1), w2, b2, g2, be2)


if __name__ == "__main__":
    key = jax.random.PRNGKey(0)
    k_x, k_p = jax.random.split(key)

    N, Cin, Cout, H, W = 2, 4, 8, 16, 16
    x = jax.random.normal(k_x, (N, Cin, H, W), jnp.float32)   # NCHW like PyTorch
    params = init_params(k_p, Cin, Cout)

    fwd = jax.jit(double_conv)
    out = jax.block_until_ready(fwd(x, params))
    ref = jax.block_until_ready(_reference(x, params))

    assert out.shape == (N, Cout, H, W), out.shape
    err = float(jnp.max(jnp.abs(out - ref)))
    assert jnp.allclose(out, ref, rtol=1e-2, atol=1e-2), err
    print("KERNEL_OK")
</pallas_src>

<mosaic_0001>
module attributes {stable_mosaic.version = 11 : i64} {
  func.func @kernel(%arg0: i32, %arg1: memref<1x16x16x128xf32, #tpu.memory_space<vmem>>, %arg2: memref<1152x128xbf16, #tpu.memory_space<vmem>>, %arg3: memref<1x16x16x128xf32, #tpu.memory_space<vmem>>, %arg4: memref<1x8x128xf32, #tpu.memory_space<vmem>>, %arg5: memref<1x8x128xf32, #tpu.memory_space<vmem>>, %arg6: memref<18x18x128xf32, #tpu.memory_space<vmem>>) attributes {dimension_semantics = [#tpu.dimension_semantics<parallel>], iteration_bounds = array<i64: 2>, scalar_prefetch = 0 : i64, scratch_operands = 1 : i64, tpu.core_type = #tpu.core_type<tc>, window_params = [{transform_indices = @transform_0, window_bounds = array<i64: 1, 16, 16, 128>}, {pipeline_mode = #tpu.pipeline_mode<synchronous>, transform_indices = @transform_1, window_bounds = array<i64: 1152, 128>}, {transform_indices = @transform_2, window_bounds = array<i64: 1, 16, 16, 128>}, {transform_indices = @transform_3, window_bounds = array<i64: 1, 8, 128>}, {transform_indices = @transform_4, window_bounds = array<i64: 1, 8, 128>}]} {
    %cst = arith.constant 0.000000e+00 : f32
    %0 = vector.broadcast %cst : f32 to vector<18x18x128xf32>
    %c0 = arith.constant 0 : index
    %c0_0 = arith.constant 0 : index
    %c0_1 = arith.constant 0 : index
    %1 = vector.load %arg6[%c0, %c0_0, %c0_1] : memref<18x18x128xf32, #tpu.memory_space<vmem>>, vector<18x18x128xf32>
    tpu.vector_store %arg6[%c0, %c0_0, %c0_1], %0 {strides = array<i32>} : memref<18x18x128xf32, #tpu.memory_space<vmem>>, vector<18x18x128xf32>,
    %c0_2 = arith.constant 0 : index
    %c0_3 = arith.constant 0 : index
    %c0_4 = arith.constant 0 : index
    %c0_5 = arith.constant 0 : index
    %2 = vector.load %arg1[%c0_2, %c0_3, %c0_4, %c0_5] : memref<1x16x16x128xf32, #tpu.memory_space<vmem>>, vector<1x16x16x128xf32>
    %3 = vector.shape_cast %2 : vector<1x16x16x128xf32> to vector<16x16x128xf32>
    %c1 = arith.constant 1 : index
    %c1_6 = arith.constant 1 : index
    %c0_7 = arith.constant 0 : index
    %4 = vector.load %arg6[%c1, %c1_6, %c0_7] : memref<18x18x128xf32, #tpu.memory_space<vmem>>, vector<16x16x128xf32>
    tpu.vector_store %arg6[%c1, %c1_6, %c0_7], %3 {strides = array<i32>} : memref<18x18x128xf32, #tpu.memory_space<vmem>>, vector<16x16x128xf32>,
    %c0_8 = arith.constant 0 : index
    %c0_9 = arith.constant 0 : index
    %c0_10 = arith.constant 0 : index
    %5 = vector.load %arg6[%c0_8, %c0_9, %c0_10] : memref<18x18x128xf32, #tpu.memory_space<vmem>>, vector<18x18x128xf32>
    %6 = vector.extract_strided_slice %5 {offsets = [0, 0, 0], sizes = [16, 16, 128], strides = [1, 1, 1]} : vector<18x18x128xf32> to vector<16x16x128xf32>
    %7 = arith.truncf %6 : vector<16x16x128xf32> to vector<16x16x128xbf16>
    %8 = vector.extract_strided_slice %5 {offsets = [0, 1, 0], sizes = [16, 16, 128], strides = [1, 1, 1]} : vector<18x18x128xf32> to vector<16x16x128xf32>
    %9 = arith.truncf %8 : vector<16x16x128xf32> to vector<16x16x128xbf16>
    %10 = vector.extract_strided_slice %5 {offsets = [0, 2, 0], sizes = [16, 16, 128], strides = [1, 1, 1]} : vector<18x18x128xf32> to vector<16x16x128xf32>
    %11 = arith.truncf %10 : vector<16x16x128xf32> to vector<16x16x128xbf16>
    %12 = vector.extract_strided_slice %5 {offsets = [1, 0, 0], sizes = [16, 16, 128], strides = [1, 1, 1]} : vector<18x18x128xf32> to vector<16x16x128xf32>
    %13 = arith.truncf %12 : vector<16x16x128xf32> to vector<16x16x128xbf16>
    %14 = vector.extract_strided_slice %5 {offsets = [1, 1, 0], sizes = [16, 16, 128], strides = [1, 1, 1]} : vector<18x18x128xf32> to vector<16x16x128xf32>
    %15 = arith.truncf %14 : vector<16x16x128xf32> to vector<16x16x128xbf16>
    %16 = vector.extract_strided_slice %5 {offsets = [1, 2, 0], sizes = [16, 16, 128], strides = [1, 1, 1]} : vector<18x18x128xf32> to vector<16x16x128xf32>
    %17 = arith.truncf %16 : vector<16x16x128xf32> to vector<16x16x128xbf16>
    %18 = vector.extract_strided_slice %5 {offsets = [2, 0, 0], sizes = [16, 16, 128], strides = [1, 1, 1]} : vector<18x18x128xf32> to vector<16x16x128xf32>
    %19 = arith.truncf %18 : vector<16x16x128xf32> to vector<16x16x128xbf16>
    %20 = vector.extract_strided_slice %5 {offsets = [2, 1, 0], sizes = [16, 16, 128], strides = [1, 1, 1]} : vector<18x18x128xf32> to vector<16x16x128xf32>
    %21 = arith.truncf %20 : vector<16x16x128xf32> to vector<16x16x128xbf16>
    %22 = vector.extract_strided_slice %5 {offsets = [2, 2, 0], sizes = [16, 16, 128], strides = [1, 1, 1]} : vector<18x18x128xf32> to vector<16x16x128xf32>
    %23 = arith.truncf %22 : vector<16x16x128xf32> to vector<16x16x128xbf16>
    %24 = tpu.concatenate %7, %9, %11, %13, %15, %17, %19, %21, %23 in 2 : vector<16x16x128xbf16>, vector<16x16x128xbf16>, vector<16x16x128xbf16>, vector<16x16x128xbf16>, vector<16x16x128xbf16>, vector<16x16x128xbf16>, vector<16x16x128xbf16>, vector<16x16x128xbf16>, vector<16x16x128xbf16> -> vector<16x16x1152xbf16>
    %25 = vector.shape_cast %24 : vector<16x16x1152xbf16> to vector<256x1152xbf16>
    %c0_11 = arith.constant 0 : index
    %c0_12 = arith.constant 0 : index
    %26 = vector.load %arg2[%c0_11, %c0_12] : memref<1152x128xbf16, #tpu.memory_space<vmem>>, vector<1152x128xbf16>
    %cst_13 = arith.constant dense<0.000000e+00> : vector<256x128xf32>
    %27 = tpu.matmul %25, %26, %cst_13 {dimension_numbers = #tpu.dot_dimension_numbers<[1], [0], [0], [1], [0, 0, 1, 1], [], []>} : vector<256x1152xbf16>, vector<1152x128xbf16>, vector<256x128xf32> -> vector<256x128xf32>
    %28 = vector.shape_cast %27 : vector<256x128xf32> to vector<16x16x128xf32>
    %c0_14 = arith.constant 0 : index
    %c0_15 = arith.constant 0 : index
    %c0_16 = arith.constant 0 : index
    %c0_17 = arith.constant 0 : index
    %29 = vector.load %arg3[%c0_14, %c0_15, %c0_16, %c0_17] : memref<1x16x16x128xf32, #tpu.memory_space<vmem>>, vector<1x16x16x128xf32>
    %30 = vector.shape_cast %29 : vector<1x16x16x128xf32> to vector<16x16x128xf32>
    %31 = vector.shape_cast %28 : vector<16x16x128xf32> to vector<1x16x16x128xf32>
    tpu.vector_store %arg3[%c0_14, %c0_15, %c0_16, %c0_17], %31 {strides = array<i32>} : memref<1x16x16x128xf32, #tpu.memory_space<vmem>>, vector<1x16x16x128xf32>,
    %cst_18 = arith.constant dense<0.000000e+00> : vector<128xf32>
    %32 = vector.multi_reduction <add>, %27, %cst_18 [0] : vector<256x128xf32> to vector<128xf32>
    %33 = vector.shape_cast %32 : vector<128xf32> to vector<1x128xf32>
    %34 = arith.mulf %27, %27 : vector<256x128xf32>
    %cst_19 = arith.constant dense<0.000000e+00> : vector<128xf32>
    %35 = vector.multi_reduction <add>, %34, %cst_19 [0] : vector<256x128xf32> to vector<128xf32>
    %36 = vector.shape_cast %35 : vector<128xf32> to vector<1x128xf32>
    %37 = vector.shape_cast %33 : vector<1x128xf32> to vector<1x128xf32>
    %38 = vector.broadcast %37 : vector<1x128xf32> to vector<8x128xf32>
    %c0_20 = arith.constant 0 : index
    %c0_21 = arith.constant 0 : index
    %c0_22 = arith.constant 0 : index
    %39 = vector.load %arg4[%c0_20, %c0_21, %c0_22] : memref<1x8x128xf32, #tpu.memory_space<vmem>>, vector<1x8x128xf32>
    %40 = vector.shape_cast %39 : vector<1x8x128xf32> to vector<8x128xf32>
    %41 = vector.shape_cast %38 : vector<8x128xf32> to vector<1x8x128xf32>
    tpu.vector_store %arg4[%c0_20, %c0_21, %c0_22], %41 {strides = array<i32>} : memref<1x8x128xf32, #tpu.memory_space<vmem>>, vector<1x8x128xf32>,
    %42 = vector.shape_cast %36 : vector<1x128xf32> to vector<1x128xf32>
    %43 = vector.broadcast %42 : vector<1x128xf32> to vector<8x128xf32>
    %c0_23 = arith.constant 0 : index
    %c0_24 = arith.constant 0 : index
    %c0_25 = arith.constant 0 : index
    %44 = vector.load %arg5[%c0_23, %c0_24, %c0_25] : memref<1x8x128xf32, #tpu.memory_space<vmem>>, vector<1x8x128xf32>
    %45 = vector.shape_cast %44 : vector<1x8x128xf32> to vector<8x128xf32>
    %46 = vector.shape_cast %43 : vector<8x128xf32> to vector<1x8x128xf32>
    tpu.vector_store %arg5[%c0_23, %c0_24, %c0_25], %46 {strides = array<i32>} : memref<1x8x128xf32, #tpu.memory_space<vmem>>, vector<1x8x128xf32>,
    return
  }
  func.func @transform_0(%arg0: i32) -> (i32, i32, i32, i32) {
    %c0_i32 = arith.constant 0 : i32
    %c0_i32_0 = arith.constant 0 : i32
    %c0_i32_1 = arith.constant 0 : i32
    %c0_i32_2 = arith.constant 0 : i32
    return %arg0, %c0_i32, %c0_i32_0, %c0_i32_1 : i32, i32, i32, i32
  }
  func.func @transform_1(%arg0: i32) -> (i32, i32) {
    %c0_i32 = arith.constant 0 : i32
    %c0_i32_0 = arith.constant 0 : i32
    %c0_i32_1 = arith.constant 0 : i32
    return %c0_i32, %c0_i32_0 : i32, i32
  }
  func.func @transform_2(%arg0: i32) -> (i32, i32, i32, i32) {
    %c0_i32 = arith.constant 0 : i32
    %c0_i32_0 = arith.constant 0 : i32
    %c0_i32_1 = arith.constant 0 : i32
    %c0_i32_2 = arith.constant 0 : i32
    return %arg0, %c0_i32, %c0_i32_0, %c0_i32_1 : i32, i32, i32, i32
  }
  func.func @transform_3(%arg0: i32) -> (i32, i32, i32) {
    %c0_i32 = arith.constant 0 : i32
    %c0_i32_0 = arith.constant 0 : i32
    %c0_i32_1 = arith.constant 0 : i32
    return %arg0, %c0_i32, %c0_i32_0 : i32, i32, i32
  }
  func.func @transform_4(%arg0: i32) -> (i32, i32, i32) {
    %c0_i32 = arith.constant 0 : i32
    %c0_i32_0 = arith.constant 0 : i32
    %c0_i32_1 = arith.constant 0 : i32
    return %arg0, %c0_i32, %c0_i32_0 : i32, i32, i32
  }
}

module attributes {stable_mosaic.version = 11 : i64} {
  func.func @_bn_relu_kernel(%arg0: i32, %arg1: i32, %arg2: memref<1x8x16x128xf32, #tpu.memory_space<vmem>>, %arg3: memref<1x128xf32, #tpu.memory_space<vmem>>, %arg4: memref<1x128xf32, #tpu.memory_space<vmem>>, %arg5: memref<1x8x16x128xf32, #tpu.memory_space<vmem>>) attributes {dimension_semantics = [#tpu.dimension_semantics<parallel>, #tpu.dimension_semantics<parallel>], iteration_bounds = array<i64: 2, 2>, scalar_prefetch = 0 : i64, scratch_operands = 0 : i64, tpu.core_type = #tpu.core_type<tc>, window_params = [{transform_indices = @transform_0, window_bounds = array<i64: 1, 8, 16, 128>}, {pipeline_mode = #tpu.pipeline_mode<synchronous>, transform_indices = @transform_1, window_bounds = array<i64: 1, 128>}, {pipeline_mode = #tpu.pipeline_mode<synchronous>, transform_indices = @transform_2, window_bounds = array<i64: 1, 128>}, {transform_indices = @transform_3, window_bounds = array<i64: 1, 8, 16, 128>}]} {
    %c0 = arith.constant 0 : index
    %c0_0 = arith.constant 0 : index
    %0 = vector.load %arg3[%c0, %c0_0] : memref<1x128xf32, #tpu.memory_space<vmem>>, vector<1x128xf32>
    %1 = vector.shape_cast %0 : vector<1x128xf32> to vector<1x1x1x128xf32>
    %c0_1 = arith.constant 0 : index
    %c0_2 = arith.constant 0 : index
    %2 = vector.load %arg4[%c0_1, %c0_2] : memref<1x128xf32, #tpu.memory_space<vmem>>, vector<1x128xf32>
    %3 = vector.shape_cast %2 : vector<1x128xf32> to vector<1x1x1x128xf32>
    %c0_3 = arith.constant 0 : index
    %c0_4 = arith.constant 0 : index
    %c0_5 = arith.constant 0 : index
    %c0_6 = arith.constant 0 : index
    %4 = vector.load %arg2[%c0_3, %c0_4, %c0_5, %c0_6] : memref<1x8x16x128xf32, #tpu.memory_space<vmem>>, vector<1x8x16x128xf32>
    %5 = vector.broadcast %1 : vector<1x1x1x128xf32> to vector<1x8x16x128xf32>
    %6 = arith.mulf %4, %5 : vector<1x8x16x128xf32>
    %7 = vector.broadcast %3 : vector<1x1x1x128xf32> to vector<1x8x16x128xf32>
    %8 = arith.addf %6, %7 : vector<1x8x16x128xf32>
    %cst = arith.constant 0.000000e+00 : f32
    %9 = vector.broadcast %cst : f32 to vector<1x8x16x128xf32>
    %10 = arith.maximumf %8, %9 : vector<1x8x16x128xf32>
    %c0_7 = arith.constant 0 : index
    %c0_8 = arith.constant 0 : index
    %c0_9 = arith.constant 0 : index
    %c0_10 = arith.constant 0 : index
    %11 = vector.load %arg5[%c0_7, %c0_8, %c0_9, %c0_10] : memref<1x8x16x128xf32, #tpu.memory_space<vmem>>, vector<1x8x16x128xf32>
    tpu.vector_store %arg5[%c0_7, %c0_8, %c0_9, %c0_10], %10 {strides = array<i32>} : memref<1x8x16x128xf32, #tpu.memory_space<vmem>>, vector<1x8x16x128xf32>,
    return
  }
  func.func @transform_0(%arg0: i32, %arg1: i32) -> (i32, i32, i32, i32) {
    %c0_i32 = arith.constant 0 : i32
    %c0_i32_0 = arith.constant 0 : i32
    %c0_i32_1 = arith.constant 0 : i32
    return %arg0, %arg1, %c0_i32, %c0_i32_0 : i32, i32, i32, i32
  }
  func.func @transform_1(%arg0: i32, %arg1: i32) -> (i32, i32) {
    %c0_i32 = arith.constant 0 : i32
    %c0_i32_0 = arith.constant 0 : i32
    %c0_i32_1 = arith.constant 0 : i32
    return %c0_i32, %c0_i32_0 : i32, i32
  }
  func.func @transform_2(%arg0: i32, %arg1: i32) -> (i32, i32) {
    %c0_i32 = arith.constant 0 : i32
    %c0_i32_0 = arith.constant 0 : i32
    %c0_i32_1 = arith.constant 0 : i32
    return %c0_i32, %c0_i32_0 : i32, i32
  }
  func.func @transform_3(%arg0: i32, %arg1: i32) -> (i32, i32, i32, i32) {
    %c0_i32 = arith.constant 0 : i32
    %c0_i32_0 = arith.constant 0 : i32
    %c0_i32_1 = arith.constant 0 : i32
    return %arg0, %arg1, %c0_i32, %c0_i32_0 : i32, i32, i32, i32
  }
}

module attributes {stable_mosaic.version = 11 : i64} {
  func.func @kernel(%arg0: i32, %arg1: memref<1x16x16x128xf32, #tpu.memory_space<vmem>>, %arg2: memref<1152x128xbf16, #tpu.memory_space<vmem>>, %arg3: memref<1x128xf32, #tpu.memory_space<vmem>>, %arg4: memref<1x128xf32, #tpu.memory_space<vmem>>, %arg5: memref<1x16x16x128xf32, #tpu.memory_space<vmem>>, %arg6: memref<1x8x128xf32, #tpu.memory_space<vmem>>, %arg7: memref<1x8x128xf32, #tpu.memory_space<vmem>>, %arg8: memref<18x18x128xf32, #tpu.memory_space<vmem>>) attributes {dimension_semantics = [#tpu.dimension_semantics<parallel>], iteration_bounds = array<i64: 2>, scalar_prefetch = 0 : i64, scratch_operands = 1 : i64, tpu.core_type = #tpu.core_type<tc>, window_params = [{transform_indices = @transform_0, window_bounds = array<i64: 1, 16, 16, 128>}, {pipeline_mode = #tpu.pipeline_mode<synchronous>, transform_indices = @transform_1, window_bounds = array<i64: 1152, 128>}, {pipeline_mode = #tpu.pipeline_mode<synchronous>, transform_indices = @transform_2, window_bounds = array<i64: 1, 128>}, {pipeline_mode = #tpu.pipeline_mode<synchronous>, transform_indices = @transform_3, window_bounds = array<i64: 1, 128>}, {transform_indices = @transform_4, window_bounds = array<i64: 1, 16, 16, 128>}, {transform_indices = @transform_5, window_bounds = array<i64: 1, 8, 128>}, {transform_indices = @transform_6, window_bounds = array<i64: 1, 8, 128>}]} {
    %cst = arith.constant 0.000000e+00 : f32
    %0 = vector.broadcast %cst : f32 to vector<18x18x128xf32>
    %c0 = arith.constant 0 : index
    %c0_0 = arith.constant 0 : index
    %c0_1 = arith.constant 0 : index
    %1 = vector.load %arg8[%c0, %c0_0, %c0_1] : memref<18x18x128xf32, #tpu.memory_space<vmem>>, vector<18x18x128xf32>
    tpu.vector_store %arg8[%c0, %c0_0, %c0_1], %0 {strides = array<i32>} : memref<18x18x128xf32, #tpu.memory_space<vmem>>, vector<18x18x128xf32>,
    %c0_2 = arith.constant 0 : index
    %c0_3 = arith.constant 0 : index
    %c0_4 = arith.constant 0 : index
    %c0_5 = arith.constant 0 : index
    %2 = vector.load %arg1[%c0_2, %c0_3, %c0_4, %c0_5] : memref<1x16x16x128xf32, #tpu.memory_space<vmem>>, vector<1x16x16x128xf32>
    %3 = vector.shape_cast %2 : vector<1x16x16x128xf32> to vector<16x16x128xf32>
    %c0_6 = arith.constant 0 : index
    %c0_7 = arith.constant 0 : index
    %4 = vector.load %arg3[%c0_6, %c0_7] : memref<1x128xf32, #tpu.memory_space<vmem>>, vector<1x128xf32>
    %5 = vector.shape_cast %4 : vector<1x128xf32> to vector<1x1x128xf32>
    %c0_8 = arith.constant 0 : index
    %c0_9 = arith.constant 0 : index
    %6 = vector.load %arg4[%c0_8, %c0_9] : memref<1x128xf32, #tpu.memory_space<vmem>>, vector<1x128xf32>
    %7 = vector.shape_cast %6 : vector<1x128xf32> to vector<1x1x128xf32>
    %8 = vector.broadcast %5 : vector<1x1x128xf32> to vector<16x16x128xf32>
    %9 = arith.mulf %3, %8 : vector<16x16x128xf32>
    %10 = vector.broadcast %7 : vector<1x1x128xf32> to vector<16x16x128xf32>
    %11 = arith.addf %9, %10 : vector<16x16x128xf32>
    %cst_10 = arith.constant 0.000000e+00 : f32
    %12 = vector.broadcast %cst_10 : f32 to vector<16x16x128xf32>
    %13 = arith.maximumf %11, %12 : vector<16x16x128xf32>
    %c1 = arith.constant 1 : index
    %c1_11 = arith.constant 1 : index
    %c0_12 = arith.constant 0 : index
    %14 = vector.load %arg8[%c1, %c1_11, %c0_12] : memref<18x18x128xf32, #tpu.memory_space<vmem>>, vector<16x16x128xf32>
    tpu.vector_store %arg8[%c1, %c1_11, %c0_12], %13 {strides = array<i32>} : memref<18x18x128xf32, #tpu.memory_space<vmem>>, vector<16x16x128xf32>,
    %c0_13 = arith.constant 0 : index
    %c0_14 = arith.constant 0 : index
    %c0_15 = arith.constant 0 : index
    %15 = vector.load %arg8[%c0_13, %c0_14, %c0_15] : memref<18x18x128xf32, #tpu.memory_space<vmem>>, vector<18x18x128xf32>
    %16 = vector.extract_strided_slice %15 {offsets = [0, 0, 0], sizes = [16, 16, 128], strides = [1, 1, 1]} : vector<18x18x128xf32> to vector<16x16x128xf32>
    %17 = arith.truncf %16 : vector<16x16x128xf32> to vector<16x16x128xbf16>
    %18 = vector.extract_strided_slice %15 {offsets = [0, 1, 0], sizes = [16, 16, 128], strides = [1, 1, 1]} : vector<18x18x128xf32> to vector<16x16x128xf32>
    %19 = arith.truncf %18 : vector<16x16x128xf32> to vector<16x16x128xbf16>
    %20 = vector.extract_strided_slice %15 {offsets = [0, 2, 0], sizes = [16, 16, 128], strides = [1, 1, 1]} : vector<18x18x128xf32> to vector<16x16x128xf32>
    %21 = arith.truncf %20 : vector<16x16x128xf32> to vector<16x16x128xbf16>
    %22 = vector.extract_strided_slice %15 {offsets = [1, 0, 0], sizes = [16, 16, 128], strides = [1, 1, 1]} : vector<18x18x128xf32> to vector<16x16x128xf32>
    %23 = arith.truncf %22 : vector<16x16x128xf32> to vector<16x16x128xbf16>
    %24 = vector.extract_strided_slice %15 {offsets = [1, 1, 0], sizes = [16, 16, 128], strides = [1, 1, 1]} : vector<18x18x128xf32> to vector<16x16x128xf32>
    %25 = arith.truncf %24 : vector<16x16x128xf32> to vector<16x16x128xbf16>
    %26 = vector.extract_strided_slice %15 {offsets = [1, 2, 0], sizes = [16, 16, 128], strides = [1, 1, 1]} : vector<18x18x128xf32> to vector<16x16x128xf32>
    %27 = arith.truncf %26 : vector<16x16x128xf32> to vector<16x16x128xbf16>
    %28 = vector.extract_strided_slice %15 {offsets = [2, 0, 0], sizes = [16, 16, 128], strides = [1, 1, 1]} : vector<18x18x128xf32> to vector<16x16x128xf32>
    %29 = arith.truncf %28 : vector<16x16x128xf32> to vector<16x16x128xbf16>
    %30 = vector.extract_strided_slice %15 {offsets = [2, 1, 0], sizes = [16, 16, 128], strides = [1, 1, 1]} : vector<18x18x128xf32> to vector<16x16x128xf32>
    %31 = arith.truncf %30 : vector<16x16x128xf32> to vector<16x16x128xbf16>
    %32 = vector.extract_strided_slice %15 {offsets = [2, 2, 0], sizes = [16, 16, 128], strides = [1, 1, 1]} : vector<18x18x128xf32> to vector<16x16x128xf32>
    %33 = arith.truncf %32 : vector<16x16x128xf32> to vector<16x16x128xbf16>
    %34 = tpu.concatenate %17, %19, %21, %23, %25, %27, %29, %31, %33 in 2 : vector<16x16x128xbf16>, vector<16x16x128xbf16>, vector<16x16x128xbf16>, vector<16x16x128xbf16>, vector<16x16x128xbf16>, vector<16x16x128xbf16>, vector<16x16x128xbf16>, vector<16x16x128xbf16>, vector<16x16x128xbf16> -> vector<16x16x1152xbf16>
    %35 = vector.shape_cast %34 : vector<16x16x1152xbf16> to vector<256x1152xbf16>
    %c0_16 = arith.constant 0 : index
    %c0_17 = arith.constant 0 : index
    %36 = vector.load %arg2[%c0_16, %c0_17] : memref<1152x128xbf16, #tpu.memory_space<vmem>>, vector<1152x128xbf16>
    %cst_18 = arith.constant dense<0.000000e+00> : vector<256x128xf32>
    %37 = tpu.matmul %35, %36, %cst_18 {dimension_numbers = #tpu.dot_dimension_numbers<[1], [0], [0], [1], [0, 0, 1, 1], [], []>} : vector<256x1152xbf16>, vector<1152x128xbf16>, vector<256x128xf32> -> vector<256x128xf32>
    %38 = vector.shape_cast %37 : vector<256x128xf32> to vector<16x16x128xf32>
    %c0_19 = arith.constant 0 : index
    %c0_20 = arith.constant 0 : index
    %c0_21 = arith.constant 0 : index
    %c0_22 = arith.constant 0 : index
    %39 = vector.load %arg5[%c0_19, %c0_20, %c0_21, %c0_22] : memref<1x16x16x128xf32, #tpu.memory_space<vmem>>, vector<1x16x16x128xf32>
    %40 = vector.shape_cast %39 : vector<1x16x16x128xf32> to vector<16x16x128xf32>
    %41 = vector.shape_cast %38 : vector<16x16x128xf32> to vector<1x16x16x128xf32>
    tpu.vector_store %arg5[%c0_19, %c0_20, %c0_21, %c0_22], %41 {strides = array<i32>} : memref<1x16x16x128xf32, #tpu.memory_space<vmem>>, vector<1x16x16x128xf32>,
    %cst_23 = arith.constant dense<0.000000e+00> : vector<128xf32>
    %42 = vector.multi_reduction <add>, %37, %cst_23 [0] : vector<256x128xf32> to vector<128xf32>
    %43 = vector.shape_cast %42 : vector<128xf32> to vector<1x128xf32>
    %44 = arith.mulf %37, %37 : vector<256x128xf32>
    %cst_24 = arith.constant dense<0.000000e+00> : vector<128xf32>
    %45 = vector.multi_reduction <add>, %44, %cst_24 [0] : vector<256x128xf32> to vector<128xf32>
    %46 = vector.shape_cast %45 : vector<128xf32> to vector<1x128xf32>
    %47 = vector.shape_cast %43 : vector<1x128xf32> to vector<1x128xf32>
    %48 = vector.broadcast %47 : vector<1x128xf32> to vector<8x128xf32>
    %c0_25 = arith.constant 0 : index
    %c0_26 = arith.constant 0 : index
    %c0_27 = arith.constant 0 : index
    %49 = vector.load %arg6[%c0_25, %c0_26, %c0_27] : memref<1x8x128xf32, #tpu.memory_space<vmem>>, vector<1x8x128xf32>
    %50 = vector.shape_cast %49 : vector<1x8x128xf32> to vector<8x128xf32>
    %51 = vector.shape_cast %48 : vector<8x128xf32> to vector<1x8x128xf32>
    tpu.vector_store %arg6[%c0_25, %c0_26, %c0_27], %51 {strides = array<i32>} : memref<1x8x128xf32, #tpu.memory_space<vmem>>, vector<1x8x128xf32>,
    %52 = vector.shape_cast %46 : vector<1x128xf32> to vector<1x128xf32>
    %53 = vector.broadcast %52 : vector<1x128xf32> to vector<8x128xf32>
    %c0_28 = arith.constant 0 : index
    %c0_29 = arith.constant 0 : index
    %c0_30 = arith.constant 0 : index
    %54 = vector.load %arg7[%c0_28, %c0_29, %c0_30] : memref<1x8x128xf32, #tpu.memory_space<vmem>>, vector<1x8x128xf32>
    %55 = vector.shape_cast %54 : vector<1x8x128xf32> to vector<8x128xf32>
    %56 = vector.shape_cast %53 : vector<8x128xf32> to vector<1x8x128xf32>
    tpu.vector_store %arg7[%c0_28, %c0_29, %c0_30], %56 {strides = array<i32>} : memref<1x8x128xf32, #tpu.memory_space<vmem>>, vector<1x8x128xf32>,
    return
  }
  func.func @transform_0(%arg0: i32) -> (i32, i32, i32, i32) {
    %c0_i32 = arith.constant 0 : i32
    %c0_i32_0 = arith.constant 0 : i32
    %c0_i32_1 = arith.constant 0 : i32
    %c0_i32_2 = arith.constant 0 : i32
    return %arg0, %c0_i32, %c0_i32_0, %c0_i32_1 : i32, i32, i32, i32
  }
  func.func @transform_1(%arg0: i32) -> (i32, i32) {
    %c0_i32 = arith.constant 0 : i32
    %c0_i32_0 = arith.constant 0 : i32
    %c0_i32_1 = arith.constant 0 : i32
    return %c0_i32, %c0_i32_0 : i32, i32
  }
  func.func @transform_2(%arg0: i32) -> (i32, i32) {
    %c0_i32 = arith.constant 0 : i32
    %c0_i32_0 = arith.constant 0 : i32
    %c0_i32_1 = arith.constant 0 : i32
    return %c0_i32, %c0_i32_0 : i32, i32
  }
  func.func @transform_3(%arg0: i32) -> (i32, i32) {
    %c0_i32 = arith.constant 0 : i32
    %c0_i32_0 = arith.constant 0 : i32
    %c0_i32_1 = arith.constant 0 : i32
    return %c0_i32, %c0_i32_0 : i32, i32
  }
  func.func @transform_4(%arg0: i32) -> (i32, i32, i32, i32) {
    %c0_i32 = arith.constant 0 : i32
    %c0_i32_0 = arith.constant 0 : i32
    %c0_i32_1 = arith.constant 0 : i32
    %c0_i32_2 = arith.constant 0 : i32
    return %arg0, %c0_i32, %c0_i32_0, %c0_i32_1 : i32, i32, i32, i32
  }
  func.func @transform_5(%arg0: i32) -> (i32, i32, i32) {
    %c0_i32 = arith.constant 0 : i32
    %c0_i32_0 = arith.constant 0 : i32
    %c0_i32_1 = arith.constant 0 : i32
    return %arg0, %c0_i32, %c0_i32_0 : i32, i32, i32
  }
  func.func @transform_6(%arg0: i32) -> (i32, i32, i32) {
    %c0_i32 = arith.constant 0 : i32
    %c0_i32_0 = arith.constant 0 : i32
    %c0_i32_1 = arith.constant 0 : i32
    return %arg0, %c0_i32, %c0_i32_0 : i32, i32, i32
  }
}

</mosaic_0001>

<bundles_post_ra>
// kernel: double_conv.5
= control target key start
LH: loop header
LB: loop body
LE: loop exit
PB: predicated region body
PF: predicated region fallthrough
CT: control target
= control target key end

     0   :  { %s525_s12 = smov 0   ;;  %s527_s13 = smov 0   ;;  %s654_s0 = inlined_call_operand.vmem [shape: f32[2,16,16,128], index: 0, kind: input, shape index: {}]   ;;  %s655_s1 = inlined_call_operand.vmem [shape: f32[1,128], index: 1, kind: input, shape index: {}]   ;;  %s656_s2 = inlined_call_operand.vmem [shape: f32[1,128], index: 2, kind: input, shape index: {}]   ;;  %s657_s3 = inlined_call_operand.vmem [shape: f32[2,16,16,128], index: 3, kind: output, shape index: {}]  }
   0x1   :  { %s529_s14 = smov 0   ;;  %s531_s15 = smov 0  }
   0x2   :  { %s533_s16 = smov 0  }
   0x3 LB: > { %s22_s17 = sadd.s32 1, %s495_s14  ;;  %s25_s18 = sadd.s32 1, %s499_s15  ;;  %s503_s16 = sphi %s533_s16, %s13_s16   ;;  %s499_s15 = sphi %s531_s15, %s661_s15   ;;  %s495_s14 = sphi %s529_s14, %s660_s14   ;;  %s491_s13 = sphi %s527_s13, %s659_s13   ;;  %s487_s12 = sphi %s525_s12, %s658_s12  }
   0x4   : > { %p23_p0 = scmp.ge.s32.totalorder %s22_s17, 2  ;;  %p412_p1 = scmp.ge.s32.totalorder %s503_s16, 1 }
   0x5   : > { %p159_p2 = scmp.lt.s32.totalorder %s503_s16, 5 }
   0x6   : > { %s663_s17 = smov (%p23_p0, %s22_s17), 0  ;;  %s665_s18 = smov (!%p23_p0, %s25_s18), %s499_s15 }
   0x7   : > { %p160_p3 = pnand %p412_p1, %p159_p2  ;;  %p27_p4 = scmp.ge.s32.totalorder %s665_s18, 2 }
   0x8   : > { %s413_s19 = sshll.u32 (!%p160_p3), %s487_s12, 3  ;;  %p194_p5 = scmp.lt.s32.totalorder (!%p160_p3), %s491_s13, 1  ;;  %v558_v0 = vld [vmem:[%s655_s1] ss:$0 sm:$0xff] (!%p160_p3) }
   0x9   : > { %s667_s18 = smov (%p27_p4, %s665_s18), 0  ;;  %163 = sbr.rel (%p160_p3) target bundleno = 39 (0x27), region = 32 }
   0xa   : > { %p196_p6 = scmp.lt.s32.totalorder (!%p160_p3), %s413_s19, 15  ;;  %v568_v1 = vld [vmem:[%s656_s2] ss:$0 sm:$0xff] (!%p160_p3) }
  0x10   : > { %s669_s13 = smov (!%p194_p5, %s491_s13), 1  ;;  %s671_s19 = smov (!%p196_p6, %s413_s19), 15 }
  0x11   : > { %s415_s20 = sshll.u32 %s669_s13, 5  ;;  %s414_s21 = sshll.u32 %s671_s19, 1 }
  0x12   : > { %s200_s22 = sadd.s32 %s415_s20, %s414_s21 }
  0x13   : > { %s416_s23 = sshll.u32 %s200_s22, 3 }
  0x14   : > { %s563_s28 = scalar_lea.vmem %s654_s0, %s416_s23  ;;  %s591_s6 = scalar_lea.vmem %s657_s3, %s416_s23 }
  0x15   : > { %v217_v2 = vld [vmem:[%s563_s28] sm:$0xff]  ;;  %v218_v3 = vld [vmem:[%s563_s28 + $0x8] sm:$0xff]  ;;  %v219_v4 = vld [vmem:[%s563_s28 + $0x10] sm:$0xff] }
  0x16   : > { %v239_v5 = vmul.f32 %v558_v0, %v217_v2  ;;  %v240_v6 = vmul.f32 %v558_v0, %v218_v3  ;;  %v241_v7 = vmul.f32 %v558_v0, %v219_v4  ;;  %v220_v8 = vld [vmem:[%s563_s28 + $0x18] sm:$0xff]  ;;  %v221_v9 = vld [vmem:[%s563_s28 + $0x20] sm:$0xff]  ;;  %v222_v10 = vld [vmem:[%s563_s28 + $0x28] sm:$0xff] }
  0x17   : > { %v242_v11 = vmul.f32 %v558_v0, %v220_v8  ;;  %v243_v12 = vmul.f32 %v558_v0, %v221_v9  ;;  %v244_v13 = vmul.f32 %v558_v0, %v222_v10  ;;  %v223_v14 = vld [vmem:[%s563_s28 + $0x30] sm:$0xff]  ;;  %v224_v15 = vld [vmem:[%s563_s28 + $0x38] sm:$0xff]  ;;  %v225_v24 = vld [vmem:[%s563_s28 + $0x40] sm:$0xff] }
  0x18   : > { %v261_v16 = vadd.f32 %v568_v1, %v239_v5  ;;  %v262_v17 = vadd.f32 %v568_v1, %v240_v6  ;;  %v263_v18 = vadd.f32 %v568_v1, %v241_v7  ;;  %v245_v19 = vmul.f32 %v558_v0, %v223_v14  ;;  %v226_v25 = vld [vmem:[%s563_s28 + $0x48] sm:$0xff]  ;;  %v227_v26 = vld [vmem:[%s563_s28 + $0x50] sm:$0xff]  ;;  %v228_v31 = vld [vmem:[%s563_s28 + $0x58] sm:$0xff] }
  0x19   : > { %v264_v20 = vadd.f32 %v568_v1, %v242_v11  ;;  %v265_v21 = vadd.f32 %v568_v1, %v243_v12  ;;  %v266_v22 = vadd.f32 %v568_v1, %v244_v13  ;;  %v246_v23 = vmul.f32 %v558_v0, %v224_v15  ;;  %v229_v32 = vld [vmem:[%s563_s28 + $0x60] sm:$0xff]  ;;  %v230_v33 = vld [vmem:[%s563_s28 + $0x68] sm:$0xff]  ;;  %v231_v38 = vld [vmem:[%s563_s28 + $0x70] sm:$0xff] }
  0x1a   : > { %v277_v27 = vmax.f32 %v261_v16, 0.0  ;;  %v278_v28 = vmax.f32 %v262_v17, 0.0  ;;  %v279_v29 = vmax.f32 %v263_v18, 0.0  ;;  %v267_v30 = vadd.f32 %v568_v1, %v245_v19  ;;  %v232_v43 = vld [vmem:[%s563_s28 + $0x78] sm:$0xff] }
  0x1b   : > { %v280_v34 = vmax.f32 %v264_v20, 0.0  ;;  %v281_v35 = vmax.f32 %v265_v21, 0.0  ;;  %v282_v36 = vmax.f32 %v266_v22, 0.0  ;;  %v268_v37 = vadd.f32 %v568_v1, %v246_v23 }
  0x1c   : > { %293 = vst [vmem:[%s591_s6] sm:$0xff] %v277_v27  ;;  %294 = vst [vmem:[%s591_s6 + $0x8] sm:$0xff] %v278_v28  ;;  %v283_v39 = vmax.f32 %v267_v30, 0.0  ;;  %v247_v40 = vmul.f32 %v558_v0, %v225_v24  ;;  %v248_v41 = vmul.f32 %v558_v0, %v226_v25  ;;  %v249_v42 = vmul.f32 %v558_v0, %v227_v26 }
  0x1d   : > { %295 = vst [vmem:[%s591_s6 + $0x10] sm:$0xff] %v279_v29  ;;  %296 = vst [vmem:[%s591_s6 + $0x18] sm:$0xff] %v280_v34  ;;  %v284_v44 = vmax.f32 %v268_v37, 0.0  ;;  %v250_v45 = vmul.f32 %v558_v0, %v228_v31  ;;  %v251_v46 = vmul.f32 %v558_v0, %v229_v32  ;;  %v252_v47 = vmul.f32 %v558_v0, %v230_v33 }
  0x1e   : > { %297 = vst [vmem:[%s591_s6 + $0x20] sm:$0xff] %v281_v35  ;;  %298 = vst [vmem:[%s591_s6 + $0x28] sm:$0xff] %v282_v36  ;;  %v269_v48 = vadd.f32 %v568_v1, %v247_v40  ;;  %v270_v49 = vadd.f32 %v568_v1, %v248_v41  ;;  %v271_v50 = vadd.f32 %v568_v1, %v249_v42 }
  0x1f   : > { %299 = vst [vmem:[%s591_s6 + $0x30] sm:$0xff] %v283_v39  ;;  %v253_v51 = vmul.f32 %v558_v0, %v231_v38  ;;  %300 = vst [vmem:[%s591_s6 + $0x38] sm:$0xff] %v284_v44  ;;  %v272_v52 = vadd.f32 %v568_v1, %v250_v45  ;;  %v273_v53 = vadd.f32 %v568_v1, %v251_v46 }
  0x20   : > { %v274_v54 = vadd.f32 %v568_v1, %v252_v47  ;;  %v254_v55 = vmul.f32 %v558_v0, %v232_v43  ;;  %v285_v56 = vmax.f32 %v269_v48, 0.0  ;;  %v286_v57 = vmax.f32 %v270_v49, 0.0 }
  0x21   : > { %v287_v58 = vmax.f32 %v271_v50, 0.0  ;;  %v275_v59 = vadd.f32 %v568_v1, %v253_v51  ;;  %v288_v60 = vmax.f32 %v272_v52, 0.0  ;;  %v289_v61 = vmax.f32 %v273_v53, 0.0 }
  0x22   : > { %v290_v62 = vmax.f32 %v274_v54, 0.0  ;;  %v276_v63 = vadd.f32 %v568_v1, %v254_v55  ;;  %301 = vst [vmem:[%s591_s6 + $0x40] sm:$0xff] %v285_v56  ;;  %302 = vst [vmem:[%s591_s6 + $0x48] sm:$0xff] %v286_v57 }
  0x23   : > { %303 = vst [vmem:[%s591_s6 + $0x50] sm:$0xff] %v287_v58  ;;  %v291_v2 = vmax.f32 %v275_v59, 0.0  ;;  %304 = vst [vmem:[%s591_s6 + $0x58] sm:$0xff] %v288_v60 }
  0x24   : > { %305 = vst [vmem:[%s591_s6 + $0x60] sm:$0xff] %v289_v61  ;;  %306 = vst [vmem:[%s591_s6 + $0x68] sm:$0xff] %v290_v62  ;;  %v292_v0 = vmax.f32 %v276_v63, 0.0 }
  0x25   : > { %307 = vst [vmem:[%s591_s6 + $0x70] sm:$0xff] %v291_v2 }
  0x26   : > { %308 = vst [vmem:[%s591_s6 + $0x78] sm:$0xff] %v292_v0 }
  0x27 PF: > { %s13_s16 = sadd.s32 1, %s503_s16   ;;  %s658_s12 = smov %s495_s14 }
  0x28   : > { %p10_p7 = scmp.ge.s32.totalorder %s13_s16, 6   ;;  %s659_s13 = smov %s499_s15 }
  0x29   : > { %s660_s14 = smov %s663_s17  ;;  %s661_s15 = smov %s667_s18 }
  0x2a   :  { %12 = sbr.rel (!%p10_p7) target bundleno = 3 (0x3), region = 62 }

// kernel: double_conv.3
= control target key start
LH: loop header
LB: loop body
LE: loop exit
PB: predicated region body
PF: predicated region fallthrough
CT: control target
= control target key end

     0   :  { %s3152_s15 = smov 0   ;;  %s4198_s0 = inlined_call_operand.vmem [shape: f32[2,16,16,128], index: 0, kind: input, shape index: {}]   ;;  %s4199_s1 = inlined_call_operand.vmem [shape: bf16[1152,128], index: 1, kind: input, shape index: {}]   ;;  %s4200_s2 = inlined_call_operand.vmem [shape: f32[2,16,16,128], index: 2, kind: output, shape index: {0}]   ;;  %s4201_s3 = inlined_call_operand.vmem [shape: f32[2,8,128], index: 3, kind: output, shape index: {1}]   ;;  %s4202_s4 = inlined_call_operand.vmem [shape: f32[2,8,128], index: 4, kind: output, shape index: {2}]  }
   0x1 LB: > { %s2411_s16 = sadd.s32 4294967295, %s3122_s15   ;;  %p2415_p0 = scmp.ge.s32.totalorder %s3122_s15, 1  ;;  %s3122_s15 = sphi %s3152_s15, %s15_s15  }
   0x2   : > { %p167_p1 = scmp.lt.s32.totalorder %s3122_s15, 3 }
   0x4   : > { %p168_p2 = pnand %p2415_p0, %p167_p1 }
   0x5   : > { %v3043_v0 = vld [vmem:[%s4199_s1 + $0x40] sm:$0xff] (!%p168_p2)   ;;  %v3124_v2 = vmov (!%p168_p2), 0.0   ;;  %v3045_v3 = vld [vmem:[%s4199_s1 + $0x48] sm:$0xff] (!%p168_p2)   ;;  %p201_p3 = scmp.lt.s32.totalorder (!%p168_p2), %s2411_s16, 1  ;;  %v3047_v5 = vld [vmem:[%s4199_s1 + $0x50] sm:$0xff] (!%p168_p2)   ;;  %v3125_v12 = vmov (!%p168_p2), 0  }
   0x6   : > { %171 = sbr.rel (%p168_p2) target bundleno = 568 (0x238), region = 28  ;;  %v3044_v1 = vld [vmem:[%s4199_s1] sm:$0xff] (!%p168_p2)   ;;  %220 = vst [vmem:[#allocation2] sm:$0xff] (!%p168_p2), %v3124_v2  ;;  %222 = vst [vmem:[#allocation2 + $0x10] sm:$0x3] (!%p168_p2), %v3124_v2  ;;  %2498 = vmatprep.subr.bf16.mxu0 (!%p168_p2), %v3043_v0  ;;  %3018 = vmatprep.subr.bf16.mxu1 (!%p168_p2), %v3043_v0  ;;  %v3046_v4 = vld [vmem:[%s4199_s1 + $0x8] sm:$0xff] (!%p168_p2)  }
   0x7   : > { %223 = vst [vmem:[#allocation2 + $0x18] sm:$0xff] (!%p168_p2), %v3124_v2  ;;  %224 = vst [vmem:[#allocation2 + $0x20] sm:$0xff] (!%p168_p2), %v3124_v2  ;;  %2499 = vmatpush3.bf16.msra.mxu0 (!%p168_p2), %v3044_v1  ;;  %3026 = vmatpush3.bf16.msra.mxu1 (!%p168_p2), %v3044_v1  ;;  %v3048_v6 = vld [vmem:[%s4199_s1 + $0x10] sm:$0xff] (!%p168_p2)   ;;  %v3049_v7 = vld [vmem:[%s4199_s1 + $0x58] sm:$0xff] (!%p168_p2)   ;;  %v435_v13 = vrot.slane (!%p168_p2), %v3125_v12, 1  ;;  %v3126_v56 = vmov (!%p168_p2), 0.0|0.0  }
   0x8   : > { %225 = vst [vmem:[#allocation2 + $0x28] sm:$0x3] (!%p168_p2), %v3124_v2  ;;  %226 = vst [vmem:[#allocation2 + $0x30] sm:$0xff] (!%p168_p2), %v3124_v2  ;;  %2500 = vmatprep.subr.bf16.mxu0 (!%p168_p2), %v3045_v3  ;;  %3019 = vmatprep.subr.bf16.mxu1 (!%p168_p2), %v3045_v3  ;;  %v3050_v8 = vld [vmem:[%s4199_s1 + $0x18] sm:$0xff] (!%p168_p2)   ;;  %v3051_v9 = vld [vmem:[%s4199_s1 + $0x60] sm:$0xff] (!%p168_p2)   ;;  %vm670_vm1 = vcmask (!%p168_p2), 1046528  }
   0x9   : > { %227 = vst [vmem:[#allocation2 + $0x38] sm:$0xff] (!%p168_p2), %v3124_v2  ;;  %228 = vst [vmem:[#allocation2 + $0x40] sm:$0x3] (!%p168_p2), %v3124_v2  ;;  %v3052_v10 = vld [vmem:[%s4199_s1 + $0x20] sm:$0xff] (!%p168_p2)   ;;  %v3053_v11 = vld [vmem:[%s4199_s1 + $0x68] sm:$0xff] (!%p168_p2)  }
   0xa   : > { %229 = vst [vmem:[#allocation2 + $0x48] sm:$0xff] (!%p168_p2), %v3124_v2  ;;  %230 = vst [vmem:[#allocation2 + $0x50] sm:$0xff] (!%p168_p2), %v3124_v2  ;;  %v3054_v18 = vld [vmem:[%s4199_s1 + $0x28] sm:$0xff] (!%p168_p2)   ;;  %v3055_v19 = vld [vmem:[%s4199_s1 + $0x70] sm:$0xff] (!%p168_p2)   ;;  %vm429_vm0 = vsmask.f32 (!%p168_p2), 7424 }
   0xb   : > { %231 = vst [vmem:[#allocation2 + $0x58] sm:$0x3] (!%p168_p2), %v3124_v2  ;;  %232 = vst [vmem:[#allocation2 + $0x60] sm:$0xff] (!%p168_p2), %v3124_v2  ;;  %2501 = vmatpush3.bf16.msra.mxu0 (!%p168_p2), %v3046_v4  ;;  %3027 = vmatpush3.bf16.msra.mxu1 (!%p168_p2), %v3046_v4  ;;  %v3056_v22 = vld [vmem:[%s4199_s1 + $0x30] sm:$0xff] (!%p168_p2)   ;;  %v3057_v23 = vld [vmem:[%s4199_s1 + $0x78] sm:$0xff] (!%p168_p2)  }
   0xc   : > { %233 = vst [vmem:[#allocation2 + $0x68] sm:$0xff] (!%p168_p2), %v3124_v2  ;;  %234 = vst [vmem:[#allocation2 + $0x70] sm:$0x3] (!%p168_p2), %v3124_v2  ;;  %2502 = vmatprep.subr.bf16.mxu0 (!%p168_p2), %v3047_v5  ;;  %3020 = vmatprep.subr.bf16.mxu1 (!%p168_p2), %v3047_v5  ;;  %v3058_v34 = vld [vmem:[%s4199_s1 + $0x38] sm:$0xff] (!%p168_p2)   ;;  %v3059_v38 = vld [vmem:[%s4199_s1 + $0xc0] sm:$0xff] (!%p168_p2)  }
   0xd   : > { %235 = vst [vmem:[#allocation2 + $0x78] sm:$0xff] %v3124_v2  ;;  %236 = vst [vmem:[#allocation2 + $0x80] sm:$0xff] %v3124_v2  ;;  %s4204_s16 = smov (!%p201_p3, %s2411_s16), 1  ;;  %v341_v14 = vld [vmem:[#allocation2 + $0x10] sm:$0x3]  ;;  %v3060_v39 = vld [vmem:[%s4199_s1 + $0x140] sm:$0xff]  }
   0xe   : > { %237 = vst [vmem:[#allocation2 + $0x88] sm:$0x3] %v3124_v2  ;;  %238 = vst [vmem:[#allocation2 + $0x90] sm:$0xff] %v3124_v2  ;;  %s2496_s5 = sshll.u32 %s4204_s16, 8  ;;  %v3209_v17 = vpack.c.bf16 %v341_v14, %v341_v14  ;;  %v3061_v42 = vld [vmem:[%s4199_s1 + $0x80] sm:$0xff]   ;;  %v3063_v45 = vld [vmem:[%s4199_s1 + $0xc8] sm:$0xff]  }
   0xf   : > { %239 = vst [vmem:[#allocation2 + $0x98] sm:$0xff] %v3124_v2  ;;  %240 = vst [vmem:[#allocation2 + $0xa0] sm:$0x3] %v3124_v2  ;;  %2503 = vmatpush3.bf16.msra.mxu0 %v3048_v6  ;;  %3028 = vmatpush3.bf16.msra.mxu1 %v3048_v6  ;;  %s3199_s12 = scalar_lea.vmem %s4198_s0, %s2496_s5  ;;  %v3062_v43 = vld [vmem:[%s4199_s1 + $0x100] sm:$0xff]   ;;  %v3068_v51 = vld [vmem:[%s4199_s1 + $0x148] sm:$0xff]   ;;  %s4104_s7 = scalar_lea.vmem %s4200_s2, %s2496_s5 }
  0x10   : > { %241 = vst [vmem:[#allocation2 + $0xa8] sm:$0xff] %v3124_v2  ;;  %242 = vst [vmem:[#allocation2 + $0xb0] sm:$0xff] %v3124_v2  ;;  %2504 = vmatprep.subr.bf16.mxu0 %v3049_v7  ;;  %3021 = vmatprep.subr.bf16.mxu1 %v3049_v7  ;;  %v296_v15 = vld [vmem:[%s3199_s12 + $0xb0] sm:$0xff]  ;;  %v297_v16 = vld [vmem:[%s3199_s12 + $0xb8] sm:$0xff]  ;;  %v438_v20 = vshll.u32 %v3209_v17, 16  ;;  %s2420_s5 = sshll.u32 %s4204_s16, 3 }
  0x11   : > { %243 = vst [vmem:[#allocation2 + $0xb8] sm:$0x3] %v3124_v2  ;;  %244 = vst [vmem:[#allocation2 + $0xc0] sm:$0xff] %v3124_v2  ;;  %v274_v25 = vld [vmem:[%s3199_s12] sm:$0xff]  ;;  %v275_v26 = vld [vmem:[%s3199_s12 + $0x8] sm:$0xff]  ;;  %s214_s10 = scalar_lea.vmem %s4201_s3, %s2420_s5  ;;  %s218_s14 = scalar_lea.vmem %s4202_s4, %s2420_s5 }
  0x12   : > { %245 = vst [vmem:[#allocation2 + $0xc8] sm:$0xff] %v3124_v2  ;;  %246 = vst [vmem:[#allocation2 + $0xd0] sm:$0x3] %v3124_v2  ;;  %v440_v21 = vrot.slane %v438_v20, 1  ;;  %v298_v32 = vld [vmem:[%s3199_s12 + $0xc0] sm:$0xff]  ;;  %v299_v33 = vld [vmem:[%s3199_s12 + $0xc8] sm:$0xff] }
  0x13   : > { %247 = vst [vmem:[#allocation2 + $0xd8] sm:$0xff] %v3124_v2  ;;  %248 = vst [vmem:[#allocation2 + $0xe0] sm:$0xff] %v3124_v2  ;;  %2505 = vmatpush3.bf16.msra.mxu0 %v3050_v8  ;;  %3029 = vmatpush3.bf16.msra.mxu1 %v3050_v8  ;;  %v3064_v57 = vld [vmem:[%s4199_s1 + $0x88] sm:$0xff]   ;;  %v276_v63 = vld [vmem:[%s3199_s12 + $0x10] sm:$0xff] }
  0x14   : > { %249 = vst [vmem:[#allocation2 + $0xe8] sm:$0x3] %v3124_v2  ;;  %250 = vst [vmem:[#allocation2 + $0xf0] sm:$0xff] %v3124_v2  ;;  %2506 = vmatprep.subr.bf16.mxu0 %v3051_v9  ;;  %3022 = vmatprep.subr.bf16.mxu1 %v3051_v9  ;;  %v441_v24 = vsel %vm429_vm0, %v435_v13, %v440_v21  ;;  %v3070_v62 = vld [vmem:[%s4199_s1 + $0x108] sm:$0xff]   ;;  %v277_v0 = vld [vmem:[%s3199_s12 + $0x18] sm:$0xff] }
  0x15   : > { %251 = vst [vmem:[#allocation2 + $0xf8] sm:$0xff] %v3124_v2  ;;  %252 = vst [vmem:[#allocation2 + $0x100] sm:$0x3] %v3124_v2  ;;  %1381 = vmatprep.mubr.bf16.mxu0 %v441_v24  ;;  %v301_v3 = vld [vmem:[%s3199_s12 + $0xd8] sm:$0xff]  ;;  %v3065_v9 = vld [vmem:[%s4199_s1 + $0xd0] sm:$0xff]  }
  0x16   : > { %253 = vst [vmem:[#allocation2 + $0x108] sm:$0xff] %v3124_v2  ;;  %254 = vst [vmem:[#allocation2 + $0x110] sm:$0xff] %v3124_v2  ;;  %v3066_v13 = vld [vmem:[%s4199_s1 + $0x90] sm:$0xff]   ;;  %v302_v20 = vld [vmem:[%s3199_s12 + $0xe0] sm:$0xff] }
  0x17   : > { %255 = vst [vmem:[#allocation2 + $0x118] sm:$0x3] %v3124_v2  ;;  %256 = vst [vmem:[#allocation2 + $0x120] sm:$0xff] %v3124_v2  ;;  %2507 = vmatpush3.bf16.msra.mxu0 %v3052_v10  ;;  %3030 = vmatpush3.bf16.msra.mxu1 %v3052_v10  ;;  %v303_v21 = vld [vmem:[%s3199_s12 + $0xe8] sm:$0xff] }
  0x18   : > { %257 = vst [vmem:[#allocation2 + $0x128] sm:$0xff] %v3124_v2  ;;  %258 = vst [vmem:[#allocation2 + $0x130] sm:$0x3] %v3124_v2  ;;  %2508 = vmatprep.subr.bf16.mxu0 %v3053_v11  ;;  %3023 = vmatprep.subr.bf16.mxu1 %v3053_v11 }
  0x19   : > { %259 = vst [vmem:[#allocation2 + $0x138] sm:$0xff] %v3124_v2  ;;  %260 = vst [vmem:[#allocation2 + $0x140] sm:$0xff] %v3124_v2 }
  0x1a   : > { %261 = vst [vmem:[#allocation2 + $0x148] sm:$0x3] %v3124_v2  ;;  %262 = vst [vmem:[#allocation2 + $0x150] sm:$0xff] %v3124_v2 }
  0x1b   : > { %263 = vst [vmem:[#allocation2 + $0x158] sm:$0xff] %v3124_v2  ;;  %264 = vst [vmem:[#allocation2 + $0x160] sm:$0x3] %v3124_v2  ;;  %2509 = vmatpush3.bf16.msra.mxu0 %v3054_v18  ;;  %3031 = vmatpush3.bf16.msra.mxu1 %v3054_v18  ;;  %v278_v18 = vld [vmem:[%s3199_s12 + $0x20] sm:$0xff] }
  0x1c   : > { %265 = vst [vmem:[#allocation2 + $0x168] sm:$0xff] %v3124_v2  ;;  %266 = vst [vmem:[#allocation2 + $0x170] sm:$0xff] %v3124_v2  ;;  %2510 = vmatprep.subr.bf16.mxu0 %v3055_v19  ;;  %3024 = vmatprep.subr.bf16.mxu1 %v3055_v19  ;;  %v279_v19 = vld [vmem:[%s3199_s12 + $0x28] sm:$0xff] }
  0x1d   : > { %267 = vst [vmem:[#allocation2 + $0x178] sm:$0x3] %v3124_v2  ;;  %268 = vst [vmem:[#allocation2 + $0x180] sm:$0xff] %v3124_v2 }
  0x1e   : > { %269 = vst [vmem:[#allocation2 + $0x188] sm:$0xff] %v3124_v2  ;;  %270 = vst [vmem:[#allocation2 + $0x190] sm:$0x3] %v3124_v2 }
  0x1f   : > { %273 = vst [vmem:[#allocation2 + $0x1a8] sm:$0x3] %v3124_v2  ;;  %329 = vst [vmem:[#allocation2 + $0x121] sm:$0xff] %v296_v15  ;;  %2511 = vmatpush3.bf16.msra.mxu0 %v3056_v22  ;;  %3032 = vmatpush3.bf16.msra.mxu1 %v3056_v22  ;;  %v300_v2 = vld [vmem:[%s3199_s12 + $0xd0] sm:$0xff] }
  0x20   : > { %330 = vst [vmem:[#allocation2 + $0x129] sm:$0xff] %v297_v16  ;;  %307 = vst [vmem:[#allocation2 + $0x19] sm:$0xff] %v274_v25  ;;  %2512 = vmatprep.subr.bf16.mxu0 %v3057_v23  ;;  %3025 = vmatprep.subr.bf16.mxu1 %v3057_v23  ;;  %v3067_v16 = vld [vmem:[%s4199_s1 + $0xd8] sm:$0xff]  }
  0x21   : > { %308 = vst [vmem:[#allocation2 + $0x21] sm:$0xff] %v275_v26  ;;  %331 = vst [vmem:[#allocation2 + $0x139] sm:$0xff] %v298_v32 }
  0x22   : > { %332 = vst [vmem:[#allocation2 + $0x141] sm:$0xff] %v299_v33  ;;  %309 = vst [vmem:[#allocation2 + $0x31] sm:$0xff] %v276_v63  ;;  %v3069_v33 = vld [vmem:[%s4199_s1 + $0x98] sm:$0xff]  }
  0x23   : > { %2513 = vmatpush3.bf16.msra.mxu0 %v3058_v34  ;;  %3033 = vmatpush3.bf16.msra.mxu1 %v3058_v34  ;;  %310 = vst [vmem:[#allocation2 + $0x39] sm:$0xff] %v277_v0  ;;  %333 = vst [vmem:[#allocation2 + $0x151] sm:$0xff] %v300_v2  ;;  %v3078_v2 = vld [vmem:[%s4199_s1 + $0x110] sm:$0xff]  }
  0x24   : > { %2610 = vmatprep.subr.bf16.mxu1 %v3059_v38  ;;  %2722 = vmatprep.subr.bf16.mxu0 %v3060_v39  ;;  %334 = vst [vmem:[#allocation2 + $0x159] sm:$0xff] %v301_v3  ;;  %311 = vst [vmem:[#allocation2 + $0x49] sm:$0xff] %v278_v18  ;;  %v3076_v39 = vld [vmem:[%s4199_s1 + $0x150] sm:$0xff]   ;;  %v281_v18 = vld [vmem:[%s3199_s12 + $0x38] sm:$0xff] }
  0x25   : > { %312 = vst [vmem:[#allocation2 + $0x51] sm:$0xff] %v279_v19  ;;  %335 = vst [vmem:[#allocation2 + $0x169] sm:$0xff] %v302_v20 }
  0x26   : > { %v375_v27 = vld [vmem:[#allocation2 + $0x120] sm:$0xff]  ;;  %1382 = vmatmul.mubr.bf16.vlgmr.msra.gmra.mrb[0].mxu0 %v3126_v56  ;;  %336 = vst [vmem:[#allocation2 + $0x171] sm:$0xff] %v303_v21  ;;  %314 = vst [vmem:[#allocation2 + $0x69] sm:$0xff] %v281_v18  ;;  %v3074_v21 = vld [vmem:[%s4199_s1 + $0xa8] sm:$0xff]  }
  0x27   : > { %v376_v28 = vld [vmem:[#allocation2 + $0x128] sm:$0xff]  ;;  %v377_v29 = vld [vmem:[#allocation2 + $0x130] sm:$0x3]  ;;  %v342_v46 = vld [vmem:[#allocation2 + $0x18] sm:$0xff]  ;;  %2723 = vmatpush3.bf16.msra.mxu0 %v3062_v43 }
  0x28   : > { %v3227_v30 = vpack.c.bf16 %v376_v28, %v375_v27  ;;  %v3229_v31 = vpack.c.bf16 %v377_v29, %v377_v29  ;;  %v343_v47 = vld [vmem:[#allocation2 + $0x20] sm:$0xff]  ;;  %v344_v48 = vld [vmem:[#allocation2 + $0x28] sm:$0x3]  ;;  %v378_v53 = vld [vmem:[#allocation2 + $0x138] sm:$0xff]  ;;  %2724 = vmatprep.subr.bf16.mxu0 %v3068_v51 }
  0x29   : > { %v3254_v49 = vpack.c.bf16 %v343_v47, %v342_v46  ;;  %v3256_v50 = vpack.c.bf16 %v344_v48, %v344_v48  ;;  %v379_v54 = vld [vmem:[#allocation2 + $0x140] sm:$0xff]  ;;  %v380_v55 = vld [vmem:[#allocation2 + $0x148] sm:$0x3]  ;;  %v345_v23 = vld [vmem:[#allocation2 + $0x30] sm:$0xff] }
  0x2a   : > { %v575_v35 = vshrl.u32 %v3227_v30, 16  ;;  %v577_v36 = vshll.u32 %v3227_v30, 16  ;;  %v582_v37 = vshll.u32 %v3229_v31, 16  ;;  %v3272_v61 = vpack.c.bf16 %v379_v54, %v378_v53  ;;  %v346_v24 = vld [vmem:[#allocation2 + $0x38] sm:$0xff]  ;;  %v347_v25 = vld [vmem:[#allocation2 + $0x40] sm:$0x3] }
  0x2b   : > { %v443_v58 = vshrl.u32 %v3254_v49, 16  ;;  %v445_v59 = vshll.u32 %v3254_v49, 16  ;;  %v450_v60 = vshll.u32 %v3256_v50, 16  ;;  %v3280_v1 = vpack.c.bf16 %v380_v55, %v380_v55  ;;  %2725 = vmatpush3.bf16.msra.mxu0 %v3070_v62  ;;  %v381_v28 = vld [vmem:[#allocation2 + $0x150] sm:$0xff]  ;;  %v382_v29 = vld [vmem:[#allocation2 + $0x158] sm:$0xff]  ;;  %v3071_v43 = vld [vmem:[%s4199_s1 + $0xe0] sm:$0xff]  }
  0x2c   : > { %v579_v40 = vrot.slane %v577_v36, 1  ;;  %v584_v41 = vrot.slane %v582_v37, 1  ;;  %v587_v6 = vshrl.u32 %v3272_v61, 16  ;;  %v589_v7 = vshll.u32 %v3272_v61, 16  ;;  %v383_v32 = vld [vmem:[#allocation2 + $0x160] sm:$0x3]  ;;  %2726 = vmatprep.subr.bf16.mxu0 %v3076_v39 }
  0x2d   : > { %v447_v4 = vrot.slane %v445_v59, 1  ;;  %v452_v5 = vrot.slane %v450_v60, 1  ;;  %v594_v8 = vshll.u32 %v3280_v1, 16  ;;  %v3309_v26 = vpack.c.bf16 %v346_v24, %v345_v23  ;;  %v348_v48 = vld [vmem:[#allocation2 + $0x48] sm:$0xff]  ;;  %v349_v51 = vld [vmem:[#allocation2 + $0x50] sm:$0xff] }
  0x2e   : > { %v580_v44 = vor.u32 %v579_v40, %v575_v35  ;;  %v591_v11 = vrot.slane %v589_v7, 1  ;;  %v3311_v27 = vpack.c.bf16 %v347_v25, %v347_v25  ;;  %v3317_v34 = vpack.c.bf16 %v382_v29, %v381_v28  ;;  %v350_v53 = vld [vmem:[#allocation2 + $0x58] sm:$0x3]  ;;  %v385_v59 = vld [vmem:[#allocation2 + $0x170] sm:$0xff]  ;;  %v283_v39 = vld [vmem:[%s3199_s12 + $0x48] sm:$0xff] }
  0x2f   : > { %v448_v10 = vor.u32 %v447_v4, %v443_v58  ;;  %v596_v12 = vrot.slane %v594_v8, 1  ;;  %v3319_v35 = vpack.c.bf16 %v383_v32, %v383_v32  ;;  %v455_v36 = vshrl.u32 %v3309_v26, 16  ;;  %v384_v58 = vld [vmem:[#allocation2 + $0x168] sm:$0xff]  ;;  %v386_v60 = vld [vmem:[#allocation2 + $0x178] sm:$0x3]  ;;  %v3072_v4 = vld [vmem:[%s4199_s1 + $0xa0] sm:$0xff]   ;;  %2727 = vmatpush3.bf16.msra.mxu0 %v3078_v2 }
  0x30   : > { %v3262_v52 = vsel %vm429_vm0, %v580_v44, %v584_v41  ;;  %v592_v15 = vor.u32 %v591_v11, %v587_v6  ;;  %v457_v37 = vshll.u32 %v3309_v26, 16  ;;  %v462_v38 = vshll.u32 %v3311_v27, 16  ;;  %v3075_v25 = vld [vmem:[%s4199_s1 + $0xf0] sm:$0xff]   ;;  %v3083_v32 = vld [vmem:[%s4199_s1 + $0x158] sm:$0xff]   ;;  %316 = vst [vmem:[#allocation2 + $0x81] sm:$0xff] %v283_v39  ;;  %v287_v2 = vld [vmem:[%s3199_s12 + $0x68] sm:$0xff] }
  0x31   : > { %1477 = vmatprep.mubr.bf16.mxu1 %v3262_v52  ;;  %v3294_v14 = vsel %vm429_vm0, %v448_v10, %v452_v5  ;;  %v599_v40 = vshrl.u32 %v3317_v34, 16  ;;  %v601_v41 = vshll.u32 %v3317_v34, 16  ;;  %v3333_v55 = vpack.c.bf16 %v349_v51, %v348_v48  ;;  %v3077_v29 = vld [vmem:[%s4199_s1 + $0xb0] sm:$0xff]   ;;  %2728 = vmatprep.subr.bf16.mxu0 %v3083_v32  ;;  %320 = vst [vmem:[#allocation2 + $0xb1] sm:$0xff] %v287_v2  ;;  %v290_v2 = vld [vmem:[%s3199_s12 + $0x80] sm:$0xff] }
  0x32   : > { %1478 = vmatmul.mubr.bf16.vlgmr.msra.gmra.mrb[0].mxu1 %v3227_v30  ;;  %1389 = vmatprep.mubr.bf16.mxu0 %v3294_v14  ;;  %v3305_v22 = vsel %vm429_vm0, %v592_v15, %v596_v12  ;;  %v459_v44 = vrot.slane %v457_v37, 1  ;;  %v3337_v63 = vpack.c.bf16 %v385_v59, %v384_v58  ;;  %v3339_v0 = vpack.c.bf16 %v386_v60, %v386_v60  ;;  %v3084_v37 = vld [vmem:[%s4199_s1 + $0x118] sm:$0xff]  }
  0x33   : > { %2611 = vmatpush3.bf16.msra.mxu1 %v3061_v42  ;;  %1390 = vmatmul.mubr.bf16.gmra.mrb[4].mxu0 %v3254_v49  ;;  %v606_v42 = vshll.u32 %v3319_v35, 16  ;;  %v603_v46 = vrot.slane %v601_v41, 1  ;;  %v467_v5 = vshrl.u32 %v3333_v55, 16  ;;  %v469_v6 = vshll.u32 %v3333_v55, 16  ;;  %v285_v41 = vld [vmem:[%s3199_s12 + $0x58] sm:$0xff]  ;;  %323 = vst [vmem:[#allocation2 + $0xd9] sm:$0xff] %v290_v2 }
  0x34   : > { %2612 = vmatprep.subr.bf16.mxu1 %v3063_v45  ;;  %1485 = vmatprep.mubr.bf16.mxu1 %v3305_v22  ;;  %v464_v45 = vrot.slane %v462_v38, 1  ;;  %v460_v54 = vor.u32 %v459_v44, %v455_v36  ;;  %v611_v10 = vshrl.u32 %v3337_v63, 16  ;;  %v613_v11 = vshll.u32 %v3337_v63, 16  ;;  %v3079_v36 = vld [vmem:[%s4199_s1 + $0xf8] sm:$0xff]   ;;  %v282_v38 = vld [vmem:[%s3199_s12 + $0x40] sm:$0xff]  ;;  %318 = vst [vmem:[#allocation2 + $0x99] sm:$0xff] %v285_v41 }
  0x35   : > { %v608_v47 = vrot.slane %v606_v42, 1  ;;  %v604_v62 = vor.u32 %v603_v46, %v599_v40  ;;  %v618_v12 = vshll.u32 %v3339_v0, 16  ;;  %315 = vst [vmem:[#allocation2 + $0x79] sm:$0xff] %v282_v38  ;;  %v284_v40 = vld [vmem:[%s3199_s12 + $0x50] sm:$0xff]  ;;  %v3085_v42 = vld [vmem:[%s4199_s1 + $0x160] sm:$0xff]   ;;  %v3080_v46 = vld [vmem:[%s4199_s1 + $0xb8] sm:$0xff]   ;;  %2729 = vmatpush3.bf16.msra.mxu0 %v3084_v37 }
  0x36   : > { %v3345_v3 = vsel %vm429_vm0, %v460_v54, %v464_v45  ;;  %v615_v19 = vrot.slane %v613_v11, 1  ;;  %317 = vst [vmem:[#allocation2 + $0x91] sm:$0xff] %v284_v40  ;;  %v353_v45 = vld [vmem:[#allocation2 + $0x70] sm:$0x3]  ;;  %v671_v51 = vrot.slane %v3126_v56, 1  ;;  %v3087_v54 = vld [vmem:[%s4199_s1 + $0x120] sm:$0xff]   ;;  %2730 = vmatprep.subr.bf16.mxu0 %v3085_v42 }
  0x37   : > { %2613 = vmatpush3.bf16.msra.mxu1 %v3064_v57  ;;  %v3335_v57 = vpack.c.bf16 %v350_v53, %v350_v53  ;;  %1397 = vmatprep.mubr.bf16.mxu0 %v3345_v3  ;;  %v3355_v8 = vsel %vm429_vm0, %v604_v62, %v608_v47  ;;  %v620_v20 = vrot.slane %v618_v12, 1  ;;  %v3408_v48 = vpack.c.bf16 %v353_v45, %v353_v45  ;;  %v3081_v56 = vld [vmem:[%s4199_s1 + $0x1c0] sm:$0xff]   ;;  %v3088_v40 = vld [vmem:[%s4199_s1 + $0x188] sm:$0xff]   ;;  %v288_v41 = vld [vmem:[%s3199_s12 + $0x70] sm:$0xff] }
  0x38   : > { %2614 = vmatprep.subr.bf16.mxu1 %v3065_v9  ;;  %v3073_v9 = vld [vmem:[%s4199_s1 + $0xe8] sm:$0xff]   ;;  %v616_v24 = vor.u32 %v615_v19, %v611_v10  ;;  %v672_v53 = vrot.slane %v3209_v17, 1  ;;  %v3082_v17 = vld [vmem:[%s4199_s1 + $0x180] sm:$0xff]   ;;  %v289_v42 = vld [vmem:[%s3199_s12 + $0x78] sm:$0xff]  ;;  %321 = vst [vmem:[#allocation2 + $0xc1] sm:$0xff] %v288_v41 }
  0x39   : > { %v474_v7 = vshll.u32 %v3335_v57, 16  ;;  %v486_v60 = vshll.u32 %v3408_v48, 16  ;;  %v286_v62 = vld [vmem:[%s3199_s12 + $0x60] sm:$0xff]  ;;  %2731 = vmatpush3.bf16.msra.mxu0 %v3087_v54  ;;  %v3086_v19 = vld [vmem:[%s4199_s1 + $0x1c8] sm:$0xff]   ;;  %322 = vst [vmem:[#allocation2 + $0xc9] sm:$0xff] %v289_v42 }
  0x3a   : > { %1486 = vmatmul.mubr.bf16.gmra.mrb[4].mxu1 %v3272_v61  ;;  %319 = vst [vmem:[#allocation2 + $0xa9] sm:$0xff] %v286_v62  ;;  %v673_v10 = vsel %vm670_vm1, %v671_v51, %v672_v53  ;;  %v3092_v62 = vld [vmem:[%s4199_s1 + $0x190] sm:$0xff]  }
  0x3b   : > { %2615 = vmatpush3.bf16.msra.mxu1 %v3066_v13  ;;  %1493 = vmatprep.mubr.bf16.mxu1 %v3355_v8  ;;  %v471_v13 = vrot.slane %v469_v6, 1  ;;  %v476_v15 = vrot.slane %v474_v7, 1  ;;  %v359_v18 = vld [vmem:[#allocation2 + $0xa0] sm:$0x3] }
  0x3c   : > { %2616 = vmatprep.subr.bf16.mxu1 %v3067_v16  ;;  %1398 = vmatmul.mubr.bf16.gmra.mrb[8].mxu0 %v3309_v26  ;;  %v280_v16 = vld [vmem:[%s3199_s12 + $0x30] sm:$0xff]  ;;  %v354_v6 = vld [vmem:[#allocation2 + $0x78] sm:$0xff]  ;;  %v355_v7 = vld [vmem:[#allocation2 + $0x80] sm:$0xff] }
  0x3d   : > { %313 = vst [vmem:[#allocation2 + $0x61] sm:$0xff] %v280_v16  ;;  %v472_v23 = vor.u32 %v471_v13, %v467_v5  ;;  %v488_v5 = vrot.slane %v486_v60, 1  ;;  %v3428_v11 = vpack.c.bf16 %v355_v7, %v354_v6  ;;  %v674_v13 = vrot.slane %v3254_v49, 1  ;;  %v358_v16 = vld [vmem:[#allocation2 + $0x98] sm:$0xff]  ;;  %v3093_v7 = vld [vmem:[%s4199_s1 + $0x170] sm:$0xff]  }
  0x3f   : > { %2617 = vmatpush3.bf16.msra.mxu1 %v3069_v33  ;;  %v3375_v28 = vsel %vm429_vm0, %v472_v23, %v476_v15  ;;  %v3385_v33 = vsel %vm429_vm0, %v616_v24, %v620_v20  ;;  %v357_v15 = vld [vmem:[#allocation2 + $0x90] sm:$0xff]  ;;  %v3439_v24 = vpack.c.bf16 %v359_v18, %v359_v18  ;;  %v293_v18 = vld [vmem:[%s3199_s12 + $0x98] sm:$0xff] }
  0x40   : > { %2618 = vmatprep.subr.bf16.mxu1 %v3071_v43  ;;  %1405 = vmatprep.mubr.bf16.mxu0 %v3375_v28  ;;  %v3437_v23 = vpack.c.bf16 %v358_v16, %v357_v15  ;;  %v677_v15 = vrot.slane %v3309_v26, 1  ;;  %v292_v16 = vld [vmem:[%s3199_s12 + $0x90] sm:$0xff]  ;;  %326 = vst [vmem:[#allocation2 + $0xf9] sm:$0xff] %v293_v18 }
  0x41   : > { %v510_v39 = vshll.u32 %v3439_v24, 16  ;;  %v360_v53 = vld [vmem:[#allocation2 + $0xa8] sm:$0xff]  ;;  %v361_v54 = vld [vmem:[#allocation2 + $0xb0] sm:$0xff]  ;;  %325 = vst [vmem:[#allocation2 + $0xf1] sm:$0xff] %v292_v16 }
  0x42   : > { %1494 = vmatmul.mubr.bf16.gmra.mrb[8].mxu1 %v3317_v34  ;;  %v503_v37 = vshrl.u32 %v3437_v23, 16  ;;  %v505_v38 = vshll.u32 %v3437_v23, 16 }
  0x43   : > { %2619 = vmatpush3.bf16.msra.mxu1 %v3072_v4  ;;  %1501 = vmatprep.mubr.bf16.mxu1 %v3385_v33  ;;  %v512_v60 = vrot.slane %v510_v39, 1 }
  0x44   : > { %2620 = vmatprep.subr.bf16.mxu1 %v3073_v9  ;;  %1406 = vmatmul.mubr.bf16.gmra.mrb[12].mxu0 %v3333_v55  ;;  %v351_v43 = vld [vmem:[#allocation2 + $0x60] sm:$0xff]  ;;  %v352_v44 = vld [vmem:[#allocation2 + $0x68] sm:$0xff]  ;;  %v507_v45 = vrot.slane %v505_v38, 1  ;;  %v3096_v38 = vld [vmem:[%s4199_s1 + $0x198] sm:$0xff]  }
  0x45   : > { %v3406_v47 = vpack.c.bf16 %v352_v44, %v351_v43  ;;  %v356_v9 = vld [vmem:[#allocation2 + $0x88] sm:$0x3] }
  0x46   : > { %v3430_v12 = vpack.c.bf16 %v356_v9, %v356_v9 }
  0x47   : > { %2621 = vmatpush3.bf16.msra.mxu1 %v3074_v21  ;;  %v479_v58 = vshrl.u32 %v3406_v47, 16  ;;  %v481_v59 = vshll.u32 %v3406_v47, 16  ;;  %v675_v21 = vrot.slane %v3256_v50, 1 }
  0x48   : > { %2622 = vmatprep.subr.bf16.mxu1 %v3075_v25  ;;  %v491_v25 = vshrl.u32 %v3428_v11, 16  ;;  %v498_v32 = vshll.u32 %v3430_v12, 16 }
  0x49   : > { %v483_v4 = vrot.slane %v481_v59, 1  ;;  %v508_v59 = vor.u32 %v507_v45, %v503_v37  ;;  %v3480_v6 = vsel %vm670_vm1, %v674_v13, %v675_v21  ;;  %v3095_v37 = vld [vmem:[%s4199_s1 + $0x1d8] sm:$0xff]  }
  0x4a   : > { %1502 = vmatmul.mubr.bf16.gmra.mrb[12].mxu1 %v3337_v63  ;;  %v500_v44 = vrot.slane %v498_v32, 1  ;;  %v678_v32 = vrot.slane %v3311_v27, 1  ;;  %v3097_v27 = vld [vmem:[%s4199_s1 + $0x178] sm:$0xff]  }
  0x4b   : > { %2623 = vmatpush3.bf16.msra.mxu1 %v3077_v29  ;;  %1542 = vmatprep.mubr.bf16.mxu1 %v3254_v49  ;;  %v484_v20 = vor.u32 %v483_v4, %v479_v58  ;;  %v3089_v49 = vld [vmem:[%s4199_s1 + $0x168] sm:$0xff]   ;;  %v493_v29 = vshll.u32 %v3428_v11, 16  ;;  %v362_v58 = vld [vmem:[#allocation2 + $0xb8] sm:$0x3] }
  0x4c   : > { %2624 = vmatprep.subr.bf16.mxu1 %v3079_v36  ;;  %v3090_v36 = vld [vmem:[%s4199_s1 + $0x128] sm:$0xff]   ;;  %2732 = vmatprep.subr.bf16.mxu0 %v3089_v49  ;;  %v363_v49 = vld [vmem:[#allocation2 + $0xc0] sm:$0xff] }
  0x4d   : > { %v3451_v50 = vsel %vm429_vm0, %v484_v20, %v488_v5  ;;  %v495_v43 = vrot.slane %v493_v29, 1  ;;  %2733 = vmatpush3.bf16.msra.mxu0 %v3090_v36  ;;  %v291_v4 = vld [vmem:[%s3199_s12 + $0x88] sm:$0xff]  ;;  %v365_v29 = vld [vmem:[#allocation2 + $0xd0] sm:$0x3] }
  0x4e   : > { %1413 = vmatprep.mubr.bf16.mxu0 %v3451_v50  ;;  %324 = vst [vmem:[#allocation2 + $0xe1] sm:$0xff] %v291_v4  ;;  %2734 = vmatprep.subr.bf16.mxu0 %v3093_v7  ;;  %v3514_v41 = vpack.c.bf16 %v365_v29, %v365_v29  ;;  %v680_v4 = vrot.slane %v3333_v55, 1  ;;  %v681_v7 = vrot.slane %v3335_v57, 1  ;;  %v3101_v57 = vld [vmem:[%s4199_s1 + $0x1a0] sm:$0xff]   ;;  %v683_v29 = vrot.slane %v3406_v47, 1 }
  0x4f   : > { %2625 = vmatpush3.bf16.msra.mxu1 %v3080_v46  ;;  %1414 = vmatmul.mubr.bf16.gmra.mrb[16].mxu0 %v3406_v47  ;;  %v3091_v46 = vld [vmem:[%s4199_s1 + $0x1d0] sm:$0xff]   ;;  %v496_v51 = vor.u32 %v495_v43, %v491_v25  ;;  %v364_v25 = vld [vmem:[#allocation2 + $0xc8] sm:$0xff]  ;;  %v366_v43 = vld [vmem:[#allocation2 + $0xd8] sm:$0xff] }
  0x50   : > { %2834 = vmatprep.subr.bf16.mxu1 %v3081_v56  ;;  %v3467_v56 = vpack.c.bf16 %v361_v54, %v360_v53  ;;  %v3501_v36 = vpack.c.bf16 %v364_v25, %v363_v49  ;;  %v3557_v49 = vsel %vm670_vm1, %v680_v4, %v681_v7  ;;  %v370_v25 = vld [vmem:[#allocation2 + $0xf8] sm:$0xff]  ;;  %v686_v7 = vrot.slane %v3428_v11, 1 }
  0x51   : > { %v3477_v5 = vsel %vm429_vm0, %v496_v51, %v500_v44  ;;  %v3518_v44 = vsel %vm670_vm1, %v677_v15, %v678_v32  ;;  %v294_v51 = vld [vmem:[%s3199_s12 + $0xa0] sm:$0xff] }
  0x52   : > { %1543 = vmatmul.mubr.bf16.vlgmr.msra.gmra.mrb[16].mxu1 %v673_v10  ;;  %1421 = vmatprep.mubr.bf16.mxu0 %v3477_v5  ;;  %v517_v9 = vshll.u32 %v3467_v56, 16  ;;  %v3094_v10 = vld [vmem:[%s4199_s1 + $0x130] sm:$0xff]   ;;  %v515_v13 = vshrl.u32 %v3467_v56, 16  ;;  %v529_v42 = vshll.u32 %v3501_v36, 16  ;;  %v527_v53 = vshrl.u32 %v3501_v36, 16  ;;  %327 = vst [vmem:[#allocation2 + $0x109] sm:$0xff] %v294_v51 }
  0x53   : > { %2835 = vmatpush3.bf16.msra.mxu1 %v3082_v17  ;;  %1550 = vmatprep.mubr.bf16.mxu1 %v3309_v26  ;;  %v3469_v17 = vpack.c.bf16 %v362_v58, %v362_v58  ;;  %v295_v58 = vld [vmem:[%s3199_s12 + $0xa8] sm:$0xff] }
  0x54   : > { %2836 = vmatprep.subr.bf16.mxu1 %v3086_v19  ;;  %v3496_v19 = vsel %vm429_vm0, %v508_v59, %v512_v60  ;;  %v519_v20 = vrot.slane %v517_v9, 1  ;;  %2735 = vmatpush3.bf16.msra.mxu0 %v3094_v10  ;;  %v531_v60 = vrot.slane %v529_v42, 1  ;;  %328 = vst [vmem:[#allocation2 + $0x111] sm:$0xff] %v295_v58  ;;  %v3099_v9 = vld [vmem:[%s4199_s1 + $0x1e0] sm:$0xff]   ;;  %v3104_v42 = vld [vmem:[%s4199_s1 + $0x1a8] sm:$0xff]  }
  0x55   : > { %v522_v21 = vshll.u32 %v3469_v17, 16  ;;  %v367_v45 = vld [vmem:[#allocation2 + $0xe0] sm:$0xff]  ;;  %2736 = vmatprep.subr.bf16.mxu0 %v3097_v27  ;;  %v368_v54 = vld [vmem:[#allocation2 + $0xe8] sm:$0x3] }
  0x56   : > { %v520_v39 = vor.u32 %v519_v20, %v515_v13  ;;  %v3531_v2 = vpack.c.bf16 %v367_v45, %v366_v43  ;;  %v3542_v10 = vld [vmem:[%s4199_s1 + $0x200] sm:$0xff]   ;;  %v3546_v15 = vpack.c.bf16 %v368_v54, %v368_v54  ;;  %v532_v13 = vor.u32 %v531_v60, %v527_v53  ;;  %v369_v20 = vld [vmem:[#allocation2 + $0xf0] sm:$0xff] }
  0x57   : > { %2837 = vmatpush3.bf16.msra.mxu1 %v3088_v40  ;;  %1422 = vmatmul.mubr.bf16.gmra.mrb[20].mxu0 %v3428_v11  ;;  %v524_v40 = vrot.slane %v522_v21, 1  ;;  %v3102_v21 = vld [vmem:[%s4199_s1 + $0x1e8] sm:$0xff]   ;;  %v684_v43 = vrot.slane %v3408_v48, 1  ;;  %v3105_v45 = vld [vmem:[%s4199_s1 + $0x1f0] sm:$0xff]   ;;  %v3108_v48 = vld [vmem:[%s4199_s1 + $0x1f8] sm:$0xff]  }
  0x58   : > { %2838 = vmatprep.subr.bf16.mxu1 %v3091_v46  ;;  %1429 = vmatprep.mubr.bf16.mxu0 %v3496_v19  ;;  %v3098_v46 = vld [vmem:[%s4199_s1 + $0x138] sm:$0xff]   ;;  %v541_v18 = vshll.u32 %v3531_v2, 16  ;;  %v539_v32 = vshrl.u32 %v3531_v2, 16 }
  0x59   : > { %v3528_v59 = vsel %vm429_vm0, %v520_v39, %v524_v40  ;;  %2737 = vmatpush3.bf16.msra.mxu0 %v3098_v46  ;;  %v3566_v40 = vpack.c.bf16 %v370_v25, %v369_v20  ;;  %v3107_v46 = vld [vmem:[%s4199_s1 + $0x1b0] sm:$0xff]   ;;  %v372_v60 = vld [vmem:[#allocation2 + $0x108] sm:$0xff] }
  0x5a   : > { %1551 = vmatmul.mubr.bf16.gmra.mrb[20].mxu1 %v3480_v6  ;;  %2970 = vmatprep.subr.bf16.mxu0 %v3542_v10  ;;  %v543_v39 = vrot.slane %v541_v18, 1  ;;  %v305_v18 = vld [vmem:[%s3199_s12 + $0xf8] sm:$0xff] }
  0x5b   : > { %1558 = vmatprep.mubr.bf16.mxu1 %v3333_v55  ;;  %2839 = vmatpush3.bf16.msra.mxu1 %v3092_v62  ;;  %v534_v62 = vshll.u32 %v3514_v41, 16  ;;  %v553_v58 = vshll.u32 %v3566_v40, 16  ;;  %v373_v4 = vld [vmem:[#allocation2 + $0x110] sm:$0xff]  ;;  %338 = vst [vmem:[#allocation2 + $0x189] sm:$0xff] %v305_v18  ;;  %v3103_v18 = vld [vmem:[%s4199_s1 + $0x208] sm:$0xff]  }
  0x5c   : > { %2840 = vmatprep.subr.bf16.mxu1 %v3095_v37  ;;  %v546_v37 = vshll.u32 %v3546_v15, 16  ;;  %v544_v53 = vor.u32 %v543_v39, %v539_v32 }
  0x5d   : > { %v536_v16 = vrot.slane %v534_v62, 1  ;;  %v3588_v62 = vsel %vm670_vm1, %v683_v29, %v684_v43  ;;  %v3603_v29 = vpack.c.bf16 %v373_v4, %v372_v60 }
  0x5e   : > { %v548_v51 = vrot.slane %v546_v37, 1 }
  0x5f   : > { %2841 = vmatpush3.bf16.msra.mxu1 %v3096_v38  ;;  %1430 = vmatmul.mubr.bf16.gmra.mrb[24].mxu0 %v3437_v23  ;;  %v371_v38 = vld [vmem:[#allocation2 + $0x100] sm:$0x3]  ;;  %v3564_v27 = vsel %vm429_vm0, %v532_v13, %v536_v16  ;;  %v551_v13 = vshrl.u32 %v3566_v40, 16  ;;  %v304_v16 = vld [vmem:[%s3199_s12 + $0xf0] sm:$0xff]  ;;  %v565_v39 = vshll.u32 %v3603_v29, 16 }
  0x60   : > { %1437 = vmatprep.mubr.bf16.mxu0 %v3528_v59  ;;  %2842 = vmatprep.subr.bf16.mxu1 %v3099_v9  ;;  %v3584_v54 = vpack.c.bf16 %v371_v38, %v371_v38  ;;  %v3110_v9 = vld [vmem:[%s4199_s1 + $0x1b8] sm:$0xff]   ;;  %v3600_v20 = vsel %vm429_vm0, %v544_v53, %v548_v51  ;;  %337 = vst [vmem:[#allocation2 + $0x181] sm:$0xff] %v304_v16  ;;  %v690_v53 = vrot.slane %v3439_v24, 1  ;;  %v693_v24 = vrot.slane %v3469_v17, 1 }
  0x61   : > { %v696_v16 = vrot.slane %v3514_v41, 1 }
  0x62   : > { %1559 = vmatmul.mubr.bf16.gmra.mrb[24].mxu1 %v3518_v44  ;;  %v558_v25 = vshll.u32 %v3584_v54, 16 }
  0x63   : > { %1566 = vmatprep.mubr.bf16.mxu1 %v3406_v47  ;;  %2843 = vmatpush3.bf16.msra.mxu1 %v3101_v57  ;;  %v687_v57 = vrot.slane %v3430_v12, 1  ;;  %v374_v12 = vld [vmem:[#allocation2 + $0x118] sm:$0x3] }
  0x64   : > { %2844 = vmatprep.subr.bf16.mxu1 %v3102_v21  ;;  %v555_v21 = vrot.slane %v553_v58, 1  ;;  %v560_v37 = vrot.slane %v558_v25, 1  ;;  %v3608_v38 = vpack.c.bf16 %v374_v12, %v374_v12  ;;  %v699_v25 = vrot.slane %v3546_v15, 1  ;;  %v3111_v12 = vld [vmem:[%s4199_s1 + $0x220] sm:$0xff]  }
  0x65   : > { %v702_v15 = vrot.slane %v3584_v54, 1  ;;  %v3112_v54 = vld [vmem:[%s4199_s1 + $0x228] sm:$0xff]  }
  0x66   : > { %v556_v32 = vor.u32 %v555_v21, %v551_v13  ;;  %v570_v51 = vshll.u32 %v3608_v38, 16  ;;  %v695_v13 = vrot.slane %v3501_v36, 1  ;;  %v698_v21 = vrot.slane %v3531_v2, 1 }
  0x67   : > { %1438 = vmatmul.mubr.bf16.gmra.mrb[28].mxu0 %v3467_v56  ;;  %2845 = vmatpush3.bf16.msra.mxu1 %v3104_v42  ;;  %v3612_v42 = vsel %vm670_vm1, %v686_v7, %v687_v57 }
  0x68   : > { %1445 = vmatprep.mubr.bf16.mxu0 %v3564_v27  ;;  %2846 = vmatprep.subr.bf16.mxu1 %v3105_v45  ;;  %v3616_v43 = vsel %vm429_vm0, %v556_v32, %v560_v37  ;;  %v563_v45 = vshrl.u32 %v3603_v29, 16  ;;  %v572_v60 = vrot.slane %v570_v51, 1  ;;  %v3647_v17 = vsel %vm670_vm1, %v695_v13, %v696_v16  ;;  %v387_v13 = vld [vmem:[#allocation2 + $0x180] sm:$0xff]  ;;  %v388_v16 = vld [vmem:[#allocation2 + $0x188] sm:$0xff] }
  0x69   : > { %v3663_v41 = vsel %vm670_vm1, %v698_v21, %v699_v25  ;;  %v704_v37 = vrot.slane %v3603_v29, 1  ;;  %v707_v51 = vrot.slane %v3227_v30, 1  ;;  %v716_v21 = vrot.slane %v3337_v63, 1 }
  0x6a   : > { %1567 = vmatmul.mubr.bf16.gmra.mrb[28].mxu1 %v3557_v49  ;;  %v717_v25 = vrot.slane %v3339_v0, 1 }
  0x6b   : > { %1574 = vmatprep.mubr.bf16.mxu1 %v3428_v11  ;;  %2847 = vmatpush3.bf16.msra.mxu1 %v3107_v46  ;;  %v567_v46 = vrot.slane %v565_v39, 1  ;;  %v705_v39 = vrot.slane %v3608_v38, 1  ;;  %v3114_v38 = vld [vmem:[%s4199_s1 + $0x238] sm:$0xff]  }
  0x6c   : > { %2848 = vmatprep.subr.bf16.mxu1 %v3108_v48  ;;  %v689_v48 = vrot.slane %v3437_v23, 1 }
  0x6d   : > { %v568_v58 = vor.u32 %v567_v46, %v563_v45  ;;  %v3113_v45 = vld [vmem:[%s4199_s1 + $0x230] sm:$0xff]   ;;  %v3693_v46 = vsel %vm670_vm1, %v704_v37, %v705_v39 }
  0x6e   : > { %v3626_v4 = vsel %vm670_vm1, %v689_v48, %v690_v53  ;;  %v708_v48 = vrot.slane %v3229_v31, 1 }
  0x6f   : > { %1446 = vmatmul.mubr.bf16.gmra.mrb[32].mxu0 %v3501_v36  ;;  %2849 = vmatpush3.bf16.msra.mxu1 %v3110_v9  ;;  %v3630_v7 = vsel %vm429_vm0, %v568_v58, %v572_v60  ;;  %v692_v9 = vrot.slane %v3467_v56, 1  ;;  %v710_v58 = vrot.slane %v3272_v61, 1  ;;  %v711_v60 = vrot.slane %v3280_v1, 1 }
  0x70   : > { %1453 = vmatprep.mubr.bf16.mxu0 %v3600_v20  ;;  %v3705_v53 = vsel %vm670_vm1, %v707_v51, %v708_v48 }
  0x71   : > { %v3638_v57 = vsel %vm670_vm1, %v692_v9, %v693_v24  ;;  %v3714_v31 = vsel %vm670_vm1, %v710_v58, %v711_v60  ;;  %v713_v9 = vrot.slane %v3317_v34, 1  ;;  %v714_v24 = vrot.slane %v3319_v35, 1 }
  0x72   : > { %1575 = vmatmul.mubr.bf16.gmra.mrb[32].mxu1 %v3588_v62  ;;  %v3734_v35 = vsel %vm670_vm1, %v716_v21, %v717_v25 }
  0x73   : > { %1582 = vmatprep.mubr.bf16.mxu1 %v3437_v23  ;;  %v3723_v1 = vsel %vm670_vm1, %v713_v9, %v714_v24 }
  0x77   : > { %1454 = vmatmul.mubr.bf16.gmra.mrb[36].mxu0 %v3531_v2 }
  0x78   : > { %1461 = vmatprep.mubr.bf16.mxu0 %v3616_v43 }
  0x7a   : > { %1583 = vmatmul.mubr.bf16.gmra.mrb[36].mxu1 %v3612_v42 }
  0x7b   : > { %1590 = vmatprep.mubr.bf16.mxu1 %v3467_v56 }
  0x7f   : > { %1462 = vmatmul.mubr.bf16.gmra.mrb[40].mxu0 %v3566_v40 }
  0x80   : > { %1469 = vmatprep.mubr.bf16.mxu0 %v3630_v7 }
  0x82   : > { %1591 = vmatmul.mubr.bf16.gmra.mrb[40].mxu1 %v3626_v4 }
  0x83   : > { %1598 = vmatprep.mubr.bf16.mxu1 %v3501_v36 }
  0x87   : > { %1470 = vmatmul.mubr.bf16.gmra.mrb[44].mxu0 %v3603_v29 }
  0x88   : > { %1703 = vmatprep.mubr.bf16.mxu0 %v3480_v6  ;;  %v3106_v6 = vld [vmem:[%s4199_s1 + $0x210] sm:$0xff]  }
  0x8a   : > { %1599 = vmatmul.mubr.bf16.gmra.mrb[44].mxu1 %v3638_v57 }
  0x8b   : > { %1606 = vmatprep.mubr.bf16.mxu1 %v3531_v2 }
  0x8f   : > { %1704 = vmatmul.mubr.bf16.vlgmr.msra.gmra.mrb[48].mxu0 %v3294_v14  ;;  %v3109_v14 = vld [vmem:[%s4199_s1 + $0x218] sm:$0xff]  }
  0x90   : > { %2971 = vmatpush3.bf16.msra.mxu0 %v3542_v10  ;;  %1711 = vmatprep.mubr.bf16.mxu0 %v3518_v44  ;;  %v701_v10 = vrot.slane %v3566_v40, 1 }
  0x91   : > { %2972 = vmatprep.subr.bf16.mxu0 %v3103_v18 }
  0x92   : > { %1607 = vmatmul.mubr.bf16.gmra.mrb[48].mxu1 %v3647_v17  ;;  %v3678_v32 = vsel %vm670_vm1, %v701_v10, %v702_v15 }
  0x93   : > { %1614 = vmatprep.mubr.bf16.mxu1 %v3566_v40 }
  0x94   : > { %2973 = vmatpush3.bf16.msra.mxu0 %v3103_v18  ;;  %v3725_v18 = vpack.c.bf16 %v388_v16, %v387_v13 }
  0x95   : > { %2974 = vmatprep.subr.bf16.mxu0 %v3106_v6 }
  0x96   : > { %v738_v0 = vshll.u32 %v3725_v18, 16 }
  0x97   : > { %1712 = vmatmul.mubr.bf16.gmra.mrb[52].mxu0 %v3345_v3 }
  0x98   : > { %1719 = vmatprep.mubr.bf16.mxu0 %v3557_v49  ;;  %2975 = vmatpush3.bf16.msra.mxu0 %v3106_v6 }
  0x99   : > { %2976 = vmatprep.subr.bf16.mxu0 %v3109_v14 }
  0x9a   : > { %1615 = vmatmul.mubr.bf16.gmra.mrb[52].mxu1 %v3663_v41 }
  0x9b   : > { %1622 = vmatprep.mubr.bf16.mxu1 %v3603_v29 }
  0x9c   : > { %2977 = vmatpush3.bf16.msra.mxu0 %v3109_v14 }
  0x9d   : > { %2978 = vmatprep.subr.bf16.mxu0 %v3111_v12 }
  0x9f   : > { %1720 = vmatmul.mubr.bf16.gmra.mrb[56].mxu0 %v3375_v28 }
  0xa0   : > { %1727 = vmatprep.mubr.bf16.mxu0 %v3588_v62  ;;  %2979 = vmatpush3.bf16.msra.mxu0 %v3111_v12 }
  0xa1   : > { %2980 = vmatprep.subr.bf16.mxu0 %v3112_v54 }
  0xa2   : > { %1623 = vmatmul.mubr.bf16.gmra.mrb[56].mxu1 %v3678_v32 }
  0xa3   : > { %1630 = vmatprep.mubr.bf16.mxu1 %v3227_v30 }
  0xa4   : > { %2981 = vmatpush3.bf16.msra.mxu0 %v3112_v54 }
  0xa5   : > { %2982 = vmatprep.subr.bf16.mxu0 %v3113_v45 }
  0xa7   : > { %1728 = vmatmul.mubr.bf16.gmra.mrb[60].mxu0 %v3451_v50 }
  0xa8   : > { %1735 = vmatprep.mubr.bf16.mxu0 %v3612_v42  ;;  %2983 = vmatpush3.bf16.msra.mxu0 %v3113_v45 }
  0xa9   : > { %2984 = vmatprep.subr.bf16.mxu0 %v3114_v38 }
  0xaa   : > { %1631 = vmatmul.mubr.bf16.gmra.mrb[60].mxu1 %v3693_v46 }
  0xab   : > { %1638 = vmatprep.mubr.bf16.mxu1 %v3272_v61 }
  0xac   : > { %2985 = vmatpush3.bf16.msra.mxu0 %v3114_v38 }
  0xaf   : > { %1736 = vmatmul.mubr.bf16.gmra.mrb[64].mxu0 %v3477_v5 }
  0xb0   : > { %1743 = vmatprep.mubr.bf16.mxu0 %v3626_v4 }
  0xb2   : > { %1639 = vmatmul.mubr.bf16.gmra.mrb[64].mxu1 %v3705_v53 }
  0xb3   : > { %1646 = vmatprep.mubr.bf16.mxu1 %v3317_v34 }
  0xb7   : > { %1744 = vmatmul.mubr.bf16.gmra.mrb[68].mxu0 %v3496_v19 }
  0xb8   : > { %1751 = vmatprep.mubr.bf16.mxu0 %v3638_v57 }
  0xba   : > { %1647 = vmatmul.mubr.bf16.gmra.mrb[68].mxu1 %v3714_v31 }
  0xbb   : > { %1654 = vmatprep.mubr.bf16.mxu1 %v3337_v63 }
  0xbf   : > { %1752 = vmatmul.mubr.bf16.gmra.mrb[72].mxu0 %v3528_v59 }
  0xc0   : > { %1759 = vmatprep.mubr.bf16.mxu0 %v3647_v17 }
  0xc2   : > { %1655 = vmatmul.mubr.bf16.gmra.mrb[72].mxu1 %v3723_v1 }
  0xc3   : > { %1662 = vmatprep.mubr.bf16.mxu1 %v3725_v18 }
  0xc7   : > { %1760 = vmatmul.mubr.bf16.gmra.mrb[76].mxu0 %v3564_v27 }
  0xc8   : > { %1767 = vmatprep.mubr.bf16.mxu0 %v3663_v41 }
  0xca   : > { %1663 = vmatmul.mubr.bf16.gmra.mrb[76].mxu1 %v3734_v35 }
  0xcb   : > { %1864 = vmatprep.mubr.bf16.mxu1 %v3345_v3  ;;  %v750_v3 = vrot.slane %v3725_v18, 1 }
  0xcf   : > { %1768 = vmatmul.mubr.bf16.gmra.mrb[80].mxu0 %v3600_v20 }
  0xd0   : > { %1775 = vmatprep.mubr.bf16.mxu0 %v3678_v32 }
  0xd2   : > { %1865 = vmatmul.mubr.bf16.vlgmr.msra.gmra.mrb[80].mxu1 %v3309_v26  ;;  %v389_v26 = vld [vmem:[#allocation2 + $0x190] sm:$0x3] }
  0xd3   : > { %1872 = vmatprep.mubr.bf16.mxu1 %v3375_v28 }
  0xd7   : > { %1776 = vmatmul.mubr.bf16.gmra.mrb[84].mxu0 %v3616_v43 }
  0xd8   : > { %1783 = vmatprep.mubr.bf16.mxu0 %v3693_v46 }
  0xda   : > { %1873 = vmatmul.mubr.bf16.gmra.mrb[84].mxu1 %v3333_v55  ;;  %v426_v55 = vpack.c.bf16 %v389_v26, %v389_v26 }
  0xdb   : > { %1880 = vmatprep.mubr.bf16.mxu1 %v3451_v50 }
  0xdc   : > { %v751_v28 = vrot.slane %v426_v55, 1  ;;  %v743_v50 = vshll.u32 %v426_v55, 16 }
  0xde   : > { %v745_v37 = vrot.slane %v743_v50, 1 }
  0xdf   : > { %1784 = vmatmul.mubr.bf16.gmra.mrb[88].mxu0 %v3630_v7 }
  0xe0   : > { %1791 = vmatprep.mubr.bf16.mxu0 %v3705_v53 }
  0xe2   : > { %1881 = vmatmul.mubr.bf16.gmra.mrb[88].mxu1 %v3406_v47 }
  0xe3   : > { %1888 = vmatprep.mubr.bf16.mxu1 %v3477_v5 }
  0xe7   : > { %1792 = vmatmul.mubr.bf16.gmra.mrb[92].mxu0 %v3262_v52 }
  0xe8   : > { %1799 = vmatprep.mubr.bf16.mxu0 %v3714_v31 }
  0xea   : > { %1889 = vmatmul.mubr.bf16.gmra.mrb[92].mxu1 %v3428_v11  ;;  %v736_v11 = vshrl.u32 %v3725_v18, 16 }
  0xeb   : > { %1896 = vmatprep.mubr.bf16.mxu1 %v3496_v19  ;;  %v3769_v19 = vsel %vm670_vm1, %v750_v3, %v751_v28 }
  0xef   : > { %1800 = vmatmul.mubr.bf16.gmra.mrb[96].mxu0 %v3305_v22 }
  0xf0   : > { %1807 = vmatprep.mubr.bf16.mxu0 %v3723_v1 }
  0xf2   : > { %1897 = vmatmul.mubr.bf16.gmra.mrb[96].mxu1 %v3437_v23  ;;  %v740_v23 = vrot.slane %v738_v0, 1 }
  0xf3   : > { %1904 = vmatprep.mubr.bf16.mxu1 %v3528_v59 }
  0xf4   : > { %v741_v54 = vor.u32 %v740_v23, %v736_v11 }
  0xf6   : > { %v3783_v45 = vsel %vm429_vm0, %v741_v54, %v745_v37 }
  0xf7   : > { %1808 = vmatmul.mubr.bf16.gmra.mrb[100].mxu0 %v3355_v8 }
  0xf8   : > { %1815 = vmatprep.mubr.bf16.mxu0 %v3734_v35 }
  0xf9   : > { %v2514_v47 = vpop.f32.mrb[0].mxu0 }
  0xfa   : > { %1905 = vmatmul.mubr.bf16.gmra.mrb[100].mxu1 %v3467_v56  ;;  %v2515_v5 = vpop.f32.mrb[1].mxu0 }
  0xfb   : > { %1912 = vmatprep.mubr.bf16.mxu1 %v3564_v27  ;;  %v3771_v59 = vadd.f32 %v2515_v5, %v2514_v47  ;;  %v2517_v6 = vpop.f32.mrb[2].mxu0 }
  0xfc   : > { %v2518_v15 = vpop.f32.mrb[3].mxu0 }
  0xfd   : > { %v3777_v12 = vadd.f32 %v2518_v15, %v2517_v6 }
  0xff   : > { %1816 = vmatmul.mubr.bf16.gmra.mrb[104].mxu0 %v3385_v33 }
 0x100   : > { %1823 = vmatprep.mubr.bf16.mxu0 %v3769_v19 }
 0x102   : > { %1913 = vmatmul.mubr.bf16.gmra.mrb[104].mxu1 %v3501_v36 }
 0x103   : > { %1920 = vmatprep.mubr.bf16.mxu1 %v3600_v20 }
 0x105   : > { %v2586_v56 = vpop.f32.mrb[0].mxu1 }
 0x106   : > { %v2587_v27 = vpop.f32.mrb[1].mxu1  ;;  %v2520_v38 = vpop.f32.mrb[4].mxu0 }
 0x107   : > { %v3775_v14 = vadd.f32 %v2587_v27, %v2586_v56  ;;  %v2589_v10 = vpop.f32.mrb[2].mxu1  ;;  %v2521_v20 = vpop.f32.mrb[5].mxu0  ;;  %1824 = vmatmul.mubr.bf16.gmra.mrb[108].mxu0 %v3783_v45 }
 0x108   : > { %v2590_v36 = vpop.f32.mrb[3].mxu1  ;;  %v3786_v48 = vadd.f32 %v2521_v20, %v2520_v38  ;;  %v2523_v58 = vpop.f32.mrb[6].mxu0  ;;  %2986 = vmatprep.mubr.bf16.mxu0 %v3518_v44 }
 0x109   : > { %v3780_v39 = vadd.f32 %v2590_v36, %v2589_v10  ;;  %v2524_v9 = vpop.f32.mrb[7].mxu0 }
 0x10a   : > { %1921 = vmatmul.mubr.bf16.gmra.mrb[108].mxu1 %v3531_v2  ;;  %v3792_v16 = vadd.f32 %v2524_v9, %v2523_v58 }
 0x10b   : > { %1928 = vmatprep.mubr.bf16.mxu1 %v3616_v43 }
 0x10d   : > { %v2592_v51 = vpop.f32.mrb[4].mxu1 }
 0x10e   : > { %v2593_v60 = vpop.f32.mrb[5].mxu1 }
 0x10f   : > { %v3790_v24 = vadd.f32 %v2593_v60, %v2592_v51  ;;  %v2595_v13 = vpop.f32.mrb[6].mxu1  ;;  %2987 = vmatmul.mubr.bf16.vlgmr.msra.gmra.mrb[112].mxu0 %v3557_v49  ;;  %v2526_v43 = vpop.f32.mrb[8].mxu0 }
 0x110   : > { %v2596_v21 = vpop.f32.mrb[7].mxu1  ;;  %v2527_v26 = vpop.f32.mrb[9].mxu0  ;;  %2990 = vmatprep.mubr.bf16.mxu0 %v3588_v62 }
 0x111   : > { %v3795_v2 = vadd.f32 %v2596_v21, %v2595_v13  ;;  %v3801_v55 = vadd.f32 %v2527_v26, %v2526_v43  ;;  %v2529_v3 = vpop.f32.mrb[10].mxu0 }
 0x112   : > { %1929 = vmatmul.mubr.bf16.gmra.mrb[112].mxu1 %v3566_v40  ;;  %v2530_v47 = vpop.f32.mrb[11].mxu0 }
 0x113   : > { %1936 = vmatprep.mubr.bf16.mxu1 %v3630_v7  ;;  %v3805_v11 = vadd.f32 %v2530_v47, %v2529_v3 }
 0x115   : > { %v2598_v25 = vpop.f32.mrb[8].mxu1 }
 0x116   : > { %v2599_v0 = vpop.f32.mrb[9].mxu1 }
 0x117   : > { %v3803_v28 = vadd.f32 %v2599_v0, %v2598_v25  ;;  %v2601_v44 = vpop.f32.mrb[10].mxu1  ;;  %2991 = vmatmul.mubr.bf16.gmra.mrb[116].mxu0 %v3612_v42  ;;  %v2532_v49 = vpop.f32.mrb[12].mxu0  ;;  %v3115_v0 = vld [vmem:[#allocation2] sm:$0xff] }
 0x118   : > { %v2602_v40 = vpop.f32.mrb[11].mxu1  ;;  %v2533_v7 = vpop.f32.mrb[13].mxu0  ;;  %2994 = vmatprep.mubr.bf16.mxu0 %v3626_v4 }
 0x119   : > { %v3807_v23 = vadd.f32 %v2602_v40, %v2601_v44  ;;  %v3813_v50 = vadd.f32 %v2533_v7, %v2532_v49  ;;  %v2535_v5 = vpop.f32.mrb[14].mxu0 }
 0x11a   : > { %1937 = vmatmul.mubr.bf16.gmra.mrb[116].mxu1 %v3603_v29  ;;  %v2536_v10 = vpop.f32.mrb[15].mxu0 }
 0x11b   : > { %1944 = vmatprep.mubr.bf16.mxu1 %v3262_v52  ;;  %v3817_v15 = vadd.f32 %v2536_v10, %v2535_v5 }
 0x11d   : > { %v2604_v62 = vpop.f32.mrb[12].mxu1 }
 0x11e   : > { %v2605_v56 = vpop.f32.mrb[13].mxu1 }
 0x11f   : > { %v3815_v27 = vadd.f32 %v2605_v56, %v2604_v62  ;;  %v2607_v6 = vpop.f32.mrb[14].mxu1  ;;  %2995 = vmatmul.mubr.bf16.gmra.mrb[120].mxu0 %v3638_v57 }
 0x120   : > { %v2608_v29 = vpop.f32.mrb[15].mxu1  ;;  %2998 = vmatprep.mubr.bf16.mxu0 %v3647_v17 }
 0x121   : > { %v3819_v36 = vadd.f32 %v2608_v29, %v2607_v6 }
 0x122   : > { %1945 = vmatmul.mubr.bf16.gmra.mrb[120].mxu1 %v3227_v30  ;;  %v2538_v4 = vpop.f32.mrb[16].mxu0 }
 0x123   : > { %1952 = vmatprep.mubr.bf16.mxu1 %v3305_v22  ;;  %v2539_v38 = vpop.f32.mrb[17].mxu0 }
 0x124   : > { %v3825_v51 = vadd.f32 %v2539_v38, %v2538_v4  ;;  %v2541_v60 = vpop.f32.mrb[18].mxu0 }
 0x125   : > { %v2626_v52 = vpop.f32.mrb[16].mxu1  ;;  %v2542_v9 = vpop.f32.mrb[19].mxu0 }
 0x126   : > { %v2627_v42 = vpop.f32.mrb[17].mxu1  ;;  %v3831_v22 = vadd.f32 %v2542_v9, %v2541_v60 }
 0x127   : > { %v2628_v54 = vadd.f32 %v2627_v42, %v2626_v52  ;;  %v2629_v37 = vpop.f32.mrb[18].mxu1  ;;  %2999 = vmatmul.mubr.bf16.gmra.mrb[124].mxu0 %v3663_v41  ;;  %v392_v41 = vld [vmem:[#allocation2 + $0x1a8] sm:$0x3] }
 0x128   : > { %v2630_v20 = vpop.f32.mrb[19].mxu1  ;;  %3002 = vmatprep.mubr.bf16.mxu0 %v3678_v32  ;;  %v428_v49 = vpack.c.bf16 %v392_v41, %v392_v41 }
 0x129   : > { %v3828_v58 = vadd.f32 %v2628_v54, %v3771_v59  ;;  %v2631_v30 = vadd.f32 %v2630_v20, %v2629_v37 }
 0x12a   : > { %1953 = vmatmul.mubr.bf16.gmra.mrb[124].mxu1 %v3272_v61  ;;  %v2544_v59 = vpop.f32.mrb[20].mxu0  ;;  %v3839_v61 = vpack.c.bf16 %v3115_v0, %v3115_v0  ;;  %v762_v52 = vshll.u32 %v428_v49, 16 }
 0x12b   : > { %v3834_v57 = vadd.f32 %v2631_v30, %v3777_v12  ;;  %1960 = vmatprep.mubr.bf16.mxu1 %v3355_v8  ;;  %v2545_v25 = vpop.f32.mrb[21].mxu0 }
 0x12c   : > { %v3841_v3 = vadd.f32 %v2545_v25, %v2544_v59  ;;  %v2547_v8 = vpop.f32.mrb[22].mxu0  ;;  %v757_v62 = vshll.u32 %v3839_v61, 16  ;;  %v755_v29 = vshrl.u32 %v3839_v61, 16  ;;  %v764_v20 = vrot.slane %v762_v52, 1 }
 0x12d   : > { %v2632_v17 = vpop.f32.mrb[20].mxu1  ;;  %v2548_v47 = vpop.f32.mrb[23].mxu0  ;;  %v769_v0 = vrot.slane %v3839_v61, 1 }
 0x12e   : > { %v2633_v13 = vpop.f32.mrb[21].mxu1  ;;  %v3847_v32 = vadd.f32 %v2548_v47, %v2547_v8 }
 0x12f   : > { %v2634_v21 = vadd.f32 %v2633_v13, %v2632_v17  ;;  %v2635_v43 = vpop.f32.mrb[22].mxu1  ;;  %3003 = vmatmul.mubr.bf16.gmra.mrb[128].mxu0 %v3693_v46 }
 0x130   : > { %v2636_v26 = vpop.f32.mrb[23].mxu1  ;;  %3006 = vmatprep.mubr.bf16.mxu0 %v3705_v53 }
 0x131   : > { %v3844_v12 = vadd.f32 %v2634_v21, %v3786_v48  ;;  %v2637_v44 = vadd.f32 %v2636_v26, %v2635_v43 }
 0x132   : > { %1961 = vmatmul.mubr.bf16.gmra.mrb[128].mxu1 %v3317_v34  ;;  %v2550_v56 = vpop.f32.mrb[24].mxu0 }
 0x133   : > { %v3850_v40 = vadd.f32 %v2637_v44, %v3792_v16  ;;  %1968 = vmatprep.mubr.bf16.mxu1 %v3385_v33  ;;  %v2551_v34 = vpop.f32.mrb[25].mxu0  ;;  %v759_v16 = vrot.slane %v757_v62, 1 }
 0x134   : > { %v3857_v42 = vadd.f32 %v2551_v34, %v2550_v56  ;;  %v2553_v46 = vpop.f32.mrb[26].mxu0 }
 0x135   : > { %v2638_v48 = vpop.f32.mrb[24].mxu1  ;;  %v2554_v54 = vpop.f32.mrb[27].mxu0  ;;  %v760_v38 = vor.u32 %v759_v16, %v755_v29 }
 0x136   : > { %v2639_v7 = vpop.f32.mrb[25].mxu1  ;;  %v3863_v53 = vadd.f32 %v2554_v54, %v2553_v46 }
 0x137   : > { %v2640_v5 = vadd.f32 %v2639_v7, %v2638_v48  ;;  %v2641_v6 = vpop.f32.mrb[26].mxu1  ;;  %3007 = vmatmul.mubr.bf16.gmra.mrb[132].mxu0 %v3714_v31  ;;  %v765_v59 = vsel %vm429_vm0, %v760_v38, %v764_v20 }
 0x138   : > { %v2642_v10 = vpop.f32.mrb[27].mxu1  ;;  %3010 = vmatprep.mubr.bf16.mxu0 %v3723_v1 }
 0x139   : > { %v3860_v33 = vadd.f32 %v2640_v5, %v3801_v55  ;;  %v2643_v4 = vadd.f32 %v2642_v10, %v2641_v6 }
 0x13a   : > { %1969 = vmatmul.mubr.bf16.gmra.mrb[132].mxu1 %v3337_v63  ;;  %v2556_v30 = vpop.f32.mrb[28].mxu0 }
 0x13b   : > { %v3866_v37 = vadd.f32 %v2643_v4, %v3805_v11  ;;  %1976 = vmatprep.mubr.bf16.mxu1 %v3783_v45  ;;  %v2557_v13 = vpop.f32.mrb[29].mxu0 }
 0x13c   : > { %v3872_v21 = vadd.f32 %v2557_v13, %v2556_v30  ;;  %v2559_v45 = vpop.f32.mrb[30].mxu0 }
 0x13d   : > { %v2644_v60 = vpop.f32.mrb[28].mxu1  ;;  %v2560_v43 = vpop.f32.mrb[31].mxu0 }
 0x13e   : > { %v2645_v55 = vpop.f32.mrb[29].mxu1  ;;  %v3878_v25 = vadd.f32 %v2560_v43, %v2559_v45 }
 0x13f   : > { %v2646_v9 = vadd.f32 %v2645_v55, %v2644_v60  ;;  %v2647_v17 = vpop.f32.mrb[30].mxu1  ;;  %3011 = vmatmul.mubr.bf16.gmra.mrb[136].mxu0 %v3734_v35 }
 0x140   : > { %v2648_v63 = vpop.f32.mrb[31].mxu1  ;;  %3014 = vmatprep.mubr.bf16.mxu0 %v3769_v19 }
 0x141   : > { %v3875_v11 = vadd.f32 %v2646_v9, %v3813_v50  ;;  %v2649_v31 = vadd.f32 %v2648_v63, %v2647_v17  ;;  %v770_v50 = vrot.slane %v428_v49, 1 }
 0x142   : > { %1977 = vmatmul.mubr.bf16.gmra.mrb[136].mxu1 %v3725_v18  ;;  %v2562_v44 = vpop.f32.mrb[32].mxu0 }
 0x143   : > { %v3881_v1 = vadd.f32 %v2649_v31, %v3817_v15  ;;  %1984 = vmatprep.mubr.bf16.mxu1 %v765_v59  ;;  %v2563_v62 = vpop.f32.mrb[33].mxu0  ;;  %v771_v35 = vsel %vm670_vm1, %v769_v0, %v770_v50 }
 0x144   : > { %v2564_v48 = vadd.f32 %v2563_v62, %v2562_v44  ;;  %v2565_v15 = vpop.f32.mrb[34].mxu0 }
 0x145   : > { %v2650_v26 = vpop.f32.mrb[32].mxu1  ;;  %v2566_v5 = vpop.f32.mrb[35].mxu0 }
 0x146   : > { %v2651_v8 = vpop.f32.mrb[33].mxu1  ;;  %v2567_v19 = vadd.f32 %v2566_v5, %v2565_v15 }
 0x147   : > { %v2652_v41 = vadd.f32 %v2651_v8, %v2650_v26  ;;  %v2653_v47 = vpop.f32.mrb[34].mxu1  ;;  %3015 = vmatmul.mubr.bf16.gmra.mrb[140].mxu0 %v771_v35 }
 0x148   : > { %v2654_v18 = vpop.f32.mrb[35].mxu1 }
 0x149   : > { %v3887_v7 = vadd.f32 %v2652_v41, %v3825_v51  ;;  %v2655_v56 = vadd.f32 %v2654_v18, %v2653_v47 }
 0x14a   : > { %1985 = vmatmul.mubr.bf16.gmra.mrb[140].mxu1 %v3839_v61  ;;  %v2568_v10 = vpop.f32.mrb[36].mxu0 }
 0x14b   : > { %v3892_v49 = vadd.f32 %v2655_v56, %v3831_v22  ;;  %v2569_v52 = vpop.f32.mrb[37].mxu0 }
 0x14c   : > { %v2570_v46 = vadd.f32 %v2569_v52, %v2568_v10  ;;  %v2571_v54 = vpop.f32.mrb[38].mxu0 }
 0x14d   : > { %v2656_v6 = vpop.f32.mrb[36].mxu1  ;;  %v2572_v20 = vpop.f32.mrb[39].mxu0 }
 0x14e   : > { %v2657_v34 = vpop.f32.mrb[37].mxu1  ;;  %v2573_v61 = vadd.f32 %v2572_v20, %v2571_v54 }
 0x14f   : > { %v2658_v29 = vadd.f32 %v2657_v34, %v2656_v6  ;;  %v2659_v16 = vpop.f32.mrb[38].mxu1 }
 0x150   : > { %v2660_v51 = vpop.f32.mrb[39].mxu1 }
 0x151   : > { %v3895_v4 = vadd.f32 %v2658_v29, %v3841_v3  ;;  %v2661_v38 = vadd.f32 %v2660_v51, %v2659_v16 }
 0x152   : > { %v2574_v30 = vpop.f32.mrb[40].mxu0 }
 0x153   : > { %v3898_v60 = vadd.f32 %v2661_v38, %v3847_v32  ;;  %v2575_v13 = vpop.f32.mrb[41].mxu0 }
 0x154   : > { %v2576_v59 = vadd.f32 %v2575_v13, %v2574_v30  ;;  %v2577_v3 = vpop.f32.mrb[42].mxu0 }
 0x155   : > { %v2662_v22 = vpop.f32.mrb[40].mxu1  ;;  %v2578_v43 = vpop.f32.mrb[43].mxu0 }
 0x156   : > { %v2663_v55 = vpop.f32.mrb[41].mxu1  ;;  %v2579_v26 = vadd.f32 %v2578_v43, %v2577_v3 }
 0x157   : > { %v2664_v9 = vadd.f32 %v2663_v55, %v2662_v22  ;;  %v2665_v17 = vpop.f32.mrb[42].mxu1 }
 0x158   : > { %v2666_v63 = vpop.f32.mrb[43].mxu1 }
 0x159   : > { %v3901_v45 = vadd.f32 %v2664_v9, %v3857_v42  ;;  %v2667_v31 = vadd.f32 %v2666_v63, %v2665_v17 }
 0x15a   : > { %v2580_v8 = vpop.f32.mrb[44].mxu0 }
 0x15b   : > { %v3904_v0 = vadd.f32 %v2667_v31, %v3863_v53  ;;  %v2581_v47 = vpop.f32.mrb[45].mxu0 }
 0x15c   : > { %v2582_v18 = vadd.f32 %v2581_v47, %v2580_v8  ;;  %v2583_v42 = vpop.f32.mrb[46].mxu0 }
 0x15d   : > { %v2668_v32 = vpop.f32.mrb[44].mxu1  ;;  %v2584_v35 = vpop.f32.mrb[47].mxu0 }
 0x15e   : > { %v2669_v50 = vpop.f32.mrb[45].mxu1  ;;  %v3909_v5 = vadd.f32 %v2584_v35, %v2583_v42 }
 0x15f   : > { %v2670_v44 = vadd.f32 %v2669_v50, %v2668_v32  ;;  %v2671_v41 = vpop.f32.mrb[46].mxu1 }
 0x160   : > { %v2672_v62 = vpop.f32.mrb[47].mxu1 }
 0x161   : > { %v3907_v15 = vadd.f32 %v2670_v44, %v3872_v21  ;;  %v2673_v56 = vadd.f32 %v2672_v62, %v2671_v41 }
 0x162   : > { %v2738_v10 = vpop.f32.mrb[48].mxu0 }
 0x163   : > { %v3912_v6 = vadd.f32 %v2673_v56, %v3878_v25  ;;  %v2739_v52 = vpop.f32.mrb[49].mxu0 }
 0x164   : > { %v2740_v38 = vadd.f32 %v2739_v52, %v2738_v10  ;;  %v2741_v21 = vpop.f32.mrb[50].mxu0 }
 0x165   : > { %v2674_v53 = vpop.f32.mrb[48].mxu1  ;;  %v2742_v22 = vpop.f32.mrb[51].mxu0 }
 0x166   : > { %v2675_v34 = vpop.f32.mrb[49].mxu1  ;;  %v3917_v55 = vadd.f32 %v2740_v38, %v3828_v58  ;;  %v2743_v25 = vadd.f32 %v2742_v22, %v2741_v21 }
 0x167   : > { %v2676_v29 = vadd.f32 %v2675_v34, %v2674_v53  ;;  %v2677_v16 = vpop.f32.mrb[50].mxu1 }
 0x168   : > { %v2678_v51 = vpop.f32.mrb[51].mxu1  ;;  %v3922_v9 = vadd.f32 %v2743_v25, %v3834_v57 }
 0x169   : > { %v3914_v54 = vadd.f32 %v2676_v29, %v2564_v48  ;;  %v2679_v20 = vadd.f32 %v2678_v51, %v2677_v16 }
 0x16a   : > { %v2744_v63 = vpop.f32.mrb[52].mxu0 }
 0x16b   : > { %v3919_v30 = vadd.f32 %v2679_v20, %v2567_v19  ;;  %v2745_v48 = vpop.f32.mrb[53].mxu0 }
 0x16c   : > { %v2746_v50 = vadd.f32 %v2745_v48, %v2744_v63  ;;  %v2747_v8 = vpop.f32.mrb[54].mxu0 }
 0x16d   : > { %v2680_v17 = vpop.f32.mrb[52].mxu1  ;;  %v2748_v58 = vpop.f32.mrb[55].mxu0 }
 0x16e   : > { %v2681_v13 = vpop.f32.mrb[53].mxu1  ;;  %v3927_v19 = vadd.f32 %v2746_v50, %v3844_v12  ;;  %v2749_v57 = vadd.f32 %v2748_v58, %v2747_v8 }
 0x16f   : > { %v2682_v3 = vadd.f32 %v2681_v13, %v2680_v17  ;;  %v2683_v31 = vpop.f32.mrb[54].mxu1 }
 0x170   : > { %v2684_v43 = vpop.f32.mrb[55].mxu1  ;;  %v3932_v47 = vadd.f32 %v2749_v57, %v3850_v40 }
 0x171   : > { %v3924_v32 = vadd.f32 %v2682_v3, %v2570_v46  ;;  %v2685_v44 = vadd.f32 %v2684_v43, %v2683_v31 }
 0x172   : > { %v2750_v56 = vpop.f32.mrb[56].mxu0 }
 0x173   : > { %v3929_v41 = vadd.f32 %v2685_v44, %v2573_v61  ;;  %v2751_v46 = vpop.f32.mrb[57].mxu0 }
 0x174   : > { %v2752_v29 = vadd.f32 %v2751_v46, %v2750_v56  ;;  %v2753_v16 = vpop.f32.mrb[58].mxu0 }
 0x175   : > { %v2686_v62 = vpop.f32.mrb[56].mxu1  ;;  %v2754_v12 = vpop.f32.mrb[59].mxu0 }
 0x176   : > { %v2687_v42 = vpop.f32.mrb[57].mxu1  ;;  %v3937_v61 = vadd.f32 %v2752_v29, %v3860_v33  ;;  %v2755_v40 = vadd.f32 %v2754_v12, %v2753_v16 }
 0x177   : > { %v2688_v35 = vadd.f32 %v2687_v42, %v2686_v62  ;;  %v2689_v53 = vpop.f32.mrb[58].mxu1 }
 0x178   : > { %v2690_v34 = vpop.f32.mrb[59].mxu1  ;;  %v3942_v38 = vadd.f32 %v2755_v40, %v3866_v37 }
 0x179   : > { %v3934_v10 = vadd.f32 %v2688_v35, %v2576_v59  ;;  %v2691_v52 = vadd.f32 %v2690_v34, %v2689_v53 }
 0x17a   : > { %v2756_v22 = vpop.f32.mrb[60].mxu0 }
 0x17b   : > { %v3939_v51 = vadd.f32 %v2691_v52, %v2579_v26  ;;  %v2757_v59 = vpop.f32.mrb[61].mxu0 }
 0x17c   : > { %v2758_v3 = vadd.f32 %v2757_v59, %v2756_v22  ;;  %v2759_v31 = vpop.f32.mrb[62].mxu0 }
 0x17d   : > { %v2692_v21 = vpop.f32.mrb[60].mxu1  ;;  %v2760_v33 = vpop.f32.mrb[63].mxu0 }
 0x17e   : > { %v2693_v20 = vpop.f32.mrb[61].mxu1  ;;  %v3947_v26 = vadd.f32 %v2758_v3, %v3875_v11  ;;  %v2761_v37 = vadd.f32 %v2760_v33, %v2759_v31 }
 0x17f   : > { %v2694_v25 = vadd.f32 %v2693_v20, %v2692_v21  ;;  %v2695_v17 = vpop.f32.mrb[62].mxu1 }
 0x180   : > { %v2696_v13 = vpop.f32.mrb[63].mxu1  ;;  %v3953_v50 = vadd.f32 %v2761_v37, %v3881_v1 }
 0x181   : > { %v3944_v63 = vadd.f32 %v2694_v25, %v2582_v18  ;;  %v2697_v48 = vadd.f32 %v2696_v13, %v2695_v17 }
 0x182   : > { %v2762_v58 = vpop.f32.mrb[64].mxu0 }
 0x183   : > { %v3950_v43 = vadd.f32 %v2697_v48, %v3909_v5  ;;  %v2763_v62 = vpop.f32.mrb[65].mxu0 }
 0x184   : > { %v2764_v35 = vadd.f32 %v2763_v62, %v2762_v58  ;;  %v2765_v11 = vpop.f32.mrb[66].mxu0 }
 0x185   : > { %v2698_v8 = vpop.f32.mrb[64].mxu1  ;;  %v2766_v46 = vpop.f32.mrb[67].mxu0 }
 0x186   : > { %v2699_v44 = vpop.f32.mrb[65].mxu1  ;;  %v3959_v5 = vadd.f32 %v2764_v35, %v3887_v7  ;;  %v2767_v34 = vadd.f32 %v2766_v46, %v2765_v11 }
 0x187   : > { %v2700_v57 = vadd.f32 %v2699_v44, %v2698_v8  ;;  %v2701_v18 = vpop.f32.mrb[66].mxu1 }
 0x188   : > { %v2702_v42 = vpop.f32.mrb[67].mxu1  ;;  %v3965_v29 = vadd.f32 %v2767_v34, %v3892_v49 }
 0x189   : > { %v3956_v56 = vadd.f32 %v2700_v57, %v3775_v14  ;;  %v2703_v53 = vadd.f32 %v2702_v42, %v2701_v18 }
 0x18a   : > { %v2768_v12 = vpop.f32.mrb[68].mxu0 }
 0x18b   : > { %v3962_v1 = vadd.f32 %v2703_v53, %v3780_v39  ;;  %v2769_v21 = vpop.f32.mrb[69].mxu0 }
 0x18c   : > { %v2770_v25 = vadd.f32 %v2769_v21, %v2768_v12  ;;  %v2771_v7 = vpop.f32.mrb[70].mxu0 }
 0x18d   : > { %v2704_v16 = vpop.f32.mrb[68].mxu1  ;;  %v2772_v59 = vpop.f32.mrb[71].mxu0 }
 0x18e   : > { %v2705_v52 = vpop.f32.mrb[69].mxu1  ;;  %v3971_v39 = vadd.f32 %v2770_v25, %v3895_v4  ;;  %v2773_v13 = vadd.f32 %v2772_v59, %v2771_v7 }
 0x18f   : > { %v2706_v40 = vadd.f32 %v2705_v52, %v2704_v16  ;;  %v2707_v14 = vpop.f32.mrb[70].mxu1 }
 0x190   : > { %v2708_v20 = vpop.f32.mrb[71].mxu1  ;;  %v3977_v3 = vadd.f32 %v2773_v13, %v3898_v60 }
 0x191   : > { %v3968_v22 = vadd.f32 %v2706_v40, %v3790_v24  ;;  %v2709_v17 = vadd.f32 %v2708_v20, %v2707_v14 }
 0x192   : > { %v2774_v33 = vpop.f32.mrb[72].mxu0 }
 0x193   : > { %v3974_v49 = vadd.f32 %v2709_v17, %v3795_v2  ;;  %v2775_v8 = vpop.f32.mrb[73].mxu0 }
 0x194   : > { %v2776_v57 = vadd.f32 %v2775_v8, %v2774_v33  ;;  %v2777_v4 = vpop.f32.mrb[74].mxu0 }
 0x195   : > { %v2710_v31 = vpop.f32.mrb[72].mxu1  ;;  %v2778_v62 = vpop.f32.mrb[75].mxu0 }
 0x196   : > { %v2711_v48 = vpop.f32.mrb[73].mxu1  ;;  %v3983_v2 = vadd.f32 %v2776_v57, %v3901_v45  ;;  %v2779_v42 = vadd.f32 %v2778_v62, %v2777_v4 }
 0x197   : > { %v2712_v37 = vadd.f32 %v2711_v48, %v2710_v31  ;;  %v2713_v24 = vpop.f32.mrb[74].mxu1 }
 0x198   : > { %v2714_v44 = vpop.f32.mrb[75].mxu1  ;;  %v3989_v35 = vadd.f32 %v2779_v42, %v3904_v0 }
 0x199   : > { %v3980_v58 = vadd.f32 %v2712_v37, %v3803_v28  ;;  %v2715_v18 = vadd.f32 %v2714_v44, %v2713_v24 }
 0x19a   : > { %v2780_v46 = vpop.f32.mrb[76].mxu0 }
 0x19b   : > { %v3986_v60 = vadd.f32 %v2715_v18, %v3807_v23  ;;  %v2781_v16 = vpop.f32.mrb[77].mxu0 }
 0x19c   : > { %v2782_v40 = vadd.f32 %v2781_v16, %v2780_v46  ;;  %v2783_v45 = vpop.f32.mrb[78].mxu0 }
 0x19d   : > { %v2716_v11 = vpop.f32.mrb[76].mxu1  ;;  %v2784_v21 = vpop.f32.mrb[79].mxu0 }
 0x19e   : > { %v2717_v53 = vpop.f32.mrb[77].mxu1  ;;  %v3995_v23 = vadd.f32 %v2782_v40, %v3907_v15  ;;  %v2785_v20 = vadd.f32 %v2784_v21, %v2783_v45 }
 0x19f   : > { %v2718_v34 = vadd.f32 %v2717_v53, %v2716_v11  ;;  %v2719_v28 = vpop.f32.mrb[78].mxu1 }
 0x1a0   : > { %v2720_v52 = vpop.f32.mrb[79].mxu1  ;;  %v4001_v25 = vadd.f32 %v2785_v20, %v3912_v6 }
 0x1a1   : > { %v3992_v12 = vadd.f32 %v2718_v34, %v3815_v27  ;;  %v2721_v14 = vadd.f32 %v2720_v52, %v2719_v28 }
 0x1a2   : > { %v2786_v59 = vpop.f32.mrb[80].mxu0 }
 0x1a3   : > { %v3998_v0 = vadd.f32 %v2721_v14, %v3819_v36  ;;  %v2787_v31 = vpop.f32.mrb[81].mxu0 }
 0x1a4   : > { %v2788_v33 = vadd.f32 %v2787_v31, %v2786_v59  ;;  %v2789_v37 = vpop.f32.mrb[82].mxu0 }
 0x1a5   : > { %v2850_v7 = vpop.f32.mrb[80].mxu1  ;;  %v2790_v8 = vpop.f32.mrb[83].mxu0 }
 0x1a6   : > { %v2851_v17 = vpop.f32.mrb[81].mxu1  ;;  %v4007_v36 = vadd.f32 %v2788_v33, %v3914_v54  ;;  %v2791_v44 = vadd.f32 %v2790_v8, %v2789_v37 }
 0x1a7   : > { %v2852_v13 = vadd.f32 %v2851_v17, %v2850_v7  ;;  %v2853_v27 = vpop.f32.mrb[82].mxu1 }
 0x1a8   : > { %v2854_v48 = vpop.f32.mrb[83].mxu1  ;;  %v4013_v57 = vadd.f32 %v2791_v44, %v3919_v30 }
 0x1a9   : > { %v2855_v24 = vadd.f32 %v2854_v48, %v2853_v27  ;;  %v4004_v15 = vadd.f32 %v2852_v13, %v3917_v55 }
 0x1aa   : > { %v2792_v62 = vpop.f32.mrb[84].mxu0 }
 0x1ab   : > { %v4010_v6 = vadd.f32 %v2855_v24, %v3922_v9  ;;  %v2793_v53 = vpop.f32.mrb[85].mxu0 }
 0x1ac   : > { %v2794_v55 = vadd.f32 %v2793_v53, %v2792_v62  ;;  %v2795_v34 = vpop.f32.mrb[86].mxu0 }
 0x1ad   : > { %v2856_v4 = vpop.f32.mrb[84].mxu1  ;;  %v2796_v16 = vpop.f32.mrb[87].mxu0 }
 0x1ae   : > { %v2857_v18 = vpop.f32.mrb[85].mxu1  ;;  %v4019_v9 = vadd.f32 %v2794_v55, %v3924_v32  ;;  %v2797_v52 = vadd.f32 %v2796_v16, %v2795_v34 }
 0x1af   : > { %v2858_v42 = vadd.f32 %v2857_v18, %v2856_v4  ;;  %v2859_v11 = vpop.f32.mrb[86].mxu1 }
 0x1b0   : > { %v2860_v46 = vpop.f32.mrb[87].mxu1  ;;  %v4025_v40 = vadd.f32 %v2797_v52, %v3929_v41 }
 0x1b1   : > { %v2861_v28 = vadd.f32 %v2860_v46, %v2859_v11  ;;  %v4016_v54 = vadd.f32 %v2858_v42, %v3927_v19 }
 0x1b2   : > { %v2798_v21 = vpop.f32.mrb[88].mxu0 }
 0x1b3   : > { %v4022_v30 = vadd.f32 %v2861_v28, %v3932_v47  ;;  %v2799_v17 = vpop.f32.mrb[89].mxu0 }
 0x1b4   : > { %v2800_v19 = vadd.f32 %v2799_v17, %v2798_v21  ;;  %v2801_v13 = vpop.f32.mrb[90].mxu0 }
 0x1b5   : > { %v2862_v45 = vpop.f32.mrb[88].mxu1  ;;  %v2802_v31 = vpop.f32.mrb[91].mxu0 }
 0x1b6   : > { %v2863_v14 = vpop.f32.mrb[89].mxu1  ;;  %v4031_v47 = vadd.f32 %v2800_v19, %v3934_v10  ;;  %v2803_v48 = vadd.f32 %v2802_v31, %v2801_v13 }
 0x1b7   : > { %v2864_v20 = vadd.f32 %v2863_v14, %v2862_v45  ;;  %v2865_v7 = vpop.f32.mrb[90].mxu1 }
 0x1b8   : > { %v2866_v59 = vpop.f32.mrb[91].mxu1  ;;  %v4037_v33 = vadd.f32 %v2803_v48, %v3939_v51 }
 0x1b9   : > { %v2867_v27 = vadd.f32 %v2866_v59, %v2865_v7  ;;  %v4028_v32 = vadd.f32 %v2864_v20, %v3937_v61 }
 0x1ba   : > { %v2804_v8 = vpop.f32.mrb[92].mxu0 }
 0x1bb   : > { %v4034_v41 = vadd.f32 %v2867_v27, %v3942_v38  ;;  %v2805_v18 = vpop.f32.mrb[93].mxu0 }
 0x1bc   : > { %v2806_v61 = vadd.f32 %v2805_v18, %v2804_v8  ;;  %v2807_v42 = vpop.f32.mrb[94].mxu0 }
 0x1bd   : > { %v2868_v37 = vpop.f32.mrb[92].mxu1  ;;  %v2808_v53 = vpop.f32.mrb[95].mxu0 }
 0x1be   : > { %v2869_v24 = vpop.f32.mrb[93].mxu1  ;;  %v4043_v38 = vadd.f32 %v2806_v61, %v3944_v63  ;;  %v2809_v46 = vadd.f32 %v2808_v53, %v2807_v42 }
 0x1bf   : > { %v2870_v44 = vadd.f32 %v2869_v24, %v2868_v37  ;;  %v2871_v4 = vpop.f32.mrb[94].mxu1 }
 0x1c0   : > { %v2872_v62 = vpop.f32.mrb[95].mxu1  ;;  %v4049_v55 = vadd.f32 %v2809_v46, %v3950_v43 }
 0x1c1   : > { %v2873_v11 = vadd.f32 %v2872_v62, %v2871_v4  ;;  %v4040_v10 = vadd.f32 %v2870_v44, %v3947_v26 }
 0x1c2   : > { %v2810_v16 = vpop.f32.mrb[96].mxu0 }
 0x1c3   : > { %v4046_v51 = vadd.f32 %v2873_v11, %v3953_v50  ;;  %v2811_v14 = vpop.f32.mrb[97].mxu0 }
 0x1c4   : > { %v2812_v26 = vadd.f32 %v2811_v14, %v2810_v16  ;;  %v2813_v20 = vpop.f32.mrb[98].mxu0 }
 0x1c5   : > { %v2874_v34 = vpop.f32.mrb[96].mxu1  ;;  %v2814_v17 = vpop.f32.mrb[99].mxu0 }
 0x1c6   : > { %v2875_v28 = vpop.f32.mrb[97].mxu1  ;;  %v4055_v50 = vadd.f32 %v2812_v26, %v3956_v56  ;;  %v2815_v59 = vadd.f32 %v2814_v17, %v2813_v20 }
 0x1c7   : > { %v2876_v52 = vadd.f32 %v2875_v28, %v2874_v34  ;;  %v2877_v45 = vpop.f32.mrb[98].mxu1 }
 0x1c8   : > { %v2878_v21 = vpop.f32.mrb[99].mxu1  ;;  %v4061_v19 = vadd.f32 %v2815_v59, %v3962_v1 }
 0x1c9   : > { %v2879_v7 = vadd.f32 %v2878_v21, %v2877_v45  ;;  %v4052_v63 = vadd.f32 %v2876_v52, %v3959_v5 }
 0x1ca   : > { %v2816_v31 = vpop.f32.mrb[100].mxu0 }
 0x1cb   : > { %v4058_v43 = vadd.f32 %v2879_v7, %v3965_v29  ;;  %v2817_v24 = vpop.f32.mrb[101].mxu0 }
 0x1cc   : > { %v2818_v5 = vadd.f32 %v2817_v24, %v2816_v31  ;;  %v2819_v44 = vpop.f32.mrb[102].mxu0 }
 0x1cd   : > { %v2880_v13 = vpop.f32.mrb[100].mxu1  ;;  %v2820_v18 = vpop.f32.mrb[103].mxu0 }
 0x1ce   : > { %v2881_v27 = vpop.f32.mrb[101].mxu1  ;;  %v4067_v29 = vadd.f32 %v2818_v5, %v3968_v22  ;;  %v2821_v62 = vadd.f32 %v2820_v18, %v2819_v44 }
 0x1cf   : > { %v2882_v48 = vadd.f32 %v2881_v27, %v2880_v13  ;;  %v2883_v37 = vpop.f32.mrb[102].mxu1 }
 0x1d0   : > { %v2884_v8 = vpop.f32.mrb[103].mxu1  ;;  %v4073_v61 = vadd.f32 %v2821_v62, %v3974_v49 }
 0x1d1   : > { %v2885_v4 = vadd.f32 %v2884_v8, %v2883_v37  ;;  %v4064_v56 = vadd.f32 %v2882_v48, %v3971_v39 }
 0x1d2   : > { %v2822_v53 = vpop.f32.mrb[104].mxu0 }
 0x1d3   : > { %v4070_v1 = vadd.f32 %v2885_v4, %v3977_v3  ;;  %v2823_v28 = vpop.f32.mrb[105].mxu0 }
 0x1d4   : > { %v2824_v39 = vadd.f32 %v2823_v28, %v2822_v53  ;;  %v2825_v52 = vpop.f32.mrb[106].mxu0 }
 0x1d5   : > { %v2886_v42 = vpop.f32.mrb[104].mxu1  ;;  %v2826_v14 = vpop.f32.mrb[107].mxu0 }
 0x1d6   : > { %v2887_v11 = vpop.f32.mrb[105].mxu1  ;;  %v4079_v3 = vadd.f32 %v2824_v39, %v3980_v58  ;;  %v2827_v21 = vadd.f32 %v2826_v14, %v2825_v52 }
 0x1d7   : > { %v2888_v46 = vadd.f32 %v2887_v11, %v2886_v42  ;;  %v2889_v34 = vpop.f32.mrb[106].mxu1 }
 0x1d8   : > { %v2890_v16 = vpop.f32.mrb[107].mxu1  ;;  %v4085_v26 = vadd.f32 %v2827_v21, %v3986_v60 }
 0x1d9   : > { %v2891_v45 = vadd.f32 %v2890_v16, %v2889_v34  ;;  %v4076_v22 = vadd.f32 %v2888_v46, %v3983_v2 }
 0x1da   : > { %v2828_v17 = vpop.f32.mrb[108].mxu0 }
 0x1db   : > { %v4082_v49 = vadd.f32 %v2891_v45, %v3989_v35  ;;  %v2829_v27 = vpop.f32.mrb[109].mxu0 }
 0x1dc   : > { %v2830_v31 = vadd.f32 %v2829_v27, %v2828_v17  ;;  %v2831_v48 = vpop.f32.mrb[110].mxu0 }
 0x1dd   : > { %v2892_v20 = vpop.f32.mrb[108].mxu1  ;;  %v2832_v24 = vpop.f32.mrb[111].mxu0 }
 0x1de   : > { %v2893_v7 = vpop.f32.mrb[109].mxu1  ;;  %v4091_v35 = vadd.f32 %v2830_v31, %v3992_v12  ;;  %v2833_v60 = vadd.f32 %v2832_v24, %v2831_v48 }
 0x1df   : > { %v2894_v59 = vadd.f32 %v2893_v7, %v2892_v20  ;;  %v2895_v13 = vpop.f32.mrb[110].mxu1 }
 0x1e0   : > { %v2896_v2 = vpop.f32.mrb[111].mxu1  ;;  %v4097_v5 = vadd.f32 %v2833_v60, %v3998_v0 }
 0x1e1   : > { %v2897_v37 = vadd.f32 %v2896_v2, %v2895_v13  ;;  %v4088_v58 = vadd.f32 %v2894_v59, %v3995_v23 }
 0x1e2   : > { %v2988_v23 = vpop.f32.mrb[112].mxu0 }
 0x1e3   : > { %v4094_v8 = vadd.f32 %v2897_v37, %v4001_v25  ;;  %v2036_v25 = vadd.f32 %v2988_v23, %v4016_v54  ;;  %v2027_v62 = vpop.f32.mrb[113].mxu0 }
 0x1e4   : > { %v2028_v42 = vadd.f32 %v2027_v62, %v4004_v15  ;;  %v2989_v11 = vpop.f32.mrb[114].mxu0 }
 0x1e5   : > { %v2898_v44 = vpop.f32.mrb[112].mxu1  ;;  %2156 = vst [vmem:[%s4104_s7 + $0x10] sm:$0xff] %v2036_v25  ;;  %v2039_v34 = vadd.f32 %v2989_v11, %v4022_v30  ;;  %v2030_v28 = vpop.f32.mrb[115].mxu0 }
 0x1e6   : > { %v2899_v4 = vpop.f32.mrb[113].mxu1  ;;  %2154 = vst [vmem:[%s4104_s7] sm:$0xff] %v2028_v42  ;;  %v2031_v16 = vadd.f32 %v2030_v28, %v4010_v6  ;;  %v2223_v54 = vmul.f32 %v2028_v42, %v2028_v42 }
 0x1e7   : > { %v2900_v12 = vadd.f32 %v2899_v4, %v2898_v44  ;;  %v2901_v18 = vpop.f32.mrb[114].mxu1  ;;  %2157 = vst [vmem:[%s4104_s7 + $0x18] sm:$0xff] %v2039_v34  ;;  %v2226_v59 = vmul.f32 %v2039_v34, %v2039_v34 }
 0x1e8   : > { %v2902_v0 = vpop.f32.mrb[115].mxu1  ;;  %2155 = vst [vmem:[%s4104_s7 + $0x8] sm:$0xff] %v2031_v16  ;;  %v2186_v52 = vadd.f32 %v2031_v16, %v2028_v42  ;;  %v2224_v15 = vmul.f32 %v2031_v16, %v2031_v16 }
 0x1e9   : > { %v2903_v53 = vadd.f32 %v2902_v0, %v2901_v18  ;;  %v4109_v46 = vadd.f32 %v2900_v12, %v4007_v36  ;;  %v2225_v36 = vmul.f32 %v2036_v25, %v2036_v25 }
 0x1ea   : > { %v2187_v21 = vadd.f32 %v2186_v52, %v2036_v25  ;;  %v2255_v20 = vadd.f32 %v2224_v15, %v2223_v54  ;;  %v2992_v7 = vpop.f32.mrb[116].mxu0 }
 0x1eb   : > { %v4116_v39 = vadd.f32 %v2903_v53, %v4013_v57  ;;  %v2052_v6 = vadd.f32 %v2992_v7, %v4040_v10  ;;  %v2043_v57 = vpop.f32.mrb[117].mxu0 }
 0x1ec   : > { %v2256_v27 = vadd.f32 %v2255_v20, %v2225_v36  ;;  %v2044_v2 = vadd.f32 %v2043_v57, %v4028_v32  ;;  %v2188_v31 = vadd.f32 %v2187_v21, %v2039_v34  ;;  %v2993_v48 = vpop.f32.mrb[118].mxu0 }
 0x1ed   : > { %v2904_v45 = vpop.f32.mrb[116].mxu1  ;;  %2160 = vst [vmem:[%s4104_s7 + $0x30] sm:$0xff] %v2052_v6  ;;  %v2055_v24 = vadd.f32 %v2993_v48, %v4046_v51  ;;  %v2046_v60 = vpop.f32.mrb[119].mxu0  ;;  %v2229_v42 = vmul.f32 %v2052_v6, %v2052_v6 }
 0x1ee   : > { %v2905_v14 = vpop.f32.mrb[117].mxu1  ;;  %2158 = vst [vmem:[%s4104_s7 + $0x20] sm:$0xff] %v2044_v2  ;;  %v2189_v4 = vadd.f32 %v2188_v31, %v2044_v2  ;;  %v2227_v10 = vmul.f32 %v2044_v2, %v2044_v2  ;;  %v2257_v23 = vadd.f32 %v2256_v27, %v2226_v59  ;;  %v2047_v12 = vadd.f32 %v2046_v60, %v4034_v41 }
 0x1ef   : > { %v2906_v30 = vadd.f32 %v2905_v14, %v2904_v45  ;;  %v2907_v17 = vpop.f32.mrb[118].mxu1  ;;  %2161 = vst [vmem:[%s4104_s7 + $0x38] sm:$0xff] %v2055_v24  ;;  %v2230_v16 = vmul.f32 %v2055_v24, %v2055_v24 }
 0x1f0   : > { %v2908_v13 = vpop.f32.mrb[119].mxu1  ;;  %v2258_v18 = vadd.f32 %v2257_v23, %v2227_v10  ;;  %2159 = vst [vmem:[%s4104_s7 + $0x28] sm:$0xff] %v2047_v12  ;;  %v2190_v25 = vadd.f32 %v2189_v4, %v2047_v12  ;;  %v2228_v62 = vmul.f32 %v2047_v12, %v2047_v12 }
 0x1f1   : > { %v2909_v37 = vadd.f32 %v2908_v13, %v2907_v17  ;;  %v4125_v44 = vadd.f32 %v2906_v30, %v4019_v9 }
 0x1f2   : > { %v2191_v9 = vadd.f32 %v2190_v25, %v2052_v6  ;;  %v2259_v11 = vadd.f32 %v2258_v18, %v2228_v62  ;;  %v2996_v53 = vpop.f32.mrb[120].mxu0 }
 0x1f3   : > { %v4131_v32 = vadd.f32 %v2909_v37, %v4025_v40  ;;  %v2068_v41 = vadd.f32 %v2996_v53, %v4064_v56  ;;  %v2059_v54 = vpop.f32.mrb[121].mxu0 }
 0x1f4   : > { %v2260_v52 = vadd.f32 %v2259_v11, %v2229_v42  ;;  %v2060_v15 = vadd.f32 %v2059_v54, %v4052_v63  ;;  %v2192_v45 = vadd.f32 %v2191_v9, %v2055_v24  ;;  %v2997_v14 = vpop.f32.mrb[122].mxu0 }
 0x1f5   : > { %v2910_v0 = vpop.f32.mrb[120].mxu1  ;;  %2164 = vst [vmem:[%s4104_s7 + $0x50] sm:$0xff] %v2068_v41  ;;  %v2071_v21 = vadd.f32 %v2997_v14, %v4070_v1  ;;  %v2062_v20 = vpop.f32.mrb[123].mxu0  ;;  %v2233_v2 = vmul.f32 %v2068_v41, %v2068_v41 }
 0x1f6   : > { %v2911_v51 = vpop.f32.mrb[121].mxu1  ;;  %2162 = vst [vmem:[%s4104_s7 + $0x40] sm:$0xff] %v2060_v15  ;;  %v2193_v30 = vadd.f32 %v2192_v45, %v2060_v15  ;;  %v2231_v56 = vmul.f32 %v2060_v15, %v2060_v15  ;;  %v2261_v17 = vadd.f32 %v2260_v52, %v2230_v16  ;;  %v2063_v59 = vadd.f32 %v2062_v20, %v4058_v43 }
 0x1f7   : > { %v2912_v34 = vadd.f32 %v2911_v51, %v2910_v0  ;;  %v2913_v28 = vpop.f32.mrb[122].mxu1  ;;  %2165 = vst [vmem:[%s4104_s7 + $0x58] sm:$0xff] %v2071_v21  ;;  %v2234_v60 = vmul.f32 %v2071_v21, %v2071_v21 }
 0x1f8   : > { %v2914_v40 = vpop.f32.mrb[123].mxu1  ;;  %v2262_v6 = vadd.f32 %v2261_v17, %v2231_v56  ;;  %2163 = vst [vmem:[%s4104_s7 + $0x48] sm:$0xff] %v2063_v59  ;;  %v2194_v57 = vadd.f32 %v2193_v30, %v2063_v59  ;;  %v2232_v13 = vmul.f32 %v2063_v59, %v2063_v59 }
 0x1f9   : > { %v2915_v36 = vadd.f32 %v2914_v40, %v2913_v28  ;;  %v4139_v7 = vadd.f32 %v2912_v34, %v4031_v47 }
 0x1fa   : > { %v2195_v47 = vadd.f32 %v2194_v57, %v2068_v41  ;;  %v2263_v31 = vadd.f32 %v2262_v6, %v2232_v13  ;;  %v3000_v48 = vpop.f32.mrb[124].mxu0 }
 0x1fb   : > { %v4145_v63 = vadd.f32 %v2915_v36, %v4037_v33  ;;  %v2084_v43 = vadd.f32 %v3000_v48, %v4088_v58  ;;  %v2075_v4 = vpop.f32.mrb[125].mxu0 }
 0x1fc   : > { %v2264_v10 = vadd.f32 %v2263_v31, %v2233_v2  ;;  %v2076_v23 = vadd.f32 %v2075_v4, %v4076_v22  ;;  %v2196_v12 = vadd.f32 %v2195_v47, %v2071_v21  ;;  %v3001_v18 = vpop.f32.mrb[126].mxu0 }
 0x1fd   : > { %v2916_v27 = vpop.f32.mrb[124].mxu1  ;;  %2168 = vst [vmem:[%s4104_s7 + $0x70] sm:$0xff] %v2084_v43  ;;  %v2087_v62 = vadd.f32 %v3001_v18, %v4094_v8  ;;  %v2078_v0 = vpop.f32.mrb[127].mxu0  ;;  %v2237_v8 = vmul.f32 %v2084_v43, %v2084_v43 }
 0x1fe   : > { %v2917_v1 = vpop.f32.mrb[125].mxu1  ;;  %2166 = vst [vmem:[%s4104_s7 + $0x60] sm:$0xff] %v2076_v23  ;;  %v2197_v42 = vadd.f32 %v2196_v12, %v2076_v23  ;;  %v2235_v9 = vmul.f32 %v2076_v23, %v2076_v23  ;;  %v2265_v58 = vadd.f32 %v2264_v10, %v2234_v60  ;;  %v2079_v11 = vadd.f32 %v2078_v0, %v4082_v49 }
 0x1ff   : > { %v2918_v37 = vadd.f32 %v2917_v1, %v2916_v27  ;;  %v2919_v24 = vpop.f32.mrb[126].mxu1  ;;  %2169 = vst [vmem:[%s4104_s7 + $0x78] sm:$0xff] %v2087_v62  ;;  %v2238_v45 = vmul.f32 %v2087_v62, %v2087_v62 }
 0x200   : > { %v2920_v33 = vpop.f32.mrb[127].mxu1  ;;  %v2266_v22 = vadd.f32 %v2265_v58, %v2235_v9  ;;  %2167 = vst [vmem:[%s4104_s7 + $0x68] sm:$0xff] %v2079_v11  ;;  %v2198_v34 = vadd.f32 %v2197_v42, %v2079_v11  ;;  %v2236_v28 = vmul.f32 %v2079_v11, %v2079_v11 }
 0x201   : > { %v2921_v25 = vadd.f32 %v2920_v33, %v2919_v24  ;;  %v1955_v51 = vadd.f32 %v2918_v37, %v4043_v38 }
 0x202   : > { %v2199_v54 = vadd.f32 %v2198_v34, %v2084_v43  ;;  %v2267_v40 = vadd.f32 %v2266_v22, %v2236_v28  ;;  %v3004_v38 = vpop.f32.mrb[128].mxu0 }
 0x203   : > { %v1958_v53 = vadd.f32 %v2921_v25, %v4049_v55  ;;  %v2100_v49 = vadd.f32 %v3004_v38, %v4125_v44  ;;  %v2091_v14 = vpop.f32.mrb[129].mxu0 }
 0x204   : > { %v2268_v36 = vadd.f32 %v2267_v40, %v2237_v8  ;;  %v2092_v21 = vadd.f32 %v2091_v14, %v4109_v46  ;;  %v2200_v20 = vadd.f32 %v2199_v54, %v2087_v62  ;;  %v3005_v30 = vpop.f32.mrb[130].mxu0 }
 0x205   : > { %v2922_v16 = vpop.f32.mrb[128].mxu1  ;;  %2172 = vst [vmem:[%s4104_s7 + $0x90] sm:$0xff] %v2100_v49  ;;  %v2103_v17 = vadd.f32 %v3005_v30, %v4131_v32  ;;  %v2094_v59 = vpop.f32.mrb[131].mxu0  ;;  %v2241_v32 = vmul.f32 %v2100_v49, %v2100_v49 }
 0x206   : > { %v2923_v41 = vpop.f32.mrb[129].mxu1  ;;  %2170 = vst [vmem:[%s4104_s7 + $0x80] sm:$0xff] %v2092_v21  ;;  %v2201_v57 = vadd.f32 %v2200_v20, %v2092_v21  ;;  %v2239_v13 = vmul.f32 %v2092_v21, %v2092_v21  ;;  %v2269_v44 = vadd.f32 %v2268_v36, %v2238_v45  ;;  %v2095_v27 = vadd.f32 %v2094_v59, %v4116_v39 }
 0x207   : > { %v2924_v52 = vadd.f32 %v2923_v41, %v2922_v16  ;;  %v2925_v15 = vpop.f32.mrb[130].mxu1  ;;  %2173 = vst [vmem:[%s4104_s7 + $0x98] sm:$0xff] %v2103_v17  ;;  %v2242_v4 = vmul.f32 %v2103_v17, %v2103_v17 }
 0x208   : > { %v2926_v55 = vpop.f32.mrb[131].mxu1  ;;  %v2270_v46 = vadd.f32 %v2269_v44, %v2239_v13  ;;  %2171 = vst [vmem:[%s4104_s7 + $0x88] sm:$0xff] %v2095_v27  ;;  %v2202_v2 = vadd.f32 %v2201_v57, %v2095_v27  ;;  %v2240_v47 = vmul.f32 %v2095_v27, %v2095_v27 }
 0x209   : > { %v2927_v56 = vadd.f32 %v2926_v55, %v2925_v15  ;;  %v1963_v6 = vadd.f32 %v2924_v52, %v4055_v50 }
 0x20a   : > { %v2203_v37 = vadd.f32 %v2202_v2, %v2100_v49  ;;  %v2271_v24 = vadd.f32 %v2270_v46, %v2240_v47  ;;  %v3008_v50 = vpop.f32.mrb[132].mxu0 }
 0x20b   : > { %v1966_v1 = vadd.f32 %v2927_v56, %v4061_v19  ;;  %v2116_v33 = vadd.f32 %v3008_v50, %v1955_v51  ;;  %v2107_v39 = vpop.f32.mrb[133].mxu0 }
 0x20c   : > { %v2272_v19 = vadd.f32 %v2271_v24, %v2241_v32  ;;  %v2108_v23 = vadd.f32 %v2107_v39, %v4139_v7  ;;  %v2204_v12 = vadd.f32 %v2203_v37, %v2103_v17  ;;  %v3009_v18 = vpop.f32.mrb[134].mxu0 }
 0x20d   : > { %v2928_v31 = vpop.f32.mrb[132].mxu1  ;;  %2176 = vst [vmem:[%s4104_s7 + $0xb0] sm:$0xff] %v2116_v33  ;;  %v2119_v62 = vadd.f32 %v3009_v18, %v1958_v53  ;;  %v2110_v0 = vpop.f32.mrb[135].mxu0  ;;  %v2245_v53 = vmul.f32 %v2116_v33, %v2116_v33 }
 0x20e   : > { %v2929_v48 = vpop.f32.mrb[133].mxu1  ;;  %2174 = vst [vmem:[%s4104_s7 + $0xa0] sm:$0xff] %v2108_v23  ;;  %v2205_v9 = vadd.f32 %v2204_v12, %v2108_v23  ;;  %v2243_v58 = vmul.f32 %v2108_v23, %v2108_v23  ;;  %v2273_v11 = vadd.f32 %v2272_v19, %v2242_v4  ;;  %v2111_v51 = vadd.f32 %v2110_v0, %v4145_v63 }
 0x20f   : > { %v2930_v60 = vadd.f32 %v2929_v48, %v2928_v31  ;;  %v2931_v43 = vpop.f32.mrb[134].mxu1  ;;  %2177 = vst [vmem:[%s4104_s7 + $0xb8] sm:$0xff] %v2119_v62  ;;  %v2246_v52 = vmul.f32 %v2119_v62, %v2119_v62 }
 0x210   : > { %v2932_v10 = vpop.f32.mrb[135].mxu1  ;;  %v2274_v34 = vadd.f32 %v2273_v11, %v2243_v58  ;;  %2175 = vst [vmem:[%s4104_s7 + $0xa8] sm:$0xff] %v2111_v51  ;;  %v2206_v7 = vadd.f32 %v2205_v9, %v2111_v51  ;;  %v2244_v28 = vmul.f32 %v2111_v51, %v2111_v51 }
 0x211   : > { %v2933_v25 = vadd.f32 %v2932_v10, %v2931_v43  ;;  %v1971_v42 = vadd.f32 %v2930_v60, %v4067_v29 }
 0x212   : > { %v2207_v8 = vadd.f32 %v2206_v7, %v2116_v33  ;;  %v2275_v54 = vadd.f32 %v2274_v34, %v2244_v28  ;;  %v3012_v29 = vpop.f32.mrb[136].mxu0 }
 0x213   : > { %v1974_v22 = vadd.f32 %v2933_v25, %v4073_v61  ;;  %v2132_v15 = vadd.f32 %v3012_v29, %v1971_v42  ;;  %v2123_v63 = vpop.f32.mrb[137].mxu0 }
 0x214   : > { %v2276_v61 = vadd.f32 %v2275_v54, %v2245_v53  ;;  %v2124_v49 = vadd.f32 %v2123_v63, %v1963_v6  ;;  %v2208_v14 = vadd.f32 %v2207_v8, %v2119_v62  ;;  %v3013_v55 = vpop.f32.mrb[138].mxu0 }
 0x215   : > { %v2934_v16 = vpop.f32.mrb[136].mxu1  ;;  %2180 = vst [vmem:[%s4104_s7 + $0xd0] sm:$0xff] %v2132_v15  ;;  %v2135_v21 = vadd.f32 %v3013_v55, %v1974_v22  ;;  %v2126_v20 = vpop.f32.mrb[139].mxu0  ;;  %v2249_v47 = vmul.f32 %v2132_v15, %v2132_v15 }
 0x216   : > { %v2935_v41 = vpop.f32.mrb[137].mxu1  ;;  %2178 = vst [vmem:[%s4104_s7 + $0xc0] sm:$0xff] %v2124_v49  ;;  %v2209_v56 = vadd.f32 %v2208_v14, %v2124_v49  ;;  %v2247_v17 = vmul.f32 %v2124_v49, %v2124_v49  ;;  %v2277_v59 = vadd.f32 %v2276_v61, %v2246_v52  ;;  %v2127_v57 = vadd.f32 %v2126_v20, %v1966_v1 }
 0x217   : > { %v2936_v40 = vadd.f32 %v2935_v41, %v2934_v16  ;;  %v2937_v38 = vpop.f32.mrb[138].mxu1  ;;  %2181 = vst [vmem:[%s4104_s7 + $0xd8] sm:$0xff] %v2135_v21  ;;  %v2250_v24 = vmul.f32 %v2135_v21, %v2135_v21 }
 0x218   : > { %v2938_v45 = vpop.f32.mrb[139].mxu1  ;;  %v2278_v44 = vadd.f32 %v2277_v59, %v2247_v17  ;;  %2179 = vst [vmem:[%s4104_s7 + $0xc8] sm:$0xff] %v2127_v57  ;;  %v2210_v6 = vadd.f32 %v2209_v56, %v2127_v57  ;;  %v2248_v27 = vmul.f32 %v2127_v57, %v2127_v57 }
 0x219   : > { %v2939_v36 = vadd.f32 %v2938_v45, %v2937_v38  ;;  %v1979_v30 = vadd.f32 %v2936_v40, %v4079_v3 }
 0x21a   : > { %v2211_v31 = vadd.f32 %v2210_v6, %v2132_v15  ;;  %v2279_v48 = vadd.f32 %v2278_v44, %v2248_v27  ;;  %v3016_v32 = vpop.f32.mrb[140].mxu0 }
 0x21b   : > { %v1982_v13 = vadd.f32 %v2939_v36, %v4085_v26  ;;  %v2139_v50 = vpop.f32.mrb[141].mxu0 }
 0x21c   : > { %v2280_v60 = vadd.f32 %v2279_v48, %v2249_v47  ;;  %v2140_v43 = vadd.f32 %v2139_v50, %v1979_v30  ;;  %v2212_v4 = vadd.f32 %v2211_v31, %v2135_v21  ;;  %v3017_v33 = vpop.f32.mrb[142].mxu0 }
 0x21d   : > { %v2940_v46 = vpop.f32.mrb[140].mxu1  ;;  %v2142_v10 = vpop.f32.mrb[143].mxu0 }
 0x21e   : > { %v2941_v2 = vpop.f32.mrb[141].mxu1  ;;  %2182 = vst [vmem:[%s4104_s7 + $0xe0] sm:$0xff] %v2140_v43  ;;  %v2213_v23 = vadd.f32 %v2212_v4, %v2140_v43  ;;  %v2251_v12 = vmul.f32 %v2140_v43, %v2140_v43  ;;  %v2281_v18 = vadd.f32 %v2280_v60, %v2250_v24  ;;  %v2143_v62 = vadd.f32 %v2142_v10, %v1982_v13 }
 0x21f   : > { %v2942_v3 = vadd.f32 %v2941_v2, %v2940_v46  ;;  %v2943_v37 = vpop.f32.mrb[142].mxu1 }
 0x220   : > { %v2944_v1 = vpop.f32.mrb[143].mxu1  ;;  %v2282_v0 = vadd.f32 %v2281_v18, %v2251_v12  ;;  %2183 = vst [vmem:[%s4104_s7 + $0xe8] sm:$0xff] %v2143_v62  ;;  %v2252_v58 = vmul.f32 %v2143_v62, %v2143_v62 }
 0x221   : > { %v1987_v26 = vadd.f32 %v2942_v3, %v4091_v35  ;;  %v2945_v39 = vadd.f32 %v2944_v1, %v2943_v37  ;;  %v2214_v35 = vadd.f32 %v2213_v23, %v2143_v62 }
 0x222   : > { %v2283_v22 = vadd.f32 %v2282_v0, %v2252_v58 }
 0x223   : > { %v2148_v19 = vadd.f32 %v3016_v32, %v1987_v26  ;;  %v1990_v25 = vadd.f32 %v2945_v39, %v4097_v5 }
 0x225   : > { %2184 = vst [vmem:[%s4104_s7 + $0xf0] sm:$0xff] %v2148_v19  ;;  %v2253_v42 = vmul.f32 %v2148_v19, %v2148_v19  ;;  %v2151_v9 = vadd.f32 %v3017_v33, %v1990_v25  ;;  %v2215_v51 = vadd.f32 %v2214_v35, %v2148_v19 }
 0x227   : > { %2185 = vst [vmem:[%s4104_s7 + $0xf8] sm:$0xff] %v2151_v9  ;;  %v2254_v11 = vmul.f32 %v2151_v9, %v2151_v9  ;;  %v2216_v34 = vadd.f32 %v2215_v51, %v2151_v9  ;;  %v2284_v7 = vadd.f32 %v2283_v22, %v2253_v42 }
 0x229   : > { %v2217_v28 = vrot.slane %v2216_v34, 4  ;;  %v2285_v16 = vadd.f32 %v2284_v7, %v2254_v11 }
 0x22b   : > { %v2218_v41 = vadd.f32 %v2217_v28, %v2216_v34  ;;  %v2286_v53 = vrot.slane %v2285_v16, 4 }
 0x22d   : > { %v2219_v5 = vrot.slane %v2218_v41, 2  ;;  %v2287_v8 = vadd.f32 %v2286_v53, %v2285_v16 }
 0x22f   : > { %v2220_v54 = vadd.f32 %v2219_v5, %v2218_v41  ;;  %v2288_v29 = vrot.slane %v2287_v8, 2 }
 0x231   : > { %v2221_v40 = vrot.slane %v2220_v54, 1  ;;  %v2289_v38 = vadd.f32 %v2288_v29, %v2287_v8 }
 0x233   : > { %v2222_v52 = vadd.f32 %v2221_v40, %v2220_v54  ;;  %v2290_v15 = vrot.slane %v2289_v38, 1 }
 0x235   : > { %v2291_v63 = vadd.f32 %v2290_v15, %v2289_v38  ;;  %2292 = vst [vmem:[%s214_s10] sm:$0xff] %v2222_v52 }
 0x237   : > { %2293 = vst [vmem:[%s218_s14] sm:$0xff] %v2291_v63 }
 0x238 PF: > { %s15_s15 = sadd.s32 1, %s3122_s15  }
 0x239   : > { %p12_p4 = scmp.ge.s32.totalorder %s15_s15, 4  }
 0x23b   :  { %14 = sbr.rel (!%p12_p4) target bundleno = 1 (0x1), region = 83 }

// kernel: double_conv.4
= control target key start
LH: loop header
LB: loop body
LE: loop exit
PB: predicated region body
PF: predicated region fallthrough
CT: control target
= control target key end

     0   :  { %s3330_s21 = smov 0   ;;  %s4466_s0 = inlined_call_operand.vmem [shape: f32[2,16,16,128], index: 0, kind: input, shape index: {}]   ;;  %s4467_s1 = inlined_call_operand.vmem [shape: bf16[1152,128], index: 1, kind: input, shape index: {}]   ;;  %s4468_s2 = inlined_call_operand.vmem [shape: f32[1,128], index: 2, kind: input, shape index: {}]   ;;  %s4469_s3 = inlined_call_operand.vmem [shape: f32[1,128], index: 3, kind: input, shape index: {}]   ;;  %s4470_s4 = inlined_call_operand.vmem [shape: f32[2,16,16,128], index: 4, kind: output, shape index: {0}]   ;;  %s4471_s5 = inlined_call_operand.vmem [shape: f32[2,8,128], index: 5, kind: output, shape index: {1}]   ;;  %s4472_s6 = inlined_call_operand.vmem [shape: f32[2,8,128], index: 6, kind: output, shape index: {2}]  }
   0x1 LB: > { %s2575_s22 = sadd.s32 4294967295, %s3290_s21   ;;  %p2579_p0 = scmp.ge.s32.totalorder %s3290_s21, 1  ;;  %s3290_s21 = sphi %s3330_s21, %s17_s21  }
   0x2   : > { %p217_p1 = scmp.lt.s32.totalorder %s3290_s21, 3 }
   0x4   : > { %p218_p2 = pnand %p2579_p0, %p217_p1 }
   0x5   : > { %v3209_v0 = vld [vmem:[%s4467_s1 + $0x40] sm:$0xff] (!%p218_p2)   ;;  %v3292_v2 = vmov (!%p218_p2), 0.0   ;;  %v3211_v3 = vld [vmem:[%s4467_s1 + $0x48] sm:$0xff] (!%p218_p2)   ;;  %p255_p3 = scmp.lt.s32.totalorder (!%p218_p2), %s2575_s22, 1  ;;  %v3213_v5 = vld [vmem:[%s4467_s1 + $0x50] sm:$0xff] (!%p218_p2)   ;;  %v3293_v12 = vmov (!%p218_p2), 0  }
   0x6   : > { %221 = sbr.rel (%p218_p2) target bundleno = 568 (0x238), region = 36  ;;  %v3210_v1 = vld [vmem:[%s4467_s1] sm:$0xff] (!%p218_p2)   ;;  %274 = vst [vmem:[#allocation2] sm:$0xff] (!%p218_p2), %v3292_v2  ;;  %276 = vst [vmem:[#allocation2 + $0x10] sm:$0x3] (!%p218_p2), %v3292_v2  ;;  %2664 = vmatprep.subr.bf16.mxu0 (!%p218_p2), %v3209_v0  ;;  %3184 = vmatprep.subr.bf16.mxu1 (!%p218_p2), %v3209_v0  ;;  %v3212_v4 = vld [vmem:[%s4467_s1 + $0x8] sm:$0xff] (!%p218_p2)  }
   0x7   : > { %277 = vst [vmem:[#allocation2 + $0x18] sm:$0xff] (!%p218_p2), %v3292_v2  ;;  %278 = vst [vmem:[#allocation2 + $0x20] sm:$0xff] (!%p218_p2), %v3292_v2  ;;  %2665 = vmatpush3.bf16.msra.mxu0 (!%p218_p2), %v3210_v1  ;;  %3192 = vmatpush3.bf16.msra.mxu1 (!%p218_p2), %v3210_v1  ;;  %v3214_v6 = vld [vmem:[%s4467_s1 + $0x10] sm:$0xff] (!%p218_p2)   ;;  %v3215_v7 = vld [vmem:[%s4467_s1 + $0x58] sm:$0xff] (!%p218_p2)   ;;  %v599_v13 = vrot.slane (!%p218_p2), %v3293_v12, 1  ;;  %vm834_vm1 = vcmask (!%p218_p2), 1046528  }
   0x8   : > { %279 = vst [vmem:[#allocation2 + $0x28] sm:$0x3] (!%p218_p2), %v3292_v2  ;;  %280 = vst [vmem:[#allocation2 + $0x30] sm:$0xff] (!%p218_p2), %v3292_v2  ;;  %2666 = vmatprep.subr.bf16.mxu0 (!%p218_p2), %v3211_v3  ;;  %3185 = vmatprep.subr.bf16.mxu1 (!%p218_p2), %v3211_v3  ;;  %v3216_v8 = vld [vmem:[%s4467_s1 + $0x18] sm:$0xff] (!%p218_p2)   ;;  %v3217_v9 = vld [vmem:[%s4467_s1 + $0x60] sm:$0xff] (!%p218_p2)  }
   0x9   : > { %281 = vst [vmem:[#allocation2 + $0x38] sm:$0xff] (!%p218_p2), %v3292_v2  ;;  %282 = vst [vmem:[#allocation2 + $0x40] sm:$0x3] (!%p218_p2), %v3292_v2  ;;  %v3218_v10 = vld [vmem:[%s4467_s1 + $0x20] sm:$0xff] (!%p218_p2)   ;;  %v3219_v11 = vld [vmem:[%s4467_s1 + $0x68] sm:$0xff] (!%p218_p2)  }
   0xa   : > { %283 = vst [vmem:[#allocation2 + $0x48] sm:$0xff] (!%p218_p2), %v3292_v2  ;;  %284 = vst [vmem:[#allocation2 + $0x50] sm:$0xff] (!%p218_p2), %v3292_v2  ;;  %v3392_v18 = vld [vmem:[%s4468_s2] ss:$0 sm:$0xff] (!%p218_p2)  ;;  %v3220_v20 = vld [vmem:[%s4467_s1 + $0x28] sm:$0xff] (!%p218_p2)  }
   0xb   : > { %285 = vst [vmem:[#allocation2 + $0x58] sm:$0x3] (!%p218_p2), %v3292_v2  ;;  %286 = vst [vmem:[#allocation2 + $0x60] sm:$0xff] (!%p218_p2), %v3292_v2  ;;  %2667 = vmatpush3.bf16.msra.mxu0 (!%p218_p2), %v3212_v4  ;;  %3193 = vmatpush3.bf16.msra.mxu1 (!%p218_p2), %v3212_v4  ;;  %v3397_v19 = vld [vmem:[%s4469_s3] ss:$0 sm:$0xff] (!%p218_p2)  ;;  %v3221_v23 = vld [vmem:[%s4467_s1 + $0x70] sm:$0xff] (!%p218_p2)  }
   0xc   : > { %287 = vst [vmem:[#allocation2 + $0x68] sm:$0xff] (!%p218_p2), %v3292_v2  ;;  %288 = vst [vmem:[#allocation2 + $0x70] sm:$0x3] (!%p218_p2), %v3292_v2  ;;  %2668 = vmatprep.subr.bf16.mxu0 (!%p218_p2), %v3213_v5  ;;  %3186 = vmatprep.subr.bf16.mxu1 (!%p218_p2), %v3213_v5  ;;  %vm593_vm0 = vsmask.f32 (!%p218_p2), 7424  ;;  %v3222_v28 = vld [vmem:[%s4467_s1 + $0x30] sm:$0xff] (!%p218_p2)  }
   0xd   : > { %289 = vst [vmem:[#allocation2 + $0x78] sm:$0xff] %v3292_v2  ;;  %290 = vst [vmem:[#allocation2 + $0x80] sm:$0xff] %v3292_v2  ;;  %s4474_s22 = smov (!%p255_p3, %s2575_s22), 1  ;;  %v505_v14 = vld [vmem:[#allocation2 + $0x10] sm:$0x3]  ;;  %v3223_v29 = vld [vmem:[%s4467_s1 + $0x78] sm:$0xff]  }
   0xe   : > { %291 = vst [vmem:[#allocation2 + $0x88] sm:$0x3] %v3292_v2  ;;  %292 = vst [vmem:[#allocation2 + $0x90] sm:$0xff] %v3292_v2  ;;  %s2662_s13 = sshll.u32 %s4474_s22, 8  ;;  %v3387_v17 = vpack.c.bf16 %v505_v14, %v505_v14  ;;  %v3224_v41 = vld [vmem:[%s4467_s1 + $0x38] sm:$0xff]   ;;  %v3225_v43 = vld [vmem:[%s4467_s1 + $0xc0] sm:$0xff]  }
   0xf   : > { %293 = vst [vmem:[#allocation2 + $0x98] sm:$0xff] %v3292_v2  ;;  %294 = vst [vmem:[#allocation2 + $0xa0] sm:$0x3] %v3292_v2  ;;  %2669 = vmatpush3.bf16.msra.mxu0 %v3214_v6  ;;  %3194 = vmatpush3.bf16.msra.mxu1 %v3214_v6  ;;  %s3377_s20 = scalar_lea.vmem %s4466_s0, %s2662_s13  ;;  %v3226_v47 = vld [vmem:[%s4467_s1 + $0x140] sm:$0xff]   ;;  %v3234_v58 = vld [vmem:[%s4467_s1 + $0x148] sm:$0xff]   ;;  %v3294_v4 = vmov 0.0|0.0   ;;  %s4372_s15 = scalar_lea.vmem %s4470_s4, %s2662_s13 }
  0x10   : > { %295 = vst [vmem:[#allocation2 + $0xa8] sm:$0xff] %v3292_v2  ;;  %296 = vst [vmem:[#allocation2 + $0xb0] sm:$0xff] %v3292_v2  ;;  %2670 = vmatprep.subr.bf16.mxu0 %v3215_v7  ;;  %3187 = vmatprep.subr.bf16.mxu1 %v3215_v7  ;;  %v350_v15 = vld [vmem:[%s3377_s20 + $0xb0] sm:$0xff]  ;;  %v351_v16 = vld [vmem:[%s3377_s20 + $0xb8] sm:$0xff]  ;;  %v602_v24 = vshll.u32 %v3387_v17, 16  ;;  %s2584_s13 = sshll.u32 %s4474_s22, 3 }
  0x11   : > { %297 = vst [vmem:[#allocation2 + $0xb8] sm:$0x3] %v3292_v2  ;;  %298 = vst [vmem:[#allocation2 + $0xc0] sm:$0xff] %v3292_v2  ;;  %v390_v21 = vmul.f32 %v3392_v18, %v350_v15  ;;  %v391_v22 = vmul.f32 %v3392_v18, %v351_v16  ;;  %v328_v33 = vld [vmem:[%s3377_s20] sm:$0xff]  ;;  %v329_v34 = vld [vmem:[%s3377_s20 + $0x8] sm:$0xff]  ;;  %s268_s18 = scalar_lea.vmem %s4471_s5, %s2584_s13  ;;  %s272_s23 = scalar_lea.vmem %s4472_s6, %s2584_s13 }
  0x12   : > { %299 = vst [vmem:[#allocation2 + $0xc8] sm:$0xff] %v3292_v2  ;;  %300 = vst [vmem:[#allocation2 + $0xd0] sm:$0x3] %v3292_v2  ;;  %v604_v27 = vrot.slane %v602_v24, 1  ;;  %v368_v35 = vmul.f32 %v3392_v18, %v328_v33  ;;  %v352_v36 = vld [vmem:[%s3377_s20 + $0xc0] sm:$0xff]  ;;  %v353_v37 = vld [vmem:[%s3377_s20 + $0xc8] sm:$0xff]  ;;  %v369_v38 = vmul.f32 %v3392_v18, %v329_v34 }
  0x13   : > { %301 = vst [vmem:[#allocation2 + $0xd8] sm:$0xff] %v3292_v2  ;;  %302 = vst [vmem:[#allocation2 + $0xe0] sm:$0xff] %v3292_v2  ;;  %2671 = vmatpush3.bf16.msra.mxu0 %v3216_v8  ;;  %3195 = vmatpush3.bf16.msra.mxu1 %v3216_v8  ;;  %v428_v25 = vadd.f32 %v3397_v19, %v390_v21  ;;  %v429_v26 = vadd.f32 %v3397_v19, %v391_v22  ;;  %v3228_v49 = vld [vmem:[%s4467_s1 + $0x100] sm:$0xff]   ;;  %v330_v59 = vld [vmem:[%s3377_s20 + $0x10] sm:$0xff] }
  0x14   : > { %303 = vst [vmem:[#allocation2 + $0xe8] sm:$0x3] %v3292_v2  ;;  %304 = vst [vmem:[#allocation2 + $0xf0] sm:$0xff] %v3292_v2  ;;  %2672 = vmatprep.subr.bf16.mxu0 %v3217_v9  ;;  %3188 = vmatprep.subr.bf16.mxu1 %v3217_v9  ;;  %v605_v32 = vsel %vm593_vm0, %v599_v13, %v604_v27  ;;  %v392_v39 = vmul.f32 %v3392_v18, %v352_v36  ;;  %v331_v60 = vld [vmem:[%s3377_s20 + $0x18] sm:$0xff]  ;;  %v354_v63 = vld [vmem:[%s3377_s20 + $0xd0] sm:$0xff] }
  0x15   : > { %305 = vst [vmem:[#allocation2 + $0xf8] sm:$0xff] %v3292_v2  ;;  %306 = vst [vmem:[#allocation2 + $0x100] sm:$0x3] %v3292_v2  ;;  %v460_v30 = vmax.f32 %v428_v25, 0.0  ;;  %v461_v31 = vmax.f32 %v429_v26, 0.0  ;;  %1545 = vmatprep.mubr.bf16.mxu0 %v605_v32  ;;  %v393_v40 = vmul.f32 %v3392_v18, %v353_v37  ;;  %v406_v42 = vadd.f32 %v3397_v19, %v368_v35  ;;  %v355_v0 = vld [vmem:[%s3377_s20 + $0xd8] sm:$0xff] }
  0x16   : > { %307 = vst [vmem:[#allocation2 + $0x108] sm:$0xff] %v3292_v2  ;;  %308 = vst [vmem:[#allocation2 + $0x110] sm:$0xff] %v3292_v2  ;;  %v407_v44 = vadd.f32 %v3397_v19, %v369_v38  ;;  %v430_v45 = vadd.f32 %v3397_v19, %v392_v39  ;;  %v370_v61 = vmul.f32 %v3392_v18, %v330_v59  ;;  %v3236_v6 = vld [vmem:[%s4467_s1 + $0x108] sm:$0xff]   ;;  %v3227_v13 = vld [vmem:[%s4467_s1 + $0x80] sm:$0xff]  }
  0x17   : > { %309 = vst [vmem:[#allocation2 + $0x118] sm:$0x3] %v3292_v2  ;;  %310 = vst [vmem:[#allocation2 + $0x120] sm:$0xff] %v3292_v2  ;;  %2673 = vmatpush3.bf16.msra.mxu0 %v3218_v10  ;;  %3196 = vmatpush3.bf16.msra.mxu1 %v3218_v10  ;;  %v431_v46 = vadd.f32 %v3397_v19, %v393_v40  ;;  %v438_v48 = vmax.f32 %v406_v42, 0.0  ;;  %v371_v62 = vmul.f32 %v3392_v18, %v331_v60  ;;  %v3229_v32 = vld [vmem:[%s4467_s1 + $0xc8] sm:$0xff]   ;;  %v332_v35 = vld [vmem:[%s3377_s20 + $0x20] sm:$0xff] }
  0x18   : > { %311 = vst [vmem:[#allocation2 + $0x128] sm:$0xff] %v3292_v2  ;;  %312 = vst [vmem:[#allocation2 + $0x130] sm:$0x3] %v3292_v2  ;;  %2674 = vmatprep.subr.bf16.mxu0 %v3219_v11  ;;  %3189 = vmatprep.subr.bf16.mxu1 %v3219_v11  ;;  %v439_v50 = vmax.f32 %v407_v44, 0.0  ;;  %v462_v51 = vmax.f32 %v430_v45, 0.0  ;;  %v394_v5 = vmul.f32 %v3392_v18, %v354_v63  ;;  %v333_v36 = vld [vmem:[%s3377_s20 + $0x28] sm:$0xff] }
  0x19   : > { %313 = vst [vmem:[#allocation2 + $0x138] sm:$0xff] %v3292_v2  ;;  %314 = vst [vmem:[#allocation2 + $0x140] sm:$0xff] %v3292_v2  ;;  %v463_v52 = vmax.f32 %v431_v46, 0.0  ;;  %v408_v7 = vadd.f32 %v3397_v19, %v370_v61  ;;  %v409_v8 = vadd.f32 %v3397_v19, %v371_v62  ;;  %v395_v9 = vmul.f32 %v3392_v18, %v355_v0  ;;  %v3230_v37 = vld [vmem:[%s4467_s1 + $0x88] sm:$0xff]   ;;  %v356_v42 = vld [vmem:[%s3377_s20 + $0xe0] sm:$0xff] }
  0x1a   : > { %315 = vst [vmem:[#allocation2 + $0x148] sm:$0x3] %v3292_v2  ;;  %316 = vst [vmem:[#allocation2 + $0x150] sm:$0xff] %v3292_v2  ;;  %v432_v12 = vadd.f32 %v3397_v19, %v394_v5  ;;  %v3232_v61 = vld [vmem:[%s4467_s1 + $0x90] sm:$0xff]  }
  0x1b   : > { %317 = vst [vmem:[#allocation2 + $0x158] sm:$0xff] %v3292_v2  ;;  %318 = vst [vmem:[#allocation2 + $0x160] sm:$0x3] %v3292_v2  ;;  %2675 = vmatpush3.bf16.msra.mxu0 %v3220_v20  ;;  %3197 = vmatpush3.bf16.msra.mxu1 %v3220_v20  ;;  %v440_v15 = vmax.f32 %v408_v7, 0.0  ;;  %v441_v16 = vmax.f32 %v409_v8, 0.0  ;;  %v433_v20 = vadd.f32 %v3397_v19, %v395_v9 }
  0x1c   : > { %319 = vst [vmem:[#allocation2 + $0x168] sm:$0xff] %v3292_v2  ;;  %320 = vst [vmem:[#allocation2 + $0x170] sm:$0xff] %v3292_v2  ;;  %2676 = vmatprep.subr.bf16.mxu0 %v3221_v23  ;;  %3190 = vmatprep.subr.bf16.mxu1 %v3221_v23  ;;  %v464_v25 = vmax.f32 %v432_v12, 0.0 }
  0x1d   : > { %321 = vst [vmem:[#allocation2 + $0x178] sm:$0x3] %v3292_v2  ;;  %322 = vst [vmem:[#allocation2 + $0x180] sm:$0xff] %v3292_v2 }
  0x1e   : > { %323 = vst [vmem:[#allocation2 + $0x188] sm:$0xff] %v3292_v2  ;;  %324 = vst [vmem:[#allocation2 + $0x190] sm:$0x3] %v3292_v2 }
  0x1f   : > { %327 = vst [vmem:[#allocation2 + $0x1a8] sm:$0x3] %v3292_v2  ;;  %493 = vst [vmem:[#allocation2 + $0x121] sm:$0xff] %v460_v30  ;;  %2677 = vmatpush3.bf16.msra.mxu0 %v3222_v28  ;;  %3198 = vmatpush3.bf16.msra.mxu1 %v3222_v28  ;;  %v465_v30 = vmax.f32 %v433_v20, 0.0 }
  0x20   : > { %494 = vst [vmem:[#allocation2 + $0x129] sm:$0xff] %v461_v31  ;;  %2678 = vmatprep.subr.bf16.mxu0 %v3223_v29  ;;  %3191 = vmatprep.subr.bf16.mxu1 %v3223_v29  ;;  %471 = vst [vmem:[#allocation2 + $0x19] sm:$0xff] %v438_v48  ;;  %v373_v48 = vmul.f32 %v3392_v18, %v333_v36  ;;  %v334_v36 = vld [vmem:[%s3377_s20 + $0x30] sm:$0xff] }
  0x21   : > { %472 = vst [vmem:[#allocation2 + $0x21] sm:$0xff] %v439_v50  ;;  %495 = vst [vmem:[#allocation2 + $0x139] sm:$0xff] %v462_v51 }
  0x22   : > { %496 = vst [vmem:[#allocation2 + $0x141] sm:$0xff] %v463_v52  ;;  %473 = vst [vmem:[#allocation2 + $0x31] sm:$0xff] %v440_v15 }
  0x23   : > { %2679 = vmatpush3.bf16.msra.mxu0 %v3224_v41  ;;  %3199 = vmatpush3.bf16.msra.mxu1 %v3224_v41  ;;  %474 = vst [vmem:[#allocation2 + $0x39] sm:$0xff] %v441_v16  ;;  %497 = vst [vmem:[#allocation2 + $0x151] sm:$0xff] %v464_v25  ;;  %v372_v41 = vmul.f32 %v3392_v18, %v332_v35  ;;  %v3235_v25 = vld [vmem:[%s4467_s1 + $0x98] sm:$0xff]  }
  0x24   : > { %2776 = vmatprep.subr.bf16.mxu1 %v3225_v43  ;;  %2888 = vmatprep.subr.bf16.mxu0 %v3226_v47  ;;  %498 = vst [vmem:[#allocation2 + $0x159] sm:$0xff] %v465_v30  ;;  %v357_v43 = vld [vmem:[%s3377_s20 + $0xe8] sm:$0xff]  ;;  %v3231_v47 = vld [vmem:[%s4467_s1 + $0xd0] sm:$0xff]  }
  0x25   : > { %v410_v52 = vadd.f32 %v3397_v19, %v372_v41  ;;  %v397_v59 = vmul.f32 %v3392_v18, %v357_v43 }
  0x26   : > { %v539_v53 = vld [vmem:[#allocation2 + $0x120] sm:$0xff]  ;;  %1546 = vmatmul.mubr.bf16.vlgmr.msra.gmra.mrb[0].mxu0 %v3294_v4 }
  0x27   : > { %v540_v54 = vld [vmem:[#allocation2 + $0x128] sm:$0xff]  ;;  %v541_v55 = vld [vmem:[#allocation2 + $0x130] sm:$0x3]  ;;  %2889 = vmatpush3.bf16.msra.mxu0 %v3228_v49  ;;  %v506_v14 = vld [vmem:[#allocation2 + $0x18] sm:$0xff]  ;;  %v442_v62 = vmax.f32 %v410_v52, 0.0  ;;  %v435_v7 = vadd.f32 %v3397_v19, %v397_v59 }
  0x28   : > { %v3441_v56 = vpack.c.bf16 %v540_v54, %v539_v53  ;;  %v3443_v57 = vpack.c.bf16 %v541_v55, %v541_v55  ;;  %2890 = vmatprep.subr.bf16.mxu0 %v3234_v58  ;;  %v507_v22 = vld [vmem:[#allocation2 + $0x20] sm:$0xff]  ;;  %v508_v23 = vld [vmem:[#allocation2 + $0x28] sm:$0x3]  ;;  %v542_v24 = vld [vmem:[#allocation2 + $0x138] sm:$0xff]  ;;  %v396_v53 = vmul.f32 %v3392_v18, %v356_v42  ;;  %v411_v58 = vadd.f32 %v3397_v19, %v373_v48 }
  0x29   : > { %v3470_v26 = vpack.c.bf16 %v507_v22, %v506_v14  ;;  %v3472_v27 = vpack.c.bf16 %v508_v23, %v508_v23  ;;  %v543_v28 = vld [vmem:[#allocation2 + $0x140] sm:$0xff]  ;;  %v544_v29 = vld [vmem:[#allocation2 + $0x148] sm:$0x3]  ;;  %v3242_v49 = vld [vmem:[%s4467_s1 + $0x150] sm:$0xff]   ;;  %475 = vst [vmem:[#allocation2 + $0x49] sm:$0xff] %v442_v62  ;;  %v467_v20 = vmax.f32 %v435_v7, 0.0 }
  0x2a   : > { %v739_v1 = vshrl.u32 %v3441_v56, 16  ;;  %v741_v2 = vshll.u32 %v3441_v56, 16  ;;  %v746_v3 = vshll.u32 %v3443_v57, 16  ;;  %v3480_v33 = vpack.c.bf16 %v543_v28, %v542_v24  ;;  %v511_v5 = vld [vmem:[#allocation2 + $0x40] sm:$0x3]  ;;  %v3250_v62 = vld [vmem:[%s4467_s1 + $0x118] sm:$0xff]  }
  0x2b   : > { %2891 = vmatpush3.bf16.msra.mxu0 %v3236_v6  ;;  %v3482_v34 = vpack.c.bf16 %v544_v29, %v544_v29  ;;  %v607_v38 = vshrl.u32 %v3470_v26, 16  ;;  %v609_v39 = vshll.u32 %v3470_v26, 16  ;;  %v614_v40 = vshll.u32 %v3472_v27, 16  ;;  %v546_v15 = vld [vmem:[#allocation2 + $0x158] sm:$0xff]  ;;  %v547_v16 = vld [vmem:[#allocation2 + $0x160] sm:$0x3] }
  0x2c   : > { %v743_v10 = vrot.slane %v741_v2, 1  ;;  %v748_v11 = vrot.slane %v746_v3, 1  ;;  %v751_v44 = vshrl.u32 %v3480_v33, 16  ;;  %v753_v45 = vshll.u32 %v3480_v33, 16  ;;  %2892 = vmatprep.subr.bf16.mxu0 %v3242_v49  ;;  %v509_v2 = vld [vmem:[#allocation2 + $0x30] sm:$0xff]  ;;  %v510_v3 = vld [vmem:[#allocation2 + $0x38] sm:$0xff] }
  0x2d   : > { %v758_v46 = vshll.u32 %v3482_v34, 16  ;;  %v611_v50 = vrot.slane %v609_v39, 1  ;;  %v616_v51 = vrot.slane %v614_v40, 1  ;;  %v434_v63 = vadd.f32 %v3397_v19, %v396_v53  ;;  %500 = vst [vmem:[#allocation2 + $0x171] sm:$0xff] %v467_v20  ;;  %v3237_v39 = vld [vmem:[%s4467_s1 + $0xe0] sm:$0xff]  }
  0x2e   : > { %v744_v21 = vor.u32 %v743_v10, %v739_v1  ;;  %v755_v54 = vrot.slane %v753_v45, 1  ;;  %v3233_v1 = vld [vmem:[%s4467_s1 + $0xd8] sm:$0xff]   ;;  %v443_v6 = vmax.f32 %v411_v58, 0.0  ;;  %v3522_v9 = vpack.c.bf16 %v510_v3, %v509_v2  ;;  %v3238_v45 = vld [vmem:[%s4467_s1 + $0xa0] sm:$0xff]   ;;  %v3240_v2 = vld [vmem:[%s4467_s1 + $0xa8] sm:$0xff]  }
  0x2f   : > { %v760_v55 = vrot.slane %v758_v46, 1  ;;  %v612_v60 = vor.u32 %v611_v50, %v607_v38  ;;  %v3524_v10 = vpack.c.bf16 %v511_v5, %v511_v5  ;;  %v466_v12 = vmax.f32 %v434_v63, 0.0 }
  0x30   : > { %v3475_v31 = vsel %vm593_vm0, %v744_v21, %v748_v11  ;;  %v756_v0 = vor.u32 %v755_v54, %v751_v44  ;;  %v545_v11 = vld [vmem:[#allocation2 + $0x150] sm:$0xff]  ;;  %476 = vst [vmem:[#allocation2 + $0x51] sm:$0xff] %v443_v6  ;;  %v619_v21 = vshrl.u32 %v3522_v9, 16  ;;  %v621_v22 = vshll.u32 %v3522_v9, 16  ;;  %v512_v46 = vld [vmem:[#allocation2 + $0x48] sm:$0xff]  ;;  %v3249_v54 = vld [vmem:[%s4467_s1 + $0x158] sm:$0xff]  }
  0x31   : > { %1641 = vmatprep.mubr.bf16.mxu1 %v3475_v31  ;;  %v3520_v8 = vsel %vm593_vm0, %v612_v60, %v616_v51  ;;  %v626_v23 = vshll.u32 %v3524_v10, 16  ;;  %v3538_v24 = vpack.c.bf16 %v546_v15, %v545_v11  ;;  %499 = vst [vmem:[#allocation2 + $0x169] sm:$0xff] %v466_v12  ;;  %v3544_v28 = vpack.c.bf16 %v547_v16, %v547_v16  ;;  %v3239_v51 = vld [vmem:[%s4467_s1 + $0xe8] sm:$0xff]   ;;  %v336_v11 = vld [vmem:[%s3377_s20 + $0x40] sm:$0xff] }
  0x32   : > { %1642 = vmatmul.mubr.bf16.vlgmr.msra.gmra.mrb[0].mxu1 %v3441_v56  ;;  %1553 = vmatprep.mubr.bf16.mxu0 %v3520_v8  ;;  %v3531_v14 = vsel %vm593_vm0, %v756_v0, %v760_v55  ;;  %v623_v29 = vrot.slane %v621_v22, 1  ;;  %v374_v40 = vmul.f32 %v3392_v18, %v334_v36  ;;  %v337_v12 = vld [vmem:[%s3377_s20 + $0x48] sm:$0xff]  ;;  %v376_v16 = vmul.f32 %v3392_v18, %v336_v11 }
  0x33   : > { %2777 = vmatpush3.bf16.msra.mxu1 %v3227_v13  ;;  %v3244_v13 = vld [vmem:[%s4467_s1 + $0x110] sm:$0xff]   ;;  %1649 = vmatprep.mubr.bf16.mxu1 %v3531_v14  ;;  %v628_v30 = vrot.slane %v626_v23, 1  ;;  %v765_v35 = vshll.u32 %v3538_v24, 16  ;;  %v770_v38 = vshll.u32 %v3544_v28, 16  ;;  %v377_v20 = vmul.f32 %v3392_v18, %v337_v12  ;;  %v3255_v12 = vld [vmem:[%s4467_s1 + $0x168] sm:$0xff]  }
  0x34   : > { %2778 = vmatprep.subr.bf16.mxu1 %v3229_v32  ;;  %1554 = vmatmul.mubr.bf16.gmra.mrb[4].mxu0 %v3470_v26  ;;  %v763_v32 = vshrl.u32 %v3538_v24, 16  ;;  %v624_v42 = vor.u32 %v623_v29, %v619_v21  ;;  %v339_v21 = vld [vmem:[%s3377_s20 + $0x58] sm:$0xff] }
  0x35   : > { %2893 = vmatpush3.bf16.msra.mxu0 %v3244_v13  ;;  %v767_v43 = vrot.slane %v765_v35, 1  ;;  %v772_v44 = vrot.slane %v770_v38, 1  ;;  %v338_v13 = vld [vmem:[%s3377_s20 + $0x50] sm:$0xff]  ;;  %v3251_v35 = vld [vmem:[%s4467_s1 + $0x160] sm:$0xff]   ;;  %v415_v38 = vadd.f32 %v3397_v19, %v377_v20 }
  0x36   : > { %v3562_v49 = vsel %vm593_vm0, %v624_v42, %v628_v30  ;;  %2894 = vmatprep.subr.bf16.mxu0 %v3249_v54  ;;  %v378_v22 = vmul.f32 %v3392_v18, %v338_v13  ;;  %v836_v13 = vrot.slane %v3387_v17, 1 }
  0x37   : > { %2779 = vmatpush3.bf16.msra.mxu1 %v3230_v37  ;;  %v335_v37 = vld [vmem:[%s3377_s20 + $0x38] sm:$0xff]  ;;  %v768_v50 = vor.u32 %v767_v43, %v763_v32  ;;  %v513_v52 = vld [vmem:[#allocation2 + $0x50] sm:$0xff]  ;;  %1561 = vmatprep.mubr.bf16.mxu0 %v3562_v49 }
  0x38   : > { %2780 = vmatprep.subr.bf16.mxu1 %v3231_v47  ;;  %v375_v41 = vmul.f32 %v3392_v18, %v335_v37  ;;  %v412_v47 = vadd.f32 %v3397_v19, %v374_v40  ;;  %v514_v53 = vld [vmem:[#allocation2 + $0x58] sm:$0x3]  ;;  %v3571_v55 = vpack.c.bf16 %v513_v52, %v512_v46  ;;  %v548_v59 = vld [vmem:[#allocation2 + $0x168] sm:$0xff]  ;;  %v549_v0 = vld [vmem:[#allocation2 + $0x170] sm:$0xff]  ;;  %v414_v37 = vadd.f32 %v3397_v19, %v376_v16 }
  0x39   : > { %v3573_v58 = vpack.c.bf16 %v514_v53, %v514_v53  ;;  %v3579_v63 = vsel %vm593_vm0, %v768_v50, %v772_v44  ;;  %v3589_v7 = vpack.c.bf16 %v549_v0, %v548_v59  ;;  %2895 = vmatpush3.bf16.msra.mxu0 %v3250_v62  ;;  %v3241_v32 = vld [vmem:[%s4467_s1 + $0xf0] sm:$0xff]   ;;  %v3253_v40 = vld [vmem:[%s4467_s1 + $0x120] sm:$0xff]   ;;  %v416_v43 = vadd.f32 %v3397_v19, %v378_v22  ;;  %v3245_v53 = vld [vmem:[%s4467_s1 + $0xf8] sm:$0xff]  }
  0x3a   : > { %1650 = vmatmul.mubr.bf16.gmra.mrb[4].mxu1 %v3480_v33  ;;  %v413_v48 = vadd.f32 %v3397_v19, %v375_v41  ;;  %v444_v60 = vmax.f32 %v412_v47, 0.0  ;;  %v631_v3 = vshrl.u32 %v3571_v55, 16  ;;  %v633_v5 = vshll.u32 %v3571_v55, 16  ;;  %2896 = vmatprep.subr.bf16.mxu0 %v3251_v35  ;;  %v340_v50 = vld [vmem:[%s3377_s20 + $0x60] sm:$0xff]  ;;  %v341_v59 = vld [vmem:[%s3377_s20 + $0x68] sm:$0xff]  ;;  %v342_v22 = vld [vmem:[%s3377_s20 + $0x70] sm:$0xff] }
  0x3b   : > { %2781 = vmatpush3.bf16.msra.mxu1 %v3232_v61  ;;  %1657 = vmatprep.mubr.bf16.mxu1 %v3579_v63  ;;  %v638_v6 = vshll.u32 %v3573_v58, 16  ;;  %v775_v29 = vshrl.u32 %v3589_v7, 16  ;;  %v777_v30 = vshll.u32 %v3589_v7, 16  ;;  %v446_v46 = vmax.f32 %v414_v37, 0.0 }
  0x3c   : > { %2782 = vmatprep.subr.bf16.mxu1 %v3233_v1  ;;  %v445_v61 = vmax.f32 %v413_v48, 0.0  ;;  %1562 = vmatmul.mubr.bf16.gmra.mrb[8].mxu0 %v3522_v9  ;;  %v550_v1 = vld [vmem:[#allocation2 + $0x178] sm:$0x3]  ;;  %477 = vst [vmem:[#allocation2 + $0x61] sm:$0xff] %v444_v60  ;;  %v635_v23 = vrot.slane %v633_v5, 1  ;;  %v447_v47 = vmax.f32 %v415_v38, 0.0  ;;  %v380_v60 = vmul.f32 %v3392_v18, %v340_v50 }
  0x3d   : > { %v3595_v15 = vpack.c.bf16 %v550_v1, %v550_v1  ;;  %v779_v42 = vrot.slane %v777_v30, 1  ;;  %2897 = vmatpush3.bf16.msra.mxu0 %v3253_v40  ;;  %v448_v54 = vmax.f32 %v416_v43, 0.0  ;;  %479 = vst [vmem:[#allocation2 + $0x79] sm:$0xff] %v446_v46  ;;  %v835_v16 = vrot.slane %v3294_v4, 1  ;;  %v343_v30 = vld [vmem:[%s3377_s20 + $0x78] sm:$0xff] }
  0x3e   : > { %478 = vst [vmem:[#allocation2 + $0x69] sm:$0xff] %v445_v61  ;;  %v636_v41 = vor.u32 %v635_v23, %v631_v3  ;;  %480 = vst [vmem:[#allocation2 + $0x81] sm:$0xff] %v447_v47  ;;  %v418_v11 = vadd.f32 %v3397_v19, %v380_v60  ;;  %2898 = vmatprep.subr.bf16.mxu0 %v3255_v12  ;;  %v3246_v4 = vld [vmem:[%s4467_s1 + $0xb8] sm:$0xff]   ;;  %v382_v35 = vmul.f32 %v3392_v18, %v342_v22 }
  0x3f   : > { %2783 = vmatpush3.bf16.msra.mxu1 %v3235_v25  ;;  %v640_v25 = vrot.slane %v638_v6, 1  ;;  %v782_v36 = vshll.u32 %v3595_v15, 16  ;;  %v780_v52 = vor.u32 %v779_v42, %v775_v29  ;;  %481 = vst [vmem:[#allocation2 + $0x91] sm:$0xff] %v448_v54  ;;  %v837_v40 = vsel %vm834_vm1, %v835_v16, %v836_v13 }
  0x40   : > { %2784 = vmatprep.subr.bf16.mxu1 %v3237_v39  ;;  %v379_v39 = vmul.f32 %v3392_v18, %v339_v21  ;;  %v3256_v21 = vld [vmem:[%s4467_s1 + $0x128] sm:$0xff]   ;;  %v450_v29 = vmax.f32 %v418_v11, 0.0  ;;  %v420_v42 = vadd.f32 %v3397_v19, %v382_v35  ;;  %v839_v11 = vrot.slane %v3472_v27, 1  ;;  %v3260_v27 = vld [vmem:[%s4467_s1 + $0x130] sm:$0xff]  }
  0x41   : > { %v784_v44 = vrot.slane %v782_v36, 1  ;;  %v383_v36 = vmul.f32 %v3392_v18, %v343_v30  ;;  %2899 = vmatpush3.bf16.msra.mxu0 %v3256_v21 }
  0x42   : > { %1658 = vmatmul.mubr.bf16.gmra.mrb[8].mxu1 %v3538_v24  ;;  %v417_v48 = vadd.f32 %v3397_v19, %v379_v39  ;;  %v3247_v39 = vld [vmem:[%s4467_s1 + $0x1c0] sm:$0xff]   ;;  %483 = vst [vmem:[#allocation2 + $0xa9] sm:$0xff] %v450_v29  ;;  %v3254_v29 = vld [vmem:[%s4467_s1 + $0x188] sm:$0xff]  }
  0x43   : > { %2785 = vmatpush3.bf16.msra.mxu1 %v3238_v45  ;;  %v3243_v45 = vld [vmem:[%s4467_s1 + $0xb0] sm:$0xff]   ;;  %v515_v61 = vld [vmem:[#allocation2 + $0x60] sm:$0xff]  ;;  %v3633_v3 = vsel %vm593_vm0, %v780_v52, %v784_v44  ;;  %v421_v43 = vadd.f32 %v3397_v19, %v383_v36  ;;  %v838_v52 = vrot.slane %v3470_v26, 1 }
  0x44   : > { %2786 = vmatprep.subr.bf16.mxu1 %v3239_v51  ;;  %v3623_v51 = vsel %vm593_vm0, %v636_v41, %v640_v25  ;;  %v449_v1 = vmax.f32 %v417_v48, 0.0  ;;  %1665 = vmatprep.mubr.bf16.mxu1 %v3633_v3  ;;  %v3248_v41 = vld [vmem:[%s4467_s1 + $0x180] sm:$0xff]   ;;  %v518_v47 = vld [vmem:[#allocation2 + $0x78] sm:$0xff] }
  0x45   : > { %1569 = vmatprep.mubr.bf16.mxu0 %v3623_v51  ;;  %v516_v62 = vld [vmem:[#allocation2 + $0x68] sm:$0xff]  ;;  %v517_v0 = vld [vmem:[#allocation2 + $0x70] sm:$0x3]  ;;  %v344_v44 = vld [vmem:[%s3377_s20 + $0x80] sm:$0xff] }
  0x46   : > { %1570 = vmatmul.mubr.bf16.gmra.mrb[12].mxu0 %v3571_v55  ;;  %v3636_v5 = vpack.c.bf16 %v516_v62, %v515_v61  ;;  %v3638_v6 = vpack.c.bf16 %v517_v0, %v517_v0  ;;  %482 = vst [vmem:[#allocation2 + $0x99] sm:$0xff] %v449_v1  ;;  %v519_v48 = vld [vmem:[#allocation2 + $0x80] sm:$0xff]  ;;  %v520_v50 = vld [vmem:[#allocation2 + $0x88] sm:$0x3]  ;;  %v384_v54 = vmul.f32 %v3392_v18, %v344_v44  ;;  %v521_v62 = vld [vmem:[#allocation2 + $0x90] sm:$0xff]  ;;  %v452_v0 = vmax.f32 %v420_v42, 0.0 }
  0x47   : > { %2787 = vmatpush3.bf16.msra.mxu1 %v3240_v2  ;;  %v381_v2 = vmul.f32 %v3392_v18, %v341_v59  ;;  %v3680_v60 = vpack.c.bf16 %v519_v48, %v518_v47  ;;  %v3682_v61 = vpack.c.bf16 %v520_v50, %v520_v50  ;;  %v453_v1 = vmax.f32 %v421_v43, 0.0 }
  0x48   : > { %2788 = vmatprep.subr.bf16.mxu1 %v3241_v32  ;;  %v643_v23 = vshrl.u32 %v3636_v5, 16  ;;  %v645_v25 = vshll.u32 %v3636_v5, 16  ;;  %v650_v17 = vshll.u32 %v3638_v6, 16  ;;  %v422_v16 = vadd.f32 %v3397_v19, %v384_v54  ;;  %485 = vst [vmem:[#allocation2 + $0xc1] sm:$0xff] %v452_v0 }
  0x49   : > { %v419_v20 = vadd.f32 %v3397_v19, %v381_v2  ;;  %v655_v21 = vshrl.u32 %v3680_v60, 16  ;;  %v657_v22 = vshll.u32 %v3680_v60, 16  ;;  %486 = vst [vmem:[#allocation2 + $0xc9] sm:$0xff] %v453_v1 }
  0x4a   : > { %1666 = vmatmul.mubr.bf16.gmra.mrb[12].mxu1 %v3589_v7  ;;  %v647_v37 = vrot.slane %v645_v25, 1  ;;  %v652_v38 = vrot.slane %v650_v17, 1  ;;  %v454_v30 = vmax.f32 %v422_v16, 0.0  ;;  %v3261_v16 = vld [vmem:[%s4467_s1 + $0x1d8] sm:$0xff]  }
  0x4b   : > { %2789 = vmatpush3.bf16.msra.mxu1 %v3243_v45  ;;  %1706 = vmatprep.mubr.bf16.mxu1 %v3470_v26  ;;  %v451_v32 = vmax.f32 %v419_v20, 0.0  ;;  %v345_v45 = vld [vmem:[%s3377_s20 + $0x88] sm:$0xff]  ;;  %v3259_v26 = vld [vmem:[%s4467_s1 + $0x170] sm:$0xff]   ;;  %v659_v35 = vrot.slane %v657_v22, 1 }
  0x4c   : > { %2790 = vmatprep.subr.bf16.mxu1 %v3245_v53  ;;  %v648_v46 = vor.u32 %v647_v37, %v643_v23  ;;  %v3252_v53 = vld [vmem:[%s4467_s1 + $0x1c8] sm:$0xff]   ;;  %v385_v59 = vmul.f32 %v3392_v18, %v345_v45  ;;  %v662_v23 = vshll.u32 %v3682_v61, 16  ;;  %2900 = vmatprep.subr.bf16.mxu0 %v3259_v26  ;;  %v3257_v45 = vld [vmem:[%s4467_s1 + $0x1d0] sm:$0xff]   ;;  %487 = vst [vmem:[#allocation2 + $0xd9] sm:$0xff] %v454_v30  ;;  %v3263_v26 = vld [vmem:[%s4467_s1 + $0x178] sm:$0xff]  }
  0x4d   : > { %484 = vst [vmem:[#allocation2 + $0xb1] sm:$0xff] %v451_v32  ;;  %v522_v12 = vld [vmem:[#allocation2 + $0x98] sm:$0xff]  ;;  %v523_v13 = vld [vmem:[#allocation2 + $0xa0] sm:$0x3]  ;;  %v346_v32 = vld [vmem:[%s3377_s20 + $0x90] sm:$0xff]  ;;  %2901 = vmatpush3.bf16.msra.mxu0 %v3260_v27  ;;  %v660_v47 = vor.u32 %v659_v35, %v655_v21 }
  0x4e   : > { %v3688_v2 = vsel %vm593_vm0, %v648_v46, %v652_v38  ;;  %v423_v20 = vadd.f32 %v3397_v19, %v385_v59  ;;  %v3697_v25 = vpack.c.bf16 %v522_v12, %v521_v62  ;;  %v3703_v17 = vpack.c.bf16 %v523_v13, %v523_v13  ;;  %v3258_v62 = vld [vmem:[%s4467_s1 + $0x190] sm:$0xff]   ;;  %2902 = vmatprep.subr.bf16.mxu0 %v3263_v26 }
  0x4f   : > { %2791 = vmatpush3.bf16.msra.mxu1 %v3246_v4  ;;  %1577 = vmatprep.mubr.bf16.mxu0 %v3688_v2  ;;  %v664_v36 = vrot.slane %v662_v23, 1  ;;  %v527_v21 = vld [vmem:[#allocation2 + $0xc0] sm:$0xff] }
  0x50   : > { %3000 = vmatprep.subr.bf16.mxu1 %v3247_v39  ;;  %1578 = vmatmul.mubr.bf16.gmra.mrb[16].mxu0 %v3636_v5  ;;  %v455_v4 = vmax.f32 %v423_v20, 0.0  ;;  %v667_v37 = vshrl.u32 %v3697_v25, 16  ;;  %v669_v38 = vshll.u32 %v3697_v25, 16  ;;  %v524_v39 = vld [vmem:[#allocation2 + $0xa8] sm:$0xff]  ;;  %v674_v42 = vshll.u32 %v3703_v17, 16 }
  0x51   : > { %v3735_v12 = vsel %vm593_vm0, %v660_v47, %v664_v36  ;;  %v528_v22 = vld [vmem:[#allocation2 + $0xc8] sm:$0xff]  ;;  %v529_v23 = vld [vmem:[#allocation2 + $0xd0] sm:$0x3]  ;;  %v348_v36 = vld [vmem:[%s3377_s20 + $0xa0] sm:$0xff] }
  0x52   : > { %1707 = vmatmul.mubr.bf16.vlgmr.msra.gmra.mrb[16].mxu1 %v837_v40  ;;  %v347_v40 = vld [vmem:[%s3377_s20 + $0x98] sm:$0xff]  ;;  %488 = vst [vmem:[#allocation2 + $0xe1] sm:$0xff] %v455_v4  ;;  %v671_v48 = vrot.slane %v669_v38, 1  ;;  %v676_v59 = vrot.slane %v674_v42, 1  ;;  %1585 = vmatprep.mubr.bf16.mxu0 %v3735_v12  ;;  %v3747_v4 = vpack.c.bf16 %v528_v22, %v527_v21  ;;  %v842_v38 = vrot.slane %v3524_v10, 1  ;;  %v3770_v10 = vld [vmem:[%s4467_s1 + $0x200] sm:$0xff]  }
  0x53   : > { %3001 = vmatpush3.bf16.msra.mxu1 %v3248_v41  ;;  %1714 = vmatprep.mubr.bf16.mxu1 %v3522_v9  ;;  %v386_v41 = vmul.f32 %v3392_v18, %v346_v32  ;;  %v387_v46 = vmul.f32 %v3392_v18, %v347_v40  ;;  %v3264_v32 = vld [vmem:[%s4467_s1 + $0x138] sm:$0xff]   ;;  %v388_v47 = vmul.f32 %v3392_v18, %v348_v36  ;;  %v3267_v21 = vld [vmem:[%s4467_s1 + $0x1a0] sm:$0xff]   ;;  %v3268_v22 = vld [vmem:[%s4467_s1 + $0x1e8] sm:$0xff]  }
  0x54   : > { %3002 = vmatprep.subr.bf16.mxu1 %v3252_v53  ;;  %v525_v43 = vld [vmem:[#allocation2 + $0xb0] sm:$0xff]  ;;  %v526_v44 = vld [vmem:[#allocation2 + $0xb8] sm:$0x3]  ;;  %v3724_v53 = vsel %vm834_vm1, %v838_v52, %v839_v11  ;;  %v672_v13 = vor.u32 %v671_v48, %v667_v37  ;;  %v841_v37 = vrot.slane %v3522_v9, 1  ;;  %2903 = vmatpush3.bf16.msra.mxu0 %v3264_v32  ;;  %v3265_v48 = vld [vmem:[%s4467_s1 + $0x1e0] sm:$0xff]  }
  0x55   : > { %v3719_v50 = vpack.c.bf16 %v525_v43, %v524_v39  ;;  %v3721_v54 = vpack.c.bf16 %v526_v44, %v526_v44  ;;  %v424_v0 = vadd.f32 %v3397_v19, %v386_v41  ;;  %v425_v1 = vadd.f32 %v3397_v19, %v387_v46  ;;  %v530_v40 = vld [vmem:[#allocation2 + $0xd8] sm:$0xff]  ;;  %v349_v43 = vld [vmem:[%s3377_s20 + $0xa8] sm:$0xff]  ;;  %3136 = vmatprep.subr.bf16.mxu0 %v3770_v10 }
  0x56   : > { %v3759_v39 = vpack.c.bf16 %v529_v23, %v529_v23  ;;  %v3262_v42 = vld [vmem:[%s4467_s1 + $0x198] sm:$0xff]   ;;  %v693_v41 = vshll.u32 %v3747_v4, 16  ;;  %v844_v23 = vrot.slane %v3571_v55, 1 }
  0x57   : > { %3003 = vmatpush3.bf16.msra.mxu1 %v3254_v29  ;;  %v679_v52 = vshrl.u32 %v3719_v50, 16  ;;  %v681_v11 = vshll.u32 %v3719_v50, 16  ;;  %v686_v20 = vshll.u32 %v3721_v54, 16  ;;  %v456_v27 = vmax.f32 %v424_v0, 0.0 }
  0x58   : > { %3004 = vmatprep.subr.bf16.mxu1 %v3257_v45  ;;  %v3745_v29 = vsel %vm593_vm0, %v672_v13, %v676_v59  ;;  %1586 = vmatmul.mubr.bf16.gmra.mrb[20].mxu0 %v3680_v60  ;;  %v457_v35 = vmax.f32 %v425_v1, 0.0  ;;  %v389_v59 = vmul.f32 %v3392_v18, %v349_v43  ;;  %v426_v0 = vadd.f32 %v3397_v19, %v388_v47  ;;  %v3281_v18 = vld [vmem:[%s4469_s3] ss:$0 sm:$0xff]  ;;  %v3271_v43 = vld [vmem:[%s4467_s1 + $0x1f0] sm:$0xff]  }
  0x59   : > { %v683_v30 = vrot.slane %v681_v11, 1  ;;  %489 = vst [vmem:[#allocation2 + $0xf1] sm:$0xff] %v456_v27  ;;  %1593 = vmatprep.mubr.bf16.mxu0 %v3745_v29  ;;  %v688_v45 = vrot.slane %v686_v20, 1  ;;  %v531_v46 = vld [vmem:[#allocation2 + $0xe0] sm:$0xff]  ;;  %v691_v1 = vshrl.u32 %v3747_v4, 16  ;;  %v698_v26 = vshll.u32 %v3759_v39, 16 }
  0x5a   : > { %1715 = vmatmul.mubr.bf16.gmra.mrb[20].mxu1 %v3724_v53  ;;  %490 = vst [vmem:[#allocation2 + $0xf9] sm:$0xff] %v457_v35  ;;  %v532_v13 = vld [vmem:[#allocation2 + $0xe8] sm:$0x3]  ;;  %v427_v19 = vadd.f32 %v3281_v18, %v389_v59  ;;  %v458_v20 = vmax.f32 %v426_v0, 0.0  ;;  %v3273_v59 = vld [vmem:[%s4467_s1 + $0x1b0] sm:$0xff]   ;;  %v3274_v0 = vld [vmem:[%s4467_s1 + $0x1f8] sm:$0xff]  }
  0x5b   : > { %1722 = vmatprep.mubr.bf16.mxu1 %v3571_v55  ;;  %v684_v44 = vor.u32 %v683_v30, %v679_v52  ;;  %3005 = vmatpush3.bf16.msra.mxu1 %v3258_v62  ;;  %v3779_v62 = vsel %vm834_vm1, %v841_v37, %v842_v38  ;;  %v3783_v52 = vpack.c.bf16 %v531_v46, %v530_v40  ;;  %v845_v30 = vrot.slane %v3573_v58, 1 }
  0x5c   : > { %3006 = vmatprep.subr.bf16.mxu1 %v3261_v16  ;;  %v695_v16 = vrot.slane %v693_v41, 1  ;;  %v459_v27 = vmax.f32 %v427_v19, 0.0  ;;  %491 = vst [vmem:[#allocation2 + $0x109] sm:$0xff] %v458_v20  ;;  %v700_v32 = vrot.slane %v698_v26, 1  ;;  %v3803_v35 = vpack.c.bf16 %v532_v13, %v532_v13 }
  0x5d   : > { %v3786_v11 = vsel %vm593_vm0, %v684_v44, %v688_v45  ;;  %v705_v40 = vshll.u32 %v3783_v52, 16  ;;  %v3813_v58 = vsel %vm834_vm1, %v844_v23, %v845_v30  ;;  %v703_v44 = vshrl.u32 %v3783_v52, 16  ;;  %v358_v23 = vld [vmem:[%s3377_s20 + $0xf0] sm:$0xff] }
  0x5e   : > { %v696_v38 = vor.u32 %v695_v16, %v691_v1  ;;  %492 = vst [vmem:[#allocation2 + $0x111] sm:$0xff] %v459_v27  ;;  %v710_v45 = vshll.u32 %v3803_v35, 16  ;;  %v847_v1 = vrot.slane %v3636_v5, 1  ;;  %v848_v26 = vrot.slane %v3638_v6, 1  ;;  %v359_v27 = vld [vmem:[%s3377_s20 + $0xf8] sm:$0xff] }
  0x5f   : > { %3007 = vmatpush3.bf16.msra.mxu1 %v3262_v42  ;;  %v3270_v42 = vld [vmem:[%s4467_s1 + $0x1a8] sm:$0xff]   ;;  %v707_v46 = vrot.slane %v705_v40, 1  ;;  %v3282_v6 = vld [vmem:[%s4468_s2] ss:$0 sm:$0xff] }
  0x60   : > { %3008 = vmatprep.subr.bf16.mxu1 %v3265_v48  ;;  %1594 = vmatmul.mubr.bf16.gmra.mrb[24].mxu0 %v3697_v25  ;;  %v533_v36 = vld [vmem:[#allocation2 + $0xf0] sm:$0xff]  ;;  %v3818_v41 = vsel %vm593_vm0, %v696_v38, %v700_v32  ;;  %v712_v19 = vrot.slane %v710_v45, 1  ;;  %v398_v32 = vmul.f32 %v3282_v6, %v358_v23 }
  0x61   : > { %1601 = vmatprep.mubr.bf16.mxu0 %v3786_v11  ;;  %v534_v37 = vld [vmem:[#allocation2 + $0xf8] sm:$0xff]  ;;  %v535_v47 = vld [vmem:[#allocation2 + $0x100] sm:$0x3]  ;;  %v708_v16 = vor.u32 %v707_v46, %v703_v44 }
  0x62   : > { %1723 = vmatmul.mubr.bf16.gmra.mrb[24].mxu1 %v3779_v62  ;;  %v3820_v48 = vpack.c.bf16 %v534_v37, %v533_v36  ;;  %v3834_v20 = vpack.c.bf16 %v535_v47, %v535_v47  ;;  %v399_v36 = vmul.f32 %v3282_v6, %v359_v27  ;;  %v3846_v37 = vsel %vm834_vm1, %v847_v1, %v848_v26 }
  0x63   : > { %1730 = vmatprep.mubr.bf16.mxu1 %v3636_v5  ;;  %3009 = vmatpush3.bf16.msra.mxu1 %v3267_v21  ;;  %v536_v13 = vld [vmem:[#allocation2 + $0x108] sm:$0xff]  ;;  %v436_v40 = vadd.f32 %v3281_v18, %v398_v32  ;;  %v851_v1 = vrot.slane %v3682_v61, 1  ;;  %v853_v61 = vrot.slane %v3697_v25, 1  ;;  %v854_v6 = vrot.slane %v3703_v17, 1 }
  0x64   : > { %3010 = vmatprep.subr.bf16.mxu1 %v3268_v22  ;;  %v717_v21 = vshll.u32 %v3820_v48, 16  ;;  %v3276_v22 = vld [vmem:[%s4467_s1 + $0x1b8] sm:$0xff]   ;;  %v715_v38 = vshrl.u32 %v3820_v48, 16  ;;  %v722_v45 = vshll.u32 %v3834_v20, 16  ;;  %v857_v17 = vrot.slane %v3721_v54, 1  ;;  %v3269_v54 = vld [vmem:[%s4467_s1 + $0x208] sm:$0xff]  }
  0x65   : > { %v537_v30 = vld [vmem:[#allocation2 + $0x110] sm:$0xff]  ;;  %v538_v47 = vld [vmem:[#allocation2 + $0x118] sm:$0x3] }
  0x66   : > { %v719_v44 = vrot.slane %v717_v21, 1  ;;  %v3853_v46 = vpack.c.bf16 %v537_v30, %v536_v13  ;;  %v724_v13 = vrot.slane %v722_v45, 1  ;;  %v859_v45 = vrot.slane %v3747_v4, 1 }
  0x67   : > { %3011 = vmatpush3.bf16.msra.mxu1 %v3270_v42  ;;  %v437_v42 = vadd.f32 %v3281_v18, %v399_v36  ;;  %v850_v18 = vrot.slane %v3680_v60, 1 }
  0x68   : > { %3012 = vmatprep.subr.bf16.mxu1 %v3271_v43  ;;  %1602 = vmatmul.mubr.bf16.gmra.mrb[28].mxu0 %v3719_v50  ;;  %v3850_v43 = vsel %vm593_vm0, %v708_v16, %v712_v19  ;;  %v720_v26 = vor.u32 %v719_v44, %v715_v38  ;;  %v3861_v16 = vpack.c.bf16 %v538_v47, %v538_v47  ;;  %v729_v19 = vshll.u32 %v3853_v46, 16 }
  0x69   : > { %1609 = vmatprep.mubr.bf16.mxu0 %v3818_v41  ;;  %v3865_v21 = vsel %vm834_vm1, %v850_v18, %v851_v1  ;;  %v727_v23 = vshrl.u32 %v3853_v46, 16  ;;  %v3879_v38 = vsel %vm834_vm1, %v853_v61, %v854_v6  ;;  %v860_v47 = vrot.slane %v3759_v39, 1  ;;  %v3272_v39 = vld [vmem:[%s4467_s1 + $0x210] sm:$0xff]   ;;  %v3277_v1 = vld [vmem:[%s4467_s1 + $0x220] sm:$0xff]  }
  0x6a   : > { %1731 = vmatmul.mubr.bf16.gmra.mrb[28].mxu1 %v3813_v58  ;;  %v731_v27 = vrot.slane %v729_v19, 1  ;;  %v734_v30 = vshll.u32 %v3861_v16, 16  ;;  %v869_v19 = vrot.slane %v3861_v16, 1  ;;  %v871_v16 = vrot.slane %v3441_v56, 1 }
  0x6b   : > { %1738 = vmatprep.mubr.bf16.mxu1 %v3680_v60  ;;  %3013 = vmatpush3.bf16.msra.mxu1 %v3273_v59  ;;  %v468_v59 = vmax.f32 %v436_v40, 0.0  ;;  %v872_v61 = vrot.slane %v3443_v57, 1 }
  0x6c   : > { %3014 = vmatprep.subr.bf16.mxu1 %v3274_v0  ;;  %v469_v0 = vmax.f32 %v437_v42, 0.0  ;;  %v732_v32 = vor.u32 %v731_v27, %v727_v23  ;;  %v736_v36 = vrot.slane %v734_v30, 1  ;;  %v856_v42 = vrot.slane %v3719_v50, 1  ;;  %v3279_v23 = vld [vmem:[%s4467_s1 + $0x230] sm:$0xff]   ;;  %v3280_v30 = vld [vmem:[%s4467_s1 + $0x238] sm:$0xff]  }
  0x6d   : > { %501 = vst [vmem:[#allocation2 + $0x181] sm:$0xff] %v468_v59  ;;  %v3900_v59 = vsel %vm834_vm1, %v859_v45, %v860_v47  ;;  %v3958_v6 = vsel %vm834_vm1, %v871_v16, %v872_v61 }
  0x6e   : > { %502 = vst [vmem:[#allocation2 + $0x189] sm:$0xff] %v469_v0  ;;  %v3882_v40 = vsel %vm593_vm0, %v732_v32, %v736_v36  ;;  %v3891_v44 = vsel %vm834_vm1, %v856_v42, %v857_v17  ;;  %v863_v0 = vrot.slane %v3803_v35, 1  ;;  %v866_v35 = vrot.slane %v3834_v20, 1 }
  0x6f   : > { %3015 = vmatpush3.bf16.msra.mxu1 %v3276_v22  ;;  %v3868_v22 = vsel %vm593_vm0, %v720_v26, %v724_v13  ;;  %v3278_v13 = vld [vmem:[%s4467_s1 + $0x228] sm:$0xff]   ;;  %v868_v20 = vrot.slane %v3853_v46, 1  ;;  %v874_v32 = vrot.slane %v3480_v33, 1  ;;  %v875_v36 = vrot.slane %v3482_v34, 1 }
  0x70   : > { %1610 = vmatmul.mubr.bf16.gmra.mrb[32].mxu0 %v3747_v4  ;;  %v877_v42 = vrot.slane %v3538_v24, 1  ;;  %v878_v17 = vrot.slane %v3544_v28, 1 }
  0x71   : > { %1617 = vmatprep.mubr.bf16.mxu0 %v3850_v43  ;;  %v3946_v27 = vsel %vm834_vm1, %v868_v20, %v869_v19  ;;  %v3967_v57 = vsel %vm834_vm1, %v874_v32, %v875_v36 }
  0x72   : > { %1739 = vmatmul.mubr.bf16.gmra.mrb[32].mxu1 %v3846_v37 }
  0x73   : > { %1746 = vmatprep.mubr.bf16.mxu1 %v3697_v25 }
  0x74   : > { %v551_v45 = vld [vmem:[#allocation2 + $0x180] sm:$0xff] }
  0x75   : > { %v552_v47 = vld [vmem:[#allocation2 + $0x188] sm:$0xff] }
  0x76   : > { %v3978_v34 = vpack.c.bf16 %v552_v47, %v551_v45 }
  0x78   : > { %1618 = vmatmul.mubr.bf16.gmra.mrb[36].mxu0 %v3783_v52 }
  0x79   : > { %1625 = vmatprep.mubr.bf16.mxu0 %v3868_v22 }
  0x7a   : > { %1747 = vmatmul.mubr.bf16.gmra.mrb[36].mxu1 %v3865_v21 }
  0x7b   : > { %1754 = vmatprep.mubr.bf16.mxu1 %v3719_v50 }
  0x80   : > { %1626 = vmatmul.mubr.bf16.gmra.mrb[40].mxu0 %v3820_v48 }
  0x81   : > { %1633 = vmatprep.mubr.bf16.mxu0 %v3882_v40 }
  0x82   : > { %1755 = vmatmul.mubr.bf16.gmra.mrb[40].mxu1 %v3879_v38 }
  0x83   : > { %1762 = vmatprep.mubr.bf16.mxu1 %v3747_v4 }
  0x88   : > { %1634 = vmatmul.mubr.bf16.gmra.mrb[44].mxu0 %v3853_v46 }
  0x89   : > { %1867 = vmatprep.mubr.bf16.mxu0 %v3724_v53  ;;  %v862_v53 = vrot.slane %v3783_v52, 1 }
  0x8a   : > { %1763 = vmatmul.mubr.bf16.gmra.mrb[44].mxu1 %v3891_v44 }
  0x8b   : > { %1770 = vmatprep.mubr.bf16.mxu1 %v3783_v52  ;;  %v3916_v18 = vsel %vm834_vm1, %v862_v53, %v863_v0  ;;  %v880_v53 = vrot.slane %v3589_v7, 1  ;;  %v881_v0 = vrot.slane %v3595_v15, 1  ;;  %v902_v15 = vshll.u32 %v3978_v34, 16 }
  0x8d   : > { %v3987_v28 = vsel %vm834_vm1, %v880_v53, %v881_v0 }
  0x90   : > { %1868 = vmatmul.mubr.bf16.vlgmr.msra.gmra.mrb[48].mxu0 %v3520_v8  ;;  %v3275_v8 = vld [vmem:[%s4467_s1 + $0x218] sm:$0xff]  }
  0x91   : > { %3137 = vmatpush3.bf16.msra.mxu0 %v3770_v10  ;;  %1875 = vmatprep.mubr.bf16.mxu0 %v3779_v62  ;;  %v865_v10 = vrot.slane %v3820_v48, 1 }
  0x92   : > { %1771 = vmatmul.mubr.bf16.gmra.mrb[48].mxu1 %v3900_v59  ;;  %3138 = vmatprep.subr.bf16.mxu0 %v3269_v54 }
  0x93   : > { %1778 = vmatprep.mubr.bf16.mxu1 %v3820_v48  ;;  %v3931_v26 = vsel %vm834_vm1, %v865_v10, %v866_v35 }
  0x95   : > { %3139 = vmatpush3.bf16.msra.mxu0 %v3269_v54  ;;  %v3976_v54 = vsel %vm834_vm1, %v877_v42, %v878_v17 }
  0x96   : > { %3140 = vmatprep.subr.bf16.mxu0 %v3272_v39 }
  0x98   : > { %1876 = vmatmul.mubr.bf16.gmra.mrb[52].mxu0 %v3562_v49 }
  0x99   : > { %1883 = vmatprep.mubr.bf16.mxu0 %v3813_v58  ;;  %3141 = vmatpush3.bf16.msra.mxu0 %v3272_v39 }
  0x9a   : > { %1779 = vmatmul.mubr.bf16.gmra.mrb[52].mxu1 %v3916_v18  ;;  %3142 = vmatprep.subr.bf16.mxu0 %v3275_v8 }
  0x9b   : > { %1786 = vmatprep.mubr.bf16.mxu1 %v3853_v46 }
  0x9d   : > { %3143 = vmatpush3.bf16.msra.mxu0 %v3275_v8 }
  0x9e   : > { %3144 = vmatprep.subr.bf16.mxu0 %v3277_v1 }
  0xa0   : > { %1884 = vmatmul.mubr.bf16.gmra.mrb[56].mxu0 %v3623_v51 }
  0xa1   : > { %1891 = vmatprep.mubr.bf16.mxu0 %v3846_v37  ;;  %3145 = vmatpush3.bf16.msra.mxu0 %v3277_v1 }
  0xa2   : > { %1787 = vmatmul.mubr.bf16.gmra.mrb[56].mxu1 %v3931_v26  ;;  %3146 = vmatprep.subr.bf16.mxu0 %v3278_v13 }
  0xa3   : > { %1794 = vmatprep.mubr.bf16.mxu1 %v3441_v56 }
  0xa5   : > { %3147 = vmatpush3.bf16.msra.mxu0 %v3278_v13 }
  0xa6   : > { %3148 = vmatprep.subr.bf16.mxu0 %v3279_v23 }
  0xa8   : > { %1892 = vmatmul.mubr.bf16.gmra.mrb[60].mxu0 %v3688_v2 }
  0xa9   : > { %1899 = vmatprep.mubr.bf16.mxu0 %v3865_v21  ;;  %3149 = vmatpush3.bf16.msra.mxu0 %v3279_v23 }
  0xaa   : > { %1795 = vmatmul.mubr.bf16.gmra.mrb[60].mxu1 %v3946_v27  ;;  %3150 = vmatprep.subr.bf16.mxu0 %v3280_v30 }
  0xab   : > { %1802 = vmatprep.mubr.bf16.mxu1 %v3480_v33 }
  0xad   : > { %3151 = vmatpush3.bf16.msra.mxu0 %v3280_v30 }
  0xb0   : > { %1900 = vmatmul.mubr.bf16.gmra.mrb[64].mxu0 %v3735_v12 }
  0xb1   : > { %1907 = vmatprep.mubr.bf16.mxu0 %v3879_v38 }
  0xb2   : > { %1803 = vmatmul.mubr.bf16.gmra.mrb[64].mxu1 %v3958_v6 }
  0xb3   : > { %1810 = vmatprep.mubr.bf16.mxu1 %v3538_v24 }
  0xb8   : > { %1908 = vmatmul.mubr.bf16.gmra.mrb[68].mxu0 %v3745_v29 }
  0xb9   : > { %1915 = vmatprep.mubr.bf16.mxu0 %v3891_v44 }
  0xba   : > { %1811 = vmatmul.mubr.bf16.gmra.mrb[68].mxu1 %v3967_v57 }
  0xbb   : > { %1818 = vmatprep.mubr.bf16.mxu1 %v3589_v7 }
  0xc0   : > { %1916 = vmatmul.mubr.bf16.gmra.mrb[72].mxu0 %v3786_v11 }
  0xc1   : > { %1923 = vmatprep.mubr.bf16.mxu0 %v3900_v59 }
  0xc2   : > { %1819 = vmatmul.mubr.bf16.gmra.mrb[72].mxu1 %v3976_v54 }
  0xc3   : > { %1826 = vmatprep.mubr.bf16.mxu1 %v3978_v34 }
  0xc8   : > { %1924 = vmatmul.mubr.bf16.gmra.mrb[76].mxu0 %v3818_v41 }
  0xc9   : > { %1931 = vmatprep.mubr.bf16.mxu0 %v3916_v18 }
  0xca   : > { %1827 = vmatmul.mubr.bf16.gmra.mrb[76].mxu1 %v3987_v28 }
  0xcb   : > { %2028 = vmatprep.mubr.bf16.mxu1 %v3562_v49 }
  0xd0   : > { %1932 = vmatmul.mubr.bf16.gmra.mrb[80].mxu0 %v3850_v43 }
  0xd1   : > { %1939 = vmatprep.mubr.bf16.mxu0 %v3931_v26 }
  0xd2   : > { %2029 = vmatmul.mubr.bf16.vlgmr.msra.gmra.mrb[80].mxu1 %v3522_v9  ;;  %v553_v9 = vld [vmem:[#allocation2 + $0x190] sm:$0x3] }
  0xd3   : > { %2036 = vmatprep.mubr.bf16.mxu1 %v3623_v51  ;;  %v590_v49 = vpack.c.bf16 %v553_v9, %v553_v9 }
  0xd5   : > { %v907_v39 = vshll.u32 %v590_v49, 16 }
  0xd7   : > { %v909_v35 = vrot.slane %v907_v39, 1 }
  0xd8   : > { %1940 = vmatmul.mubr.bf16.gmra.mrb[84].mxu0 %v3868_v22 }
  0xd9   : > { %1947 = vmatprep.mubr.bf16.mxu0 %v3946_v27 }
  0xda   : > { %2037 = vmatmul.mubr.bf16.gmra.mrb[84].mxu1 %v3571_v55 }
  0xdb   : > { %2044 = vmatprep.mubr.bf16.mxu1 %v3688_v2 }
  0xe0   : > { %1948 = vmatmul.mubr.bf16.gmra.mrb[88].mxu0 %v3882_v40 }
  0xe1   : > { %1955 = vmatprep.mubr.bf16.mxu0 %v3958_v6 }
  0xe2   : > { %2045 = vmatmul.mubr.bf16.gmra.mrb[88].mxu1 %v3636_v5  ;;  %v914_v5 = vrot.slane %v3978_v34, 1 }
  0xe3   : > { %2052 = vmatprep.mubr.bf16.mxu1 %v3735_v12 }
  0xe8   : > { %1956 = vmatmul.mubr.bf16.gmra.mrb[92].mxu0 %v3475_v31 }
  0xe9   : > { %1963 = vmatprep.mubr.bf16.mxu0 %v3967_v57 }
  0xea   : > { %2053 = vmatmul.mubr.bf16.gmra.mrb[92].mxu1 %v3680_v60  ;;  %v915_v60 = vrot.slane %v590_v49, 1 }
  0xeb   : > { %2060 = vmatprep.mubr.bf16.mxu1 %v3745_v29 }
  0xec   : > { %v4025_v8 = vsel %vm834_vm1, %v914_v5, %v915_v60 }
  0xf0   : > { %1964 = vmatmul.mubr.bf16.gmra.mrb[96].mxu0 %v3531_v14 }
  0xf1   : > { %1971 = vmatprep.mubr.bf16.mxu0 %v3976_v54 }
  0xf2   : > { %2061 = vmatmul.mubr.bf16.gmra.mrb[96].mxu1 %v3697_v25 }
  0xf3   : > { %2068 = vmatprep.mubr.bf16.mxu1 %v3786_v11  ;;  %v900_v11 = vshrl.u32 %v3978_v34, 16 }
  0xf8   : > { %1972 = vmatmul.mubr.bf16.gmra.mrb[100].mxu0 %v3579_v63 }
  0xf9   : > { %1979 = vmatprep.mubr.bf16.mxu0 %v3987_v28  ;;  %v2680_v55 = vpop.f32.mrb[0].mxu0 }
  0xfa   : > { %2069 = vmatmul.mubr.bf16.gmra.mrb[100].mxu1 %v3719_v50  ;;  %v2681_v51 = vpop.f32.mrb[1].mxu0  ;;  %v904_v50 = vrot.slane %v902_v15, 1 }
  0xfb   : > { %2076 = vmatprep.mubr.bf16.mxu1 %v3818_v41  ;;  %v4019_v2 = vadd.f32 %v2681_v51, %v2680_v55  ;;  %v2683_v25 = vpop.f32.mrb[2].mxu0 }
  0xfc   : > { %v2684_v12 = vpop.f32.mrb[3].mxu0  ;;  %v905_v10 = vor.u32 %v904_v50, %v900_v11 }
  0xfd   : > { %v4021_v29 = vadd.f32 %v2684_v12, %v2683_v25 }
  0xfe   : > { %v4036_v30 = vsel %vm593_vm0, %v905_v10, %v909_v35 }
 0x100   : > { %1980 = vmatmul.mubr.bf16.gmra.mrb[104].mxu0 %v3633_v3 }
 0x101   : > { %1987 = vmatprep.mubr.bf16.mxu0 %v4025_v8 }
 0x102   : > { %2077 = vmatmul.mubr.bf16.gmra.mrb[104].mxu1 %v3747_v4 }
 0x103   : > { %2084 = vmatprep.mubr.bf16.mxu1 %v3850_v43 }
 0x105   : > { %v2752_v41 = vpop.f32.mrb[0].mxu1 }
 0x106   : > { %v2753_v1 = vpop.f32.mrb[1].mxu1 }
 0x107   : > { %v4031_v13 = vadd.f32 %v2753_v1, %v2752_v41  ;;  %v2755_v20 = vpop.f32.mrb[2].mxu1  ;;  %v2686_v4 = vpop.f32.mrb[4].mxu0 }
 0x108   : > { %v2756_v19 = vpop.f32.mrb[3].mxu1  ;;  %1988 = vmatmul.mubr.bf16.gmra.mrb[108].mxu0 %v4036_v30  ;;  %v2687_v61 = vpop.f32.mrb[5].mxu0 }
 0x109   : > { %v4033_v23 = vadd.f32 %v2756_v19, %v2755_v20  ;;  %3152 = vmatprep.mubr.bf16.mxu0 %v3779_v62  ;;  %v4042_v43 = vadd.f32 %v2687_v61, %v2686_v4  ;;  %v2689_v36 = vpop.f32.mrb[6].mxu0 }
 0x10a   : > { %2085 = vmatmul.mubr.bf16.gmra.mrb[108].mxu1 %v3783_v52  ;;  %v2690_v45 = vpop.f32.mrb[7].mxu0 }
 0x10b   : > { %2092 = vmatprep.mubr.bf16.mxu1 %v3868_v22  ;;  %v4046_v47 = vadd.f32 %v2690_v45, %v2689_v36 }
 0x10d   : > { %v2758_v16 = vpop.f32.mrb[4].mxu1 }
 0x10e   : > { %v2759_v32 = vpop.f32.mrb[5].mxu1 }
 0x10f   : > { %v4044_v42 = vadd.f32 %v2759_v32, %v2758_v16  ;;  %v2761_v17 = vpop.f32.mrb[6].mxu1  ;;  %v2692_v52 = vpop.f32.mrb[8].mxu0 }
 0x110   : > { %v2762_v53 = vpop.f32.mrb[7].mxu1  ;;  %3153 = vmatmul.mubr.bf16.vlgmr.msra.gmra.mrb[112].mxu0 %v3813_v58  ;;  %v2693_v22 = vpop.f32.mrb[9].mxu0 }
 0x111   : > { %v4048_v0 = vadd.f32 %v2762_v53, %v2761_v17  ;;  %3156 = vmatprep.mubr.bf16.mxu0 %v3846_v37  ;;  %v4054_v9 = vadd.f32 %v2693_v22, %v2692_v52  ;;  %v2695_v49 = vpop.f32.mrb[10].mxu0 }
 0x112   : > { %2093 = vmatmul.mubr.bf16.gmra.mrb[112].mxu1 %v3820_v48  ;;  %v2696_v15 = vpop.f32.mrb[11].mxu0 }
 0x113   : > { %2100 = vmatprep.mubr.bf16.mxu1 %v3882_v40  ;;  %v4058_v60 = vadd.f32 %v2696_v15, %v2695_v49  ;;  %v3283_v15 = vld [vmem:[#allocation2] sm:$0xff] }
 0x115   : > { %v2764_v62 = vpop.f32.mrb[8].mxu1 }
 0x116   : > { %v2765_v55 = vpop.f32.mrb[9].mxu1 }
 0x117   : > { %v4056_v51 = vadd.f32 %v2765_v55, %v2764_v62  ;;  %v2767_v5 = vpop.f32.mrb[10].mxu1 }
 0x118   : > { %v2768_v48 = vpop.f32.mrb[11].mxu1  ;;  %3157 = vmatmul.mubr.bf16.gmra.mrb[116].mxu0 %v3865_v21 }
 0x119   : > { %v4060_v25 = vadd.f32 %v2768_v48, %v2767_v5  ;;  %v2698_v58 = vpop.f32.mrb[12].mxu0  ;;  %3160 = vmatprep.mubr.bf16.mxu0 %v3879_v38  ;;  %v556_v5 = vld [vmem:[#allocation2 + $0x1a8] sm:$0x3] }
 0x11a   : > { %2101 = vmatmul.mubr.bf16.gmra.mrb[116].mxu1 %v3853_v46  ;;  %v2699_v37 = vpop.f32.mrb[13].mxu0 }
 0x11b   : > { %2108 = vmatprep.mubr.bf16.mxu1 %v3475_v31  ;;  %v4066_v12 = vadd.f32 %v2699_v37, %v2698_v58  ;;  %v2701_v11 = vpop.f32.mrb[14].mxu0  ;;  %v592_v58 = vpack.c.bf16 %v556_v5, %v556_v5 }
 0x11c   : > { %v2702_v39 = vpop.f32.mrb[15].mxu0 }
 0x11d   : > { %v2770_v40 = vpop.f32.mrb[12].mxu1  ;;  %v4070_v35 = vadd.f32 %v2702_v39, %v2701_v11 }
 0x11e   : > { %v2771_v50 = vpop.f32.mrb[13].mxu1 }
 0x11f   : > { %v4068_v41 = vadd.f32 %v2771_v50, %v2770_v40  ;;  %v2773_v10 = vpop.f32.mrb[14].mxu1 }
 0x120   : > { %v2774_v46 = vpop.f32.mrb[15].mxu1  ;;  %3161 = vmatmul.mubr.bf16.gmra.mrb[120].mxu0 %v3891_v44 }
 0x121   : > { %v4072_v1 = vadd.f32 %v2774_v46, %v2773_v10  ;;  %3164 = vmatprep.mubr.bf16.mxu0 %v3900_v59 }
 0x122   : > { %2109 = vmatmul.mubr.bf16.gmra.mrb[120].mxu1 %v3441_v56 }
 0x123   : > { %2116 = vmatprep.mubr.bf16.mxu1 %v3531_v14  ;;  %v2704_v31 = vpop.f32.mrb[16].mxu0 }
 0x124   : > { %v2705_v38 = vpop.f32.mrb[17].mxu0 }
 0x125   : > { %v2792_v21 = vpop.f32.mrb[16].mxu1  ;;  %v4078_v19 = vadd.f32 %v2705_v38, %v2704_v31  ;;  %v2707_v16 = vpop.f32.mrb[18].mxu0 }
 0x126   : > { %v2793_v20 = vpop.f32.mrb[17].mxu1  ;;  %v2708_v32 = vpop.f32.mrb[19].mxu0 }
 0x127   : > { %v2794_v4 = vadd.f32 %v2793_v20, %v2792_v21  ;;  %v2795_v61 = vpop.f32.mrb[18].mxu1  ;;  %v4083_v56 = vadd.f32 %v2708_v32, %v2707_v16 }
 0x128   : > { %v2796_v36 = vpop.f32.mrb[19].mxu1  ;;  %3165 = vmatmul.mubr.bf16.gmra.mrb[124].mxu0 %v3916_v18  ;;  %v4094_v18 = vpack.c.bf16 %v3283_v15, %v3283_v15 }
 0x129   : > { %v4081_v17 = vadd.f32 %v2794_v4, %v4019_v2  ;;  %v2797_v44 = vadd.f32 %v2796_v36, %v2795_v61  ;;  %3168 = vmatprep.mubr.bf16.mxu0 %v3931_v26 }
 0x12a   : > { %2117 = vmatmul.mubr.bf16.gmra.mrb[124].mxu1 %v3480_v33  ;;  %v921_v37 = vshll.u32 %v4094_v18, 16 }
 0x12b   : > { %v4088_v14 = vadd.f32 %v2797_v44, %v4021_v29  ;;  %2124 = vmatprep.mubr.bf16.mxu1 %v3579_v63  ;;  %v2710_v59 = vpop.f32.mrb[20].mxu0 }
 0x12c   : > { %v2711_v53 = vpop.f32.mrb[21].mxu0  ;;  %v923_v21 = vrot.slane %v921_v37, 1 }
 0x12d   : > { %v2798_v45 = vpop.f32.mrb[20].mxu1  ;;  %v4092_v2 = vadd.f32 %v2711_v53, %v2710_v59  ;;  %v2713_v62 = vpop.f32.mrb[22].mxu0 }
 0x12e   : > { %v2799_v52 = vpop.f32.mrb[21].mxu1  ;;  %v2714_v55 = vpop.f32.mrb[23].mxu0 }
 0x12f   : > { %v2800_v22 = vadd.f32 %v2799_v52, %v2798_v45  ;;  %v2801_v49 = vpop.f32.mrb[22].mxu1  ;;  %v4099_v63 = vadd.f32 %v2714_v55, %v2713_v62  ;;  %v934_v55 = vrot.slane %v592_v58, 1 }
 0x130   : > { %v2802_v33 = vpop.f32.mrb[23].mxu1  ;;  %3169 = vmatmul.mubr.bf16.gmra.mrb[128].mxu0 %v3946_v27 }
 0x131   : > { %v4097_v29 = vadd.f32 %v2800_v22, %v4042_v43  ;;  %v2803_v26 = vadd.f32 %v2802_v33, %v2801_v49  ;;  %3172 = vmatprep.mubr.bf16.mxu0 %v3958_v6  ;;  %v933_v49 = vrot.slane %v4094_v18, 1 }
 0x132   : > { %2125 = vmatmul.mubr.bf16.gmra.mrb[128].mxu1 %v3538_v24 }
 0x133   : > { %v4104_v48 = vadd.f32 %v2803_v26, %v4046_v47  ;;  %2132 = vmatprep.mubr.bf16.mxu1 %v3633_v3  ;;  %v2716_v43 = vpop.f32.mrb[24].mxu0  ;;  %v919_v47 = vshrl.u32 %v4094_v18, 16  ;;  %v926_v3 = vshll.u32 %v592_v58, 16 }
 0x134   : > { %v2717_v11 = vpop.f32.mrb[25].mxu0 }
 0x135   : > { %v2804_v40 = vpop.f32.mrb[24].mxu1  ;;  %v4109_v39 = vadd.f32 %v2717_v11, %v2716_v43  ;;  %v2719_v24 = vpop.f32.mrb[26].mxu0  ;;  %v924_v16 = vor.u32 %v923_v21, %v919_v47  ;;  %v928_v61 = vrot.slane %v926_v3, 1 }
 0x136   : > { %v2805_v50 = vpop.f32.mrb[25].mxu1  ;;  %v2720_v27 = vpop.f32.mrb[27].mxu0 }
 0x137   : > { %v2806_v10 = vadd.f32 %v2805_v50, %v2804_v40  ;;  %v2807_v46 = vpop.f32.mrb[26].mxu1  ;;  %v4115_v38 = vadd.f32 %v2720_v27, %v2719_v24 }
 0x138   : > { %v2808_v31 = vpop.f32.mrb[27].mxu1  ;;  %3173 = vmatmul.mubr.bf16.gmra.mrb[132].mxu0 %v3967_v57 }
 0x139   : > { %v4113_v6 = vadd.f32 %v2806_v10, %v4054_v9  ;;  %v2809_v20 = vadd.f32 %v2808_v31, %v2807_v46  ;;  %3176 = vmatprep.mubr.bf16.mxu0 %v3976_v54 }
 0x13a   : > { %2133 = vmatmul.mubr.bf16.gmra.mrb[132].mxu1 %v3589_v7 }
 0x13b   : > { %v4120_v4 = vadd.f32 %v2809_v20, %v4058_v60  ;;  %2140 = vmatprep.mubr.bf16.mxu1 %v4036_v30  ;;  %v2722_v32 = vpop.f32.mrb[28].mxu0  ;;  %v929_v60 = vsel %vm593_vm0, %v924_v16, %v928_v61 }
 0x13c   : > { %v2723_v9 = vpop.f32.mrb[29].mxu0 }
 0x13d   : > { %v2810_v36 = vpop.f32.mrb[28].mxu1  ;;  %v4124_v59 = vadd.f32 %v2723_v9, %v2722_v32  ;;  %v2725_v53 = vpop.f32.mrb[30].mxu0 }
 0x13e   : > { %v2811_v44 = vpop.f32.mrb[29].mxu1  ;;  %v2726_v52 = vpop.f32.mrb[31].mxu0 }
 0x13f   : > { %v2812_v45 = vadd.f32 %v2811_v44, %v2810_v36  ;;  %v2813_v7 = vpop.f32.mrb[30].mxu1  ;;  %v4130_v30 = vadd.f32 %v2726_v52, %v2725_v53 }
 0x140   : > { %v2814_v57 = vpop.f32.mrb[31].mxu1  ;;  %3177 = vmatmul.mubr.bf16.gmra.mrb[136].mxu0 %v3987_v28  ;;  %v935_v28 = vsel %vm834_vm1, %v933_v49, %v934_v55 }
 0x141   : > { %v4128_v22 = vadd.f32 %v2812_v45, %v4066_v12  ;;  %v2815_v54 = vadd.f32 %v2814_v57, %v2813_v7  ;;  %3180 = vmatprep.mubr.bf16.mxu0 %v4025_v8 }
 0x142   : > { %2141 = vmatmul.mubr.bf16.gmra.mrb[136].mxu1 %v3978_v34 }
 0x143   : > { %v4135_v62 = vadd.f32 %v2815_v54, %v4070_v35  ;;  %2148 = vmatprep.mubr.bf16.mxu1 %v929_v60  ;;  %v2728_v33 = vpop.f32.mrb[32].mxu0 }
 0x144   : > { %v2729_v12 = vpop.f32.mrb[33].mxu0 }
 0x145   : > { %v2816_v15 = vpop.f32.mrb[32].mxu1  ;;  %v4139_v5 = vadd.f32 %v2729_v12, %v2728_v33  ;;  %v2731_v43 = vpop.f32.mrb[34].mxu0 }
 0x146   : > { %v2817_v26 = vpop.f32.mrb[33].mxu1  ;;  %v2732_v40 = vpop.f32.mrb[35].mxu0 }
 0x147   : > { %v2818_v37 = vadd.f32 %v2817_v26, %v2816_v15  ;;  %v2819_v34 = vpop.f32.mrb[34].mxu1  ;;  %v2733_v8 = vadd.f32 %v2732_v40, %v2731_v43 }
 0x148   : > { %v2820_v35 = vpop.f32.mrb[35].mxu1  ;;  %3181 = vmatmul.mubr.bf16.gmra.mrb[140].mxu0 %v935_v28 }
 0x149   : > { %v4143_v11 = vadd.f32 %v2818_v37, %v4078_v19  ;;  %v2821_v50 = vadd.f32 %v2820_v35, %v2819_v34 }
 0x14a   : > { %2149 = vmatmul.mubr.bf16.gmra.mrb[140].mxu1 %v4094_v18 }
 0x14b   : > { %v4147_v58 = vadd.f32 %v2821_v50, %v4083_v56  ;;  %v2734_v10 = vpop.f32.mrb[36].mxu0 }
 0x14c   : > { %v2735_v46 = vpop.f32.mrb[37].mxu0 }
 0x14d   : > { %v2822_v24 = vpop.f32.mrb[36].mxu1  ;;  %v4149_v31 = vadd.f32 %v2735_v46, %v2734_v10  ;;  %v2737_v21 = vpop.f32.mrb[38].mxu0 }
 0x14e   : > { %v2823_v27 = vpop.f32.mrb[37].mxu1  ;;  %v2738_v20 = vpop.f32.mrb[39].mxu0 }
 0x14f   : > { %v2824_v47 = vadd.f32 %v2823_v27, %v2822_v24  ;;  %v2825_v3 = vpop.f32.mrb[38].mxu1  ;;  %v2739_v61 = vadd.f32 %v2738_v20, %v2737_v21 }
 0x150   : > { %v2826_v19 = vpop.f32.mrb[39].mxu1 }
 0x151   : > { %v4152_v16 = vadd.f32 %v2824_v47, %v4092_v2  ;;  %v2827_v18 = vadd.f32 %v2826_v19, %v2825_v3 }
 0x153   : > { %v4155_v32 = vadd.f32 %v2827_v18, %v4099_v63  ;;  %v2740_v56 = vpop.f32.mrb[40].mxu0 }
 0x154   : > { %v2741_v9 = vpop.f32.mrb[41].mxu0 }
 0x155   : > { %v2828_v36 = vpop.f32.mrb[40].mxu1  ;;  %v4157_v45 = vadd.f32 %v2741_v9, %v2740_v56  ;;  %v2743_v7 = vpop.f32.mrb[42].mxu0 }
 0x156   : > { %v2829_v44 = vpop.f32.mrb[41].mxu1  ;;  %v2744_v57 = vpop.f32.mrb[43].mxu0 }
 0x157   : > { %v2830_v53 = vadd.f32 %v2829_v44, %v2828_v36  ;;  %v2831_v52 = vpop.f32.mrb[42].mxu1  ;;  %v4162_v2 = vadd.f32 %v2744_v57, %v2743_v7 }
 0x158   : > { %v2832_v60 = vpop.f32.mrb[43].mxu1 }
 0x159   : > { %v4160_v54 = vadd.f32 %v2830_v53, %v4109_v39  ;;  %v2833_v49 = vadd.f32 %v2832_v60, %v2831_v52 }
 0x15b   : > { %v4165_v63 = vadd.f32 %v2833_v49, %v4115_v38  ;;  %v2746_v55 = vpop.f32.mrb[44].mxu0 }
 0x15c   : > { %v2747_v15 = vpop.f32.mrb[45].mxu0 }
 0x15d   : > { %v2834_v33 = vpop.f32.mrb[44].mxu1  ;;  %v4167_v26 = vadd.f32 %v2747_v15, %v2746_v55  ;;  %v2749_v43 = vpop.f32.mrb[46].mxu0 }
 0x15e   : > { %v2835_v12 = vpop.f32.mrb[45].mxu1  ;;  %v2750_v28 = vpop.f32.mrb[47].mxu0 }
 0x15f   : > { %v2836_v37 = vadd.f32 %v2835_v12, %v2834_v33  ;;  %v2837_v34 = vpop.f32.mrb[46].mxu1  ;;  %v4172_v35 = vadd.f32 %v2750_v28, %v2749_v43 }
 0x160   : > { %v2838_v40 = vpop.f32.mrb[47].mxu1 }
 0x161   : > { %v4170_v39 = vadd.f32 %v2836_v37, %v4124_v59  ;;  %v2839_v50 = vadd.f32 %v2838_v40, %v2837_v34 }
 0x163   : > { %v4175_v38 = vadd.f32 %v2839_v50, %v4130_v30  ;;  %v2904_v24 = vpop.f32.mrb[48].mxu0 }
 0x164   : > { %v2905_v27 = vpop.f32.mrb[49].mxu0 }
 0x165   : > { %v2840_v10 = vpop.f32.mrb[48].mxu1  ;;  %v2906_v21 = vadd.f32 %v2905_v27, %v2904_v24  ;;  %v2907_v20 = vpop.f32.mrb[50].mxu0 }
 0x166   : > { %v2841_v46 = vpop.f32.mrb[49].mxu1  ;;  %v2908_v18 = vpop.f32.mrb[51].mxu0 }
 0x167   : > { %v2842_v47 = vadd.f32 %v2841_v46, %v2840_v10  ;;  %v2843_v3 = vpop.f32.mrb[50].mxu1  ;;  %v4181_v59 = vadd.f32 %v2906_v21, %v4081_v17  ;;  %v2909_v9 = vadd.f32 %v2908_v18, %v2907_v20 }
 0x168   : > { %v2844_v19 = vpop.f32.mrb[51].mxu1 }
 0x169   : > { %v4178_v56 = vadd.f32 %v2842_v47, %v4139_v5  ;;  %v2845_v36 = vadd.f32 %v2844_v19, %v2843_v3  ;;  %v4186_v44 = vadd.f32 %v2909_v9, %v4088_v14 }
 0x16b   : > { %v4183_v30 = vadd.f32 %v2845_v36, %v2733_v8  ;;  %v2910_v7 = vpop.f32.mrb[52].mxu0 }
 0x16c   : > { %v2911_v57 = vpop.f32.mrb[53].mxu0 }
 0x16d   : > { %v2846_v53 = vpop.f32.mrb[52].mxu1  ;;  %v2912_v49 = vadd.f32 %v2911_v57, %v2910_v7  ;;  %v2913_v33 = vpop.f32.mrb[54].mxu0 }
 0x16e   : > { %v2847_v52 = vpop.f32.mrb[53].mxu1  ;;  %v2914_v15 = vpop.f32.mrb[55].mxu0 }
 0x16f   : > { %v2848_v60 = vadd.f32 %v2847_v52, %v2846_v53  ;;  %v2849_v55 = vpop.f32.mrb[54].mxu1  ;;  %v4192_v12 = vadd.f32 %v2912_v49, %v4097_v29  ;;  %v2915_v37 = vadd.f32 %v2914_v15, %v2913_v33 }
 0x170   : > { %v2850_v5 = vpop.f32.mrb[55].mxu1 }
 0x171   : > { %v4189_v17 = vadd.f32 %v2848_v60, %v4149_v31  ;;  %v2851_v8 = vadd.f32 %v2850_v5, %v2849_v55  ;;  %v4197_v43 = vadd.f32 %v2915_v37, %v4104_v48 }
 0x173   : > { %v4194_v14 = vadd.f32 %v2851_v8, %v2739_v61  ;;  %v2916_v28 = vpop.f32.mrb[56].mxu0 }
 0x174   : > { %v2917_v50 = vpop.f32.mrb[57].mxu0 }
 0x175   : > { %v2852_v34 = vpop.f32.mrb[56].mxu1  ;;  %v2918_v24 = vadd.f32 %v2917_v50, %v2916_v28  ;;  %v2919_v27 = vpop.f32.mrb[58].mxu0 }
 0x176   : > { %v2853_v40 = vpop.f32.mrb[57].mxu1  ;;  %v2920_v47 = vpop.f32.mrb[59].mxu0 }
 0x177   : > { %v2854_v10 = vadd.f32 %v2853_v40, %v2852_v34  ;;  %v2855_v46 = vpop.f32.mrb[58].mxu1  ;;  %v4203_v21 = vadd.f32 %v2918_v24, %v4113_v6  ;;  %v2921_v3 = vadd.f32 %v2920_v47, %v2919_v27 }
 0x178   : > { %v2856_v31 = vpop.f32.mrb[59].mxu1 }
 0x179   : > { %v4200_v29 = vadd.f32 %v2854_v10, %v4157_v45  ;;  %v2857_v61 = vadd.f32 %v2856_v31, %v2855_v46  ;;  %v4209_v20 = vadd.f32 %v2921_v3, %v4120_v4 }
 0x17b   : > { %v4206_v48 = vadd.f32 %v2857_v61, %v4162_v2  ;;  %v2922_v18 = vpop.f32.mrb[60].mxu0 }
 0x17c   : > { %v2923_v9 = vpop.f32.mrb[61].mxu0 }
 0x17d   : > { %v2858_v19 = vpop.f32.mrb[60].mxu1  ;;  %v2924_v7 = vadd.f32 %v2923_v9, %v2922_v18  ;;  %v2925_v45 = vpop.f32.mrb[62].mxu0 }
 0x17e   : > { %v2859_v36 = vpop.f32.mrb[61].mxu1  ;;  %v2926_v60 = vpop.f32.mrb[63].mxu0 }
 0x17f   : > { %v2860_v53 = vadd.f32 %v2859_v36, %v2858_v19  ;;  %v2861_v52 = vpop.f32.mrb[62].mxu1  ;;  %v4215_v49 = vadd.f32 %v2924_v7, %v4128_v22  ;;  %v2927_v55 = vadd.f32 %v2926_v60, %v2925_v45 }
 0x180   : > { %v2862_v57 = vpop.f32.mrb[63].mxu1 }
 0x181   : > { %v4212_v6 = vadd.f32 %v2860_v53, %v4167_v26  ;;  %v2863_v2 = vadd.f32 %v2862_v57, %v2861_v52  ;;  %v4221_v33 = vadd.f32 %v2927_v55, %v4135_v62 }
 0x183   : > { %v4218_v4 = vadd.f32 %v2863_v2, %v4172_v35  ;;  %v2928_v15 = vpop.f32.mrb[64].mxu0 }
 0x184   : > { %v2929_v37 = vpop.f32.mrb[65].mxu0 }
 0x185   : > { %v2864_v5 = vpop.f32.mrb[64].mxu1  ;;  %v2930_v28 = vadd.f32 %v2929_v37, %v2928_v15  ;;  %v2931_v26 = vpop.f32.mrb[66].mxu0 }
 0x186   : > { %v2865_v8 = vpop.f32.mrb[65].mxu1  ;;  %v2932_v10 = vpop.f32.mrb[67].mxu0 }
 0x187   : > { %v2866_v34 = vadd.f32 %v2865_v8, %v2864_v5  ;;  %v2867_v40 = vpop.f32.mrb[66].mxu1  ;;  %v4227_v24 = vadd.f32 %v2930_v28, %v4143_v11  ;;  %v2933_v46 = vadd.f32 %v2932_v10, %v2931_v26 }
 0x188   : > { %v2868_v50 = vpop.f32.mrb[67].mxu1 }
 0x189   : > { %v4224_v22 = vadd.f32 %v2866_v34, %v4031_v13  ;;  %v2869_v35 = vadd.f32 %v2868_v50, %v2867_v40  ;;  %v4233_v27 = vadd.f32 %v2933_v46, %v4147_v58 }
 0x18b   : > { %v4230_v62 = vadd.f32 %v2869_v35, %v4033_v23  ;;  %v2934_v47 = vpop.f32.mrb[68].mxu0 }
 0x18c   : > { %v2935_v3 = vpop.f32.mrb[69].mxu0 }
 0x18d   : > { %v2870_v31 = vpop.f32.mrb[68].mxu1  ;;  %v2936_v18 = vadd.f32 %v2935_v3, %v2934_v47  ;;  %v2937_v13 = vpop.f32.mrb[70].mxu0 }
 0x18e   : > { %v2871_v61 = vpop.f32.mrb[69].mxu1  ;;  %v2938_v53 = vpop.f32.mrb[71].mxu0 }
 0x18f   : > { %v2872_v19 = vadd.f32 %v2871_v61, %v2870_v31  ;;  %v2873_v36 = vpop.f32.mrb[70].mxu1  ;;  %v4239_v7 = vadd.f32 %v2936_v18, %v4152_v16  ;;  %v2939_v52 = vadd.f32 %v2938_v53, %v2937_v13 }
 0x190   : > { %v2874_v9 = vpop.f32.mrb[71].mxu1 }
 0x191   : > { %v4236_v11 = vadd.f32 %v2872_v19, %v4044_v42  ;;  %v2875_v23 = vadd.f32 %v2874_v9, %v2873_v36  ;;  %v4245_v45 = vadd.f32 %v2939_v52, %v4155_v32 }
 0x193   : > { %v4242_v58 = vadd.f32 %v2875_v23, %v4048_v0  ;;  %v2940_v60 = vpop.f32.mrb[72].mxu0 }
 0x194   : > { %v2941_v55 = vpop.f32.mrb[73].mxu0 }
 0x195   : > { %v2876_v57 = vpop.f32.mrb[72].mxu1  ;;  %v2942_v15 = vadd.f32 %v2941_v55, %v2940_v60  ;;  %v2943_v42 = vpop.f32.mrb[74].mxu0 }
 0x196   : > { %v2877_v2 = vpop.f32.mrb[73].mxu1  ;;  %v2944_v34 = vpop.f32.mrb[75].mxu0 }
 0x197   : > { %v2878_v5 = vadd.f32 %v2877_v2, %v2876_v57  ;;  %v2879_v8 = vpop.f32.mrb[74].mxu1  ;;  %v4251_v28 = vadd.f32 %v2942_v15, %v4160_v54  ;;  %v2945_v40 = vadd.f32 %v2944_v34, %v2943_v42 }
 0x198   : > { %v2880_v37 = vpop.f32.mrb[75].mxu1 }
 0x199   : > { %v4248_v16 = vadd.f32 %v2878_v5, %v4056_v51  ;;  %v2881_v0 = vadd.f32 %v2880_v37, %v2879_v8  ;;  %v4257_v26 = vadd.f32 %v2945_v40, %v4165_v63 }
 0x19b   : > { %v4254_v32 = vadd.f32 %v2881_v0, %v4060_v25  ;;  %v2946_v10 = vpop.f32.mrb[76].mxu0 }
 0x19c   : > { %v2947_v46 = vpop.f32.mrb[77].mxu0 }
 0x19d   : > { %v2882_v50 = vpop.f32.mrb[76].mxu1  ;;  %v2948_v47 = vadd.f32 %v2947_v46, %v2946_v10  ;;  %v2949_v51 = vpop.f32.mrb[78].mxu0 }
 0x19e   : > { %v2883_v35 = vpop.f32.mrb[77].mxu1  ;;  %v2950_v19 = vpop.f32.mrb[79].mxu0 }
 0x19f   : > { %v2884_v31 = vadd.f32 %v2883_v35, %v2882_v50  ;;  %v2885_v61 = vpop.f32.mrb[78].mxu1  ;;  %v4263_v18 = vadd.f32 %v2948_v47, %v4170_v39  ;;  %v2951_v36 = vadd.f32 %v2950_v19, %v2949_v51 }
 0x1a0   : > { %v2886_v3 = vpop.f32.mrb[79].mxu1 }
 0x1a1   : > { %v4260_v54 = vadd.f32 %v2884_v31, %v4068_v41  ;;  %v2887_v25 = vadd.f32 %v2886_v3, %v2885_v61  ;;  %v4269_v13 = vadd.f32 %v2951_v36, %v4175_v38 }
 0x1a3   : > { %v4266_v63 = vadd.f32 %v2887_v25, %v4072_v1  ;;  %v2952_v9 = vpop.f32.mrb[80].mxu0 }
 0x1a4   : > { %v2953_v23 = vpop.f32.mrb[81].mxu0 }
 0x1a5   : > { %v3016_v53 = vpop.f32.mrb[80].mxu1  ;;  %v2954_v57 = vadd.f32 %v2953_v23, %v2952_v9  ;;  %v2955_v2 = vpop.f32.mrb[82].mxu0 }
 0x1a6   : > { %v3017_v52 = vpop.f32.mrb[81].mxu1  ;;  %v2956_v55 = vpop.f32.mrb[83].mxu0 }
 0x1a7   : > { %v3018_v60 = vadd.f32 %v3017_v52, %v3016_v53  ;;  %v3019_v41 = vpop.f32.mrb[82].mxu1  ;;  %v4272_v39 = vadd.f32 %v2954_v57, %v4178_v56  ;;  %v2957_v15 = vadd.f32 %v2956_v55, %v2955_v2 }
 0x1a8   : > { %v3020_v5 = vpop.f32.mrb[83].mxu1 }
 0x1a9   : > { %v3021_v8 = vadd.f32 %v3020_v5, %v3019_v41  ;;  %v4275_v1 = vadd.f32 %v3018_v60, %v4181_v59  ;;  %v4278_v38 = vadd.f32 %v2957_v15, %v4183_v30 }
 0x1ab   : > { %v4281_v42 = vadd.f32 %v3021_v8, %v4186_v44  ;;  %v2958_v37 = vpop.f32.mrb[84].mxu0 }
 0x1ac   : > { %v2959_v0 = vpop.f32.mrb[85].mxu0 }
 0x1ad   : > { %v3022_v34 = vpop.f32.mrb[84].mxu1  ;;  %v2960_v50 = vadd.f32 %v2959_v0, %v2958_v37  ;;  %v2961_v35 = vpop.f32.mrb[86].mxu0 }
 0x1ae   : > { %v3023_v40 = vpop.f32.mrb[85].mxu1  ;;  %v2962_v46 = vpop.f32.mrb[87].mxu0 }
 0x1af   : > { %v3024_v10 = vadd.f32 %v3023_v40, %v3022_v34  ;;  %v3025_v56 = vpop.f32.mrb[86].mxu1  ;;  %v4284_v47 = vadd.f32 %v2960_v50, %v4189_v17  ;;  %v2963_v59 = vadd.f32 %v2962_v46, %v2961_v35 }
 0x1b0   : > { %v3026_v31 = vpop.f32.mrb[87].mxu1 }
 0x1b1   : > { %v3027_v61 = vadd.f32 %v3026_v31, %v3025_v56  ;;  %v4287_v30 = vadd.f32 %v3024_v10, %v4192_v12  ;;  %v4290_v44 = vadd.f32 %v2963_v59, %v4194_v14 }
 0x1b3   : > { %v4293_v51 = vadd.f32 %v3027_v61, %v4197_v43  ;;  %v2964_v3 = vpop.f32.mrb[88].mxu0 }
 0x1b4   : > { %v2965_v25 = vpop.f32.mrb[89].mxu0 }
 0x1b5   : > { %v3028_v19 = vpop.f32.mrb[88].mxu1  ;;  %v2966_v9 = vadd.f32 %v2965_v25, %v2964_v3  ;;  %v2967_v23 = vpop.f32.mrb[90].mxu0 }
 0x1b6   : > { %v3029_v36 = vpop.f32.mrb[89].mxu1  ;;  %v2968_v52 = vpop.f32.mrb[91].mxu0 }
 0x1b7   : > { %v3030_v53 = vadd.f32 %v3029_v36, %v3028_v19  ;;  %v3031_v17 = vpop.f32.mrb[90].mxu1  ;;  %v4296_v60 = vadd.f32 %v2966_v9, %v4200_v29  ;;  %v2969_v12 = vadd.f32 %v2968_v52, %v2967_v23 }
 0x1b8   : > { %v3032_v57 = vpop.f32.mrb[91].mxu1 }
 0x1b9   : > { %v3033_v2 = vadd.f32 %v3032_v57, %v3031_v17  ;;  %v4299_v14 = vadd.f32 %v3030_v53, %v4203_v21  ;;  %v4302_v43 = vadd.f32 %v2969_v12, %v4206_v48 }
 0x1bb   : > { %v4305_v41 = vadd.f32 %v3033_v2, %v4209_v20  ;;  %v2970_v55 = vpop.f32.mrb[92].mxu0 }
 0x1bc   : > { %v2971_v15 = vpop.f32.mrb[93].mxu0 }
 0x1bd   : > { %v3034_v5 = vpop.f32.mrb[92].mxu1  ;;  %v2972_v37 = vadd.f32 %v2971_v15, %v2970_v55  ;;  %v2973_v0 = vpop.f32.mrb[94].mxu0 }
 0x1be   : > { %v3035_v8 = vpop.f32.mrb[93].mxu1  ;;  %v2974_v40 = vpop.f32.mrb[95].mxu0 }
 0x1bf   : > { %v3036_v34 = vadd.f32 %v3035_v8, %v3034_v5  ;;  %v3037_v29 = vpop.f32.mrb[94].mxu1  ;;  %v4308_v10 = vadd.f32 %v2972_v37, %v4212_v6  ;;  %v2975_v21 = vadd.f32 %v2974_v40, %v2973_v0 }
 0x1c0   : > { %v3038_v50 = vpop.f32.mrb[95].mxu1 }
 0x1c1   : > { %v3039_v35 = vadd.f32 %v3038_v50, %v3037_v29  ;;  %v4311_v48 = vadd.f32 %v3036_v34, %v4215_v49  ;;  %v4314_v20 = vadd.f32 %v2975_v21, %v4218_v4 }
 0x1c3   : > { %v4317_v56 = vadd.f32 %v3039_v35, %v4221_v33  ;;  %v2976_v46 = vpop.f32.mrb[96].mxu0 }
 0x1c4   : > { %v2977_v59 = vpop.f32.mrb[97].mxu0 }
 0x1c5   : > { %v3040_v31 = vpop.f32.mrb[96].mxu1  ;;  %v2978_v3 = vadd.f32 %v2977_v59, %v2976_v46  ;;  %v2979_v25 = vpop.f32.mrb[98].mxu0 }
 0x1c6   : > { %v3041_v61 = vpop.f32.mrb[97].mxu1  ;;  %v2980_v36 = vpop.f32.mrb[99].mxu0 }
 0x1c7   : > { %v3042_v19 = vadd.f32 %v3041_v61, %v3040_v31  ;;  %v3043_v6 = vpop.f32.mrb[98].mxu1  ;;  %v4320_v53 = vadd.f32 %v2978_v3, %v4224_v22  ;;  %v2981_v49 = vadd.f32 %v2980_v36, %v2979_v25 }
 0x1c8   : > { %v3044_v9 = vpop.f32.mrb[99].mxu1 }
 0x1c9   : > { %v3045_v23 = vadd.f32 %v3044_v9, %v3043_v6  ;;  %v4323_v4 = vadd.f32 %v3042_v19, %v4227_v24  ;;  %v4326_v33 = vadd.f32 %v2981_v49, %v4230_v62 }
 0x1cb   : > { %v4329_v17 = vadd.f32 %v3045_v23, %v4233_v27  ;;  %v2982_v52 = vpop.f32.mrb[100].mxu0 }
 0x1cc   : > { %v2983_v12 = vpop.f32.mrb[101].mxu0 }
 0x1cd   : > { %v3046_v57 = vpop.f32.mrb[100].mxu1  ;;  %v2984_v55 = vadd.f32 %v2983_v12, %v2982_v52  ;;  %v2985_v15 = vpop.f32.mrb[102].mxu0 }
 0x1ce   : > { %v3047_v2 = vpop.f32.mrb[101].mxu1  ;;  %v2986_v8 = vpop.f32.mrb[103].mxu0 }
 0x1cf   : > { %v3048_v5 = vadd.f32 %v3047_v2, %v3046_v57  ;;  %v3049_v22 = vpop.f32.mrb[102].mxu1  ;;  %v4332_v34 = vadd.f32 %v2984_v55, %v4236_v11  ;;  %v2987_v24 = vadd.f32 %v2986_v8, %v2985_v15 }
 0x1d0   : > { %v3050_v37 = vpop.f32.mrb[103].mxu1 }
 0x1d1   : > { %v3051_v0 = vadd.f32 %v3050_v37, %v3049_v22  ;;  %v4335_v62 = vadd.f32 %v3048_v5, %v4239_v7  ;;  %v4338_v27 = vadd.f32 %v2987_v24, %v4242_v58 }
 0x1d3   : > { %v4341_v29 = vadd.f32 %v3051_v0, %v4245_v45  ;;  %v2988_v40 = vpop.f32.mrb[104].mxu0 }
 0x1d4   : > { %v2989_v21 = vpop.f32.mrb[105].mxu0 }
 0x1d5   : > { %v3052_v50 = vpop.f32.mrb[104].mxu1  ;;  %v2990_v46 = vadd.f32 %v2989_v21, %v2988_v40  ;;  %v2991_v59 = vpop.f32.mrb[106].mxu0 }
 0x1d6   : > { %v3053_v35 = vpop.f32.mrb[105].mxu1  ;;  %v2992_v61 = vpop.f32.mrb[107].mxu0 }
 0x1d7   : > { %v3054_v31 = vadd.f32 %v3053_v35, %v3052_v50  ;;  %v3055_v11 = vpop.f32.mrb[106].mxu1  ;;  %v4344_v19 = vadd.f32 %v2990_v46, %v4248_v16  ;;  %v2993_v7 = vadd.f32 %v2992_v61, %v2991_v59 }
 0x1d8   : > { %v3056_v3 = vpop.f32.mrb[107].mxu1 }
 0x1d9   : > { %v3057_v25 = vadd.f32 %v3056_v3, %v3055_v11  ;;  %v4347_v58 = vadd.f32 %v3054_v31, %v4251_v28  ;;  %v4350_v45 = vadd.f32 %v2993_v7, %v4254_v32 }
 0x1db   : > { %v4353_v6 = vadd.f32 %v3057_v25, %v4257_v26  ;;  %v2994_v36 = vpop.f32.mrb[108].mxu0 }
 0x1dc   : > { %v2995_v49 = vpop.f32.mrb[109].mxu0 }
 0x1dd   : > { %v3058_v9 = vpop.f32.mrb[108].mxu1  ;;  %v2996_v52 = vadd.f32 %v2995_v49, %v2994_v36  ;;  %v2997_v16 = vpop.f32.mrb[110].mxu0 }
 0x1de   : > { %v3059_v23 = vpop.f32.mrb[109].mxu1  ;;  %v2998_v2 = vpop.f32.mrb[111].mxu0 }
 0x1df   : > { %v3060_v57 = vadd.f32 %v3059_v23, %v3058_v9  ;;  %v3061_v12 = vpop.f32.mrb[110].mxu1  ;;  %v4356_v28 = vadd.f32 %v2996_v52, %v4260_v54  ;;  %v2999_v5 = vadd.f32 %v2998_v2, %v2997_v16 }
 0x1e0   : > { %v3062_v55 = vpop.f32.mrb[111].mxu1 }
 0x1e1   : > { %v3063_v32 = vadd.f32 %v3062_v55, %v3061_v12  ;;  %v4359_v15 = vadd.f32 %v3060_v57, %v4263_v18  ;;  %v4362_v26 = vadd.f32 %v2999_v5, %v4266_v63 }
 0x1e3   : > { %v4365_v22 = vadd.f32 %v3063_v32, %v4269_v13  ;;  %v3154_v54 = vpop.f32.mrb[112].mxu0 }
 0x1e4   : > { %v2200_v18 = vadd.f32 %v3154_v54, %v4287_v30  ;;  %v2191_v63 = vpop.f32.mrb[113].mxu0 }
 0x1e5   : > { %v3064_v8 = vpop.f32.mrb[112].mxu1  ;;  %v2192_v13 = vadd.f32 %v2191_v63, %v4275_v1  ;;  %v3155_v40 = vpop.f32.mrb[114].mxu0 }
 0x1e6   : > { %v3065_v37 = vpop.f32.mrb[113].mxu1  ;;  %2320 = vst [vmem:[%s4372_s15 + $0x10] sm:$0xff] %v2200_v18  ;;  %v2203_v50 = vadd.f32 %v3155_v40, %v4293_v51  ;;  %v2194_v35 = vpop.f32.mrb[115].mxu0  ;;  %v2389_v3 = vmul.f32 %v2200_v18, %v2200_v18 }
 0x1e7   : > { %v3066_v24 = vadd.f32 %v3065_v37, %v3064_v8  ;;  %v3067_v0 = vpop.f32.mrb[114].mxu1  ;;  %2318 = vst [vmem:[%s4372_s15] sm:$0xff] %v2192_v13  ;;  %v2195_v31 = vadd.f32 %v2194_v35, %v4281_v42  ;;  %v2387_v30 = vmul.f32 %v2192_v13, %v2192_v13 }
 0x1e8   : > { %v3068_v21 = vpop.f32.mrb[115].mxu1  ;;  %2321 = vst [vmem:[%s4372_s15 + $0x18] sm:$0xff] %v2203_v50  ;;  %v2390_v9 = vmul.f32 %v2203_v50, %v2203_v50 }
 0x1e9   : > { %v3069_v46 = vadd.f32 %v3068_v21, %v3067_v0  ;;  %v4381_v59 = vadd.f32 %v3066_v24, %v4272_v39  ;;  %2319 = vst [vmem:[%s4372_s15 + $0x8] sm:$0xff] %v2195_v31  ;;  %v2350_v11 = vadd.f32 %v2195_v31, %v2192_v13  ;;  %v2388_v61 = vmul.f32 %v2195_v31, %v2195_v31 }
 0x1eb   : > { %v4386_v1 = vadd.f32 %v3069_v46, %v4278_v38  ;;  %v2351_v51 = vadd.f32 %v2350_v11, %v2200_v18  ;;  %v2419_v7 = vadd.f32 %v2388_v61, %v2387_v30  ;;  %v3158_v36 = vpop.f32.mrb[116].mxu0 }
 0x1ec   : > { %v2216_v42 = vadd.f32 %v3158_v36, %v4311_v48  ;;  %v2207_v49 = vpop.f32.mrb[117].mxu0 }
 0x1ed   : > { %v3070_v25 = vpop.f32.mrb[116].mxu1  ;;  %v2420_v23 = vadd.f32 %v2419_v7, %v2389_v3  ;;  %v2208_v57 = vadd.f32 %v2207_v49, %v4299_v14  ;;  %v2352_v16 = vadd.f32 %v2351_v51, %v2203_v50  ;;  %v3159_v12 = vpop.f32.mrb[118].mxu0 }
 0x1ee   : > { %v3071_v39 = vpop.f32.mrb[117].mxu1  ;;  %2324 = vst [vmem:[%s4372_s15 + $0x30] sm:$0xff] %v2216_v42  ;;  %v2219_v2 = vadd.f32 %v3159_v12, %v4317_v56  ;;  %v2210_v5 = vpop.f32.mrb[119].mxu0  ;;  %v2393_v40 = vmul.f32 %v2216_v42, %v2216_v42 }
 0x1ef   : > { %v3072_v52 = vadd.f32 %v3071_v39, %v3070_v25  ;;  %v3073_v38 = vpop.f32.mrb[118].mxu1  ;;  %2322 = vst [vmem:[%s4372_s15 + $0x20] sm:$0xff] %v2208_v57  ;;  %v2353_v32 = vadd.f32 %v2352_v16, %v2208_v57  ;;  %v2391_v8 = vmul.f32 %v2208_v57, %v2208_v57  ;;  %v2421_v48 = vadd.f32 %v2420_v23, %v2390_v9 }
 0x1f0   : > { %v3074_v55 = vpop.f32.mrb[119].mxu1  ;;  %2325 = vst [vmem:[%s4372_s15 + $0x38] sm:$0xff] %v2219_v2  ;;  %v2211_v18 = vadd.f32 %v2210_v5, %v4305_v41  ;;  %v2394_v11 = vmul.f32 %v2219_v2, %v2219_v2 }
 0x1f1   : > { %v3075_v54 = vadd.f32 %v3074_v55, %v3073_v38  ;;  %v4396_v37 = vadd.f32 %v3072_v52, %v4284_v47  ;;  %v2422_v14 = vadd.f32 %v2421_v48, %v2391_v8 }
 0x1f2   : > { %2323 = vst [vmem:[%s4372_s15 + $0x28] sm:$0xff] %v2211_v18  ;;  %v2354_v24 = vadd.f32 %v2353_v32, %v2211_v18  ;;  %v2392_v56 = vmul.f32 %v2211_v18, %v2211_v18 }
 0x1f3   : > { %v4399_v63 = vadd.f32 %v3075_v54, %v4290_v44  ;;  %v3162_v0 = vpop.f32.mrb[120].mxu0 }
 0x1f4   : > { %v2355_v50 = vadd.f32 %v2354_v24, %v2216_v42  ;;  %v2423_v21 = vadd.f32 %v2422_v14, %v2392_v56  ;;  %v2232_v35 = vadd.f32 %v3162_v0, %v4335_v62  ;;  %v2223_v46 = vpop.f32.mrb[121].mxu0 }
 0x1f5   : > { %v3076_v13 = vpop.f32.mrb[120].mxu1  ;;  %v2224_v31 = vadd.f32 %v2223_v46, %v4323_v4  ;;  %v3163_v44 = vpop.f32.mrb[122].mxu0 }
 0x1f6   : > { %v3077_v41 = vpop.f32.mrb[121].mxu1  ;;  %v2424_v61 = vadd.f32 %v2423_v21, %v2393_v40  ;;  %2328 = vst [vmem:[%s4372_s15 + $0x50] sm:$0xff] %v2232_v35  ;;  %v2356_v3 = vadd.f32 %v2355_v50, %v2219_v2  ;;  %v2235_v51 = vadd.f32 %v3163_v44, %v4341_v29  ;;  %v2226_v25 = vpop.f32.mrb[123].mxu0  ;;  %v2397_v38 = vmul.f32 %v2232_v35, %v2232_v35 }
 0x1f7   : > { %v3078_v47 = vadd.f32 %v3077_v41, %v3076_v13  ;;  %v3079_v30 = vpop.f32.mrb[122].mxu1  ;;  %2326 = vst [vmem:[%s4372_s15 + $0x40] sm:$0xff] %v2224_v31  ;;  %v2395_v36 = vmul.f32 %v2224_v31, %v2224_v31  ;;  %v2227_v9 = vadd.f32 %v2226_v25, %v4329_v17 }
 0x1f8   : > { %v3080_v7 = vpop.f32.mrb[123].mxu1  ;;  %v2357_v4 = vadd.f32 %v2356_v3, %v2224_v31  ;;  %v2425_v39 = vadd.f32 %v2424_v61, %v2394_v11  ;;  %2329 = vst [vmem:[%s4372_s15 + $0x58] sm:$0xff] %v2235_v51  ;;  %v2398_v48 = vmul.f32 %v2235_v51, %v2235_v51 }
 0x1f9   : > { %v3081_v62 = vadd.f32 %v3080_v7, %v3079_v30  ;;  %v4409_v42 = vadd.f32 %v3078_v47, %v4296_v60  ;;  %2327 = vst [vmem:[%s4372_s15 + $0x48] sm:$0xff] %v2227_v9  ;;  %v2396_v49 = vmul.f32 %v2227_v9, %v2227_v9 }
 0x1fa   : > { %v2426_v52 = vadd.f32 %v2425_v39, %v2395_v36  ;;  %v2358_v29 = vadd.f32 %v2357_v4, %v2227_v9 }
 0x1fb   : > { %v4414_v23 = vadd.f32 %v3081_v62, %v4302_v43  ;;  %v3166_v16 = vpop.f32.mrb[124].mxu0 }
 0x1fc   : > { %v2359_v12 = vadd.f32 %v2358_v29, %v2232_v35  ;;  %v2427_v17 = vadd.f32 %v2426_v52, %v2396_v49  ;;  %v2248_v60 = vadd.f32 %v3166_v16, %v4359_v15  ;;  %v2239_v55 = vpop.f32.mrb[125].mxu0 }
 0x1fd   : > { %v3082_v57 = vpop.f32.mrb[124].mxu1  ;;  %v2240_v32 = vadd.f32 %v2239_v55, %v4347_v58  ;;  %v3167_v43 = vpop.f32.mrb[126].mxu0 }
 0x1fe   : > { %v3083_v2 = vpop.f32.mrb[125].mxu1  ;;  %v2428_v54 = vadd.f32 %v2427_v17, %v2397_v38  ;;  %2332 = vst [vmem:[%s4372_s15 + $0x70] sm:$0xff] %v2248_v60  ;;  %v2360_v18 = vadd.f32 %v2359_v12, %v2235_v51  ;;  %v2251_v14 = vadd.f32 %v3167_v43, %v4365_v22  ;;  %v2242_v56 = vpop.f32.mrb[127].mxu0  ;;  %v2401_v31 = vmul.f32 %v2248_v60, %v2248_v60 }
 0x1ff   : > { %v3084_v5 = vadd.f32 %v3083_v2, %v3082_v57  ;;  %v3085_v8 = vpop.f32.mrb[126].mxu1  ;;  %2330 = vst [vmem:[%s4372_s15 + $0x60] sm:$0xff] %v2240_v32  ;;  %v2399_v13 = vmul.f32 %v2240_v32, %v2240_v32  ;;  %v2243_v0 = vadd.f32 %v2242_v56, %v4353_v6 }
 0x200   : > { %v3086_v24 = vpop.f32.mrb[127].mxu1  ;;  %v2361_v58 = vadd.f32 %v2360_v18, %v2240_v32  ;;  %v2429_v50 = vadd.f32 %v2428_v54, %v2398_v48  ;;  %2333 = vst [vmem:[%s4372_s15 + $0x78] sm:$0xff] %v2251_v14 }
 0x201   : > { %v3087_v15 = vadd.f32 %v3086_v24, %v3085_v8  ;;  %v2119_v40 = vadd.f32 %v3084_v5, %v4308_v10  ;;  %2331 = vst [vmem:[%s4372_s15 + $0x68] sm:$0xff] %v2243_v0  ;;  %v2400_v21 = vmul.f32 %v2243_v0, %v2243_v0 }
 0x202   : > { %v2430_v41 = vadd.f32 %v2429_v50, %v2399_v13  ;;  %v2362_v46 = vadd.f32 %v2361_v58, %v2243_v0 }
 0x203   : > { %v2122_v35 = vadd.f32 %v3087_v15, %v4314_v20  ;;  %v3170_v47 = vpop.f32.mrb[128].mxu0  ;;  %v2402_v20 = vmul.f32 %v2251_v14, %v2251_v14 }
 0x204   : > { %v2363_v30 = vadd.f32 %v2362_v46, %v2248_v60  ;;  %v2431_v44 = vadd.f32 %v2430_v41, %v2400_v21  ;;  %v2264_v6 = vadd.f32 %v3170_v47, %v4396_v37  ;;  %v2255_v10 = vpop.f32.mrb[129].mxu0 }
 0x205   : > { %v3088_v22 = vpop.f32.mrb[128].mxu1  ;;  %v2256_v3 = vadd.f32 %v2255_v10, %v4381_v59  ;;  %v3171_v7 = vpop.f32.mrb[130].mxu0 }
 0x206   : > { %v3089_v11 = vpop.f32.mrb[129].mxu1  ;;  %v2432_v25 = vadd.f32 %v2431_v44, %v2401_v31  ;;  %2336 = vst [vmem:[%s4372_s15 + $0x90] sm:$0xff] %v2264_v6  ;;  %v2364_v36 = vadd.f32 %v2363_v30, %v2251_v14  ;;  %v2267_v62 = vadd.f32 %v3171_v7, %v4399_v63  ;;  %v2258_v4 = vpop.f32.mrb[131].mxu0  ;;  %v2405_v60 = vmul.f32 %v2264_v6, %v2264_v6 }
 0x207   : > { %v3090_v61 = vadd.f32 %v3089_v11, %v3088_v22  ;;  %v3091_v51 = vpop.f32.mrb[130].mxu1  ;;  %2334 = vst [vmem:[%s4372_s15 + $0x80] sm:$0xff] %v2256_v3  ;;  %v2403_v39 = vmul.f32 %v2256_v3, %v2256_v3  ;;  %v2259_v49 = vadd.f32 %v2258_v4, %v4386_v1 }
 0x208   : > { %v3092_v9 = vpop.f32.mrb[131].mxu1  ;;  %v2365_v59 = vadd.f32 %v2364_v36, %v2256_v3  ;;  %v2433_v29 = vadd.f32 %v2432_v25, %v2402_v20  ;;  %2337 = vst [vmem:[%s4372_s15 + $0x98] sm:$0xff] %v2267_v62 }
 0x209   : > { %v3093_v37 = vadd.f32 %v3092_v9, %v3091_v51  ;;  %v2127_v52 = vadd.f32 %v3090_v61, %v4320_v53  ;;  %2335 = vst [vmem:[%s4372_s15 + $0x88] sm:$0xff] %v2259_v49  ;;  %v2404_v57 = vmul.f32 %v2259_v49, %v2259_v49 }
 0x20a   : > { %v2434_v38 = vadd.f32 %v2433_v29, %v2403_v39  ;;  %v2366_v12 = vadd.f32 %v2365_v59, %v2259_v49 }
 0x20b   : > { %v2130_v16 = vadd.f32 %v3093_v37, %v4326_v33  ;;  %v3174_v17 = vpop.f32.mrb[132].mxu0  ;;  %v2406_v33 = vmul.f32 %v2267_v62, %v2267_v62 }
 0x20c   : > { %v2367_v2 = vadd.f32 %v2366_v12, %v2264_v6  ;;  %v2435_v55 = vadd.f32 %v2434_v38, %v2404_v57  ;;  %v2280_v5 = vadd.f32 %v3174_v17, %v2119_v40  ;;  %v2271_v32 = vpop.f32.mrb[133].mxu0 }
 0x20d   : > { %v3094_v63 = vpop.f32.mrb[132].mxu1  ;;  %v2272_v8 = vadd.f32 %v2271_v32, %v4409_v42  ;;  %v3175_v48 = vpop.f32.mrb[134].mxu0 }
 0x20e   : > { %v3095_v1 = vpop.f32.mrb[133].mxu1  ;;  %v2436_v54 = vadd.f32 %v2435_v55, %v2405_v60  ;;  %2340 = vst [vmem:[%s4372_s15 + $0xb0] sm:$0xff] %v2280_v5  ;;  %v2368_v18 = vadd.f32 %v2367_v2, %v2267_v62  ;;  %v2283_v14 = vadd.f32 %v3175_v48, %v2122_v35  ;;  %v2274_v56 = vpop.f32.mrb[135].mxu0  ;;  %v2409_v47 = vmul.f32 %v2280_v5, %v2280_v5 }
 0x20f   : > { %v3096_v53 = vadd.f32 %v3095_v1, %v3094_v63  ;;  %v3097_v43 = vpop.f32.mrb[134].mxu1  ;;  %2338 = vst [vmem:[%s4372_s15 + $0xa0] sm:$0xff] %v2272_v8  ;;  %v2407_v13 = vmul.f32 %v2272_v8, %v2272_v8  ;;  %v2275_v0 = vadd.f32 %v2274_v56, %v4414_v23 }
 0x210   : > { %v3098_v24 = vpop.f32.mrb[135].mxu1  ;;  %v2369_v58 = vadd.f32 %v2368_v18, %v2272_v8  ;;  %v2437_v42 = vadd.f32 %v2436_v54, %v2406_v33  ;;  %2341 = vst [vmem:[%s4372_s15 + $0xb8] sm:$0xff] %v2283_v14  ;;  %v2410_v3 = vmul.f32 %v2283_v14, %v2283_v14 }
 0x211   : > { %v3099_v15 = vadd.f32 %v3098_v24, %v3097_v43  ;;  %v2135_v40 = vadd.f32 %v3096_v53, %v4332_v34  ;;  %2339 = vst [vmem:[%s4372_s15 + $0xa8] sm:$0xff] %v2275_v0  ;;  %v2408_v50 = vmul.f32 %v2275_v0, %v2275_v0 }
 0x212   : > { %v2438_v41 = vadd.f32 %v2437_v42, %v2407_v13  ;;  %v2370_v46 = vadd.f32 %v2369_v58, %v2275_v0 }
 0x213   : > { %v2138_v21 = vadd.f32 %v3099_v15, %v4338_v27  ;;  %v3178_v22 = vpop.f32.mrb[136].mxu0 }
 0x214   : > { %v2371_v31 = vadd.f32 %v2370_v46, %v2280_v5  ;;  %v2439_v30 = vadd.f32 %v2438_v41, %v2408_v50  ;;  %v2296_v44 = vadd.f32 %v3178_v22, %v2135_v40  ;;  %v2287_v6 = vpop.f32.mrb[137].mxu0 }
 0x215   : > { %v3100_v35 = vpop.f32.mrb[136].mxu1  ;;  %v2288_v11 = vadd.f32 %v2287_v6, %v2127_v52  ;;  %v3179_v61 = vpop.f32.mrb[138].mxu0 }
 0x216   : > { %v3101_v23 = vpop.f32.mrb[137].mxu1  ;;  %v2440_v27 = vadd.f32 %v2439_v30, %v2409_v47  ;;  %2344 = vst [vmem:[%s4372_s15 + $0xd0] sm:$0xff] %v2296_v44  ;;  %v2372_v51 = vadd.f32 %v2371_v31, %v2283_v14  ;;  %v2299_v7 = vadd.f32 %v3179_v61, %v2138_v21  ;;  %v2290_v25 = vpop.f32.mrb[139].mxu0  ;;  %v2413_v12 = vmul.f32 %v2296_v44, %v2296_v44 }
 0x217   : > { %v3102_v34 = vadd.f32 %v3101_v23, %v3100_v35  ;;  %v3103_v10 = vpop.f32.mrb[138].mxu1  ;;  %2342 = vst [vmem:[%s4372_s15 + $0xc0] sm:$0xff] %v2288_v11  ;;  %v2411_v36 = vmul.f32 %v2288_v11, %v2288_v11  ;;  %v2291_v9 = vadd.f32 %v2290_v25, %v2130_v16 }
 0x218   : > { %v3104_v20 = vpop.f32.mrb[139].mxu1  ;;  %v2373_v39 = vadd.f32 %v2372_v51, %v2288_v11  ;;  %v2441_v37 = vadd.f32 %v2440_v27, %v2410_v3  ;;  %2345 = vst [vmem:[%s4372_s15 + $0xd8] sm:$0xff] %v2299_v7  ;;  %v2414_v1 = vmul.f32 %v2299_v7, %v2299_v7 }
 0x219   : > { %v3105_v62 = vadd.f32 %v3104_v20, %v3103_v10  ;;  %v2143_v4 = vadd.f32 %v3102_v34, %v4344_v19  ;;  %2343 = vst [vmem:[%s4372_s15 + $0xc8] sm:$0xff] %v2291_v9  ;;  %v2412_v49 = vmul.f32 %v2291_v9, %v2291_v9 }
 0x21a   : > { %v2442_v59 = vadd.f32 %v2441_v37, %v2411_v36  ;;  %v2374_v29 = vadd.f32 %v2373_v39, %v2291_v9 }
 0x21b   : > { %v2146_v52 = vadd.f32 %v3105_v62, %v4350_v45  ;;  %v3182_v38 = vpop.f32.mrb[140].mxu0 }
 0x21c   : > { %v2375_v63 = vadd.f32 %v2374_v29, %v2296_v44  ;;  %v2443_v17 = vadd.f32 %v2442_v59, %v2412_v49  ;;  %v2303_v2 = vpop.f32.mrb[141].mxu0 }
 0x21d   : > { %v3106_v57 = vpop.f32.mrb[140].mxu1  ;;  %v2304_v55 = vadd.f32 %v2303_v2, %v2143_v4  ;;  %v3183_v5 = vpop.f32.mrb[142].mxu0 }
 0x21e   : > { %v3107_v60 = vpop.f32.mrb[141].mxu1  ;;  %v2444_v32 = vadd.f32 %v2443_v17, %v2413_v12  ;;  %v2376_v53 = vadd.f32 %v2375_v63, %v2299_v7  ;;  %v2306_v8 = vpop.f32.mrb[143].mxu0 }
 0x21f   : > { %v3108_v16 = vadd.f32 %v3107_v60, %v3106_v57  ;;  %v3109_v19 = vpop.f32.mrb[142].mxu1  ;;  %2346 = vst [vmem:[%s4372_s15 + $0xe0] sm:$0xff] %v2304_v55  ;;  %v2415_v48 = vmul.f32 %v2304_v55, %v2304_v55  ;;  %v2307_v54 = vadd.f32 %v2306_v8, %v2146_v52 }
 0x220   : > { %v3110_v45 = vpop.f32.mrb[143].mxu1  ;;  %v2377_v18 = vadd.f32 %v2376_v53, %v2304_v55  ;;  %v2445_v14 = vadd.f32 %v2444_v32, %v2414_v1 }
 0x221   : > { %v2151_v43 = vadd.f32 %v3108_v16, %v4356_v28  ;;  %v3111_v33 = vadd.f32 %v3110_v45, %v3109_v19  ;;  %2347 = vst [vmem:[%s4372_s15 + $0xe8] sm:$0xff] %v2307_v54  ;;  %v2416_v13 = vmul.f32 %v2307_v54, %v2307_v54 }
 0x222   : > { %v2446_v15 = vadd.f32 %v2445_v14, %v2415_v48  ;;  %v2378_v0 = vadd.f32 %v2377_v18, %v2307_v54 }
 0x223   : > { %v2312_v24 = vadd.f32 %v3182_v38, %v2151_v43  ;;  %v2154_v56 = vadd.f32 %v3111_v33, %v4362_v26 }
 0x224   : > { %v2447_v28 = vadd.f32 %v2446_v15, %v2416_v13 }
 0x225   : > { %2348 = vst [vmem:[%s4372_s15 + $0xf0] sm:$0xff] %v2312_v24  ;;  %v2417_v40 = vmul.f32 %v2312_v24, %v2312_v24  ;;  %v2315_v58 = vadd.f32 %v3183_v5, %v2154_v56  ;;  %v2379_v42 = vadd.f32 %v2378_v0, %v2312_v24 }
 0x227   : > { %2349 = vst [vmem:[%s4372_s15 + $0xf8] sm:$0xff] %v2315_v58  ;;  %v2418_v50 = vmul.f32 %v2315_v58, %v2315_v58  ;;  %v2380_v21 = vadd.f32 %v2379_v42, %v2315_v58  ;;  %v2448_v41 = vadd.f32 %v2447_v28, %v2417_v40 }
 0x229   : > { %v2381_v46 = vrot.slane %v2380_v21, 4  ;;  %v2449_v35 = vadd.f32 %v2448_v41, %v2418_v50 }
 0x22b   : > { %v2382_v22 = vadd.f32 %v2381_v46, %v2380_v21  ;;  %v2450_v47 = vrot.slane %v2449_v35, 4 }
 0x22d   : > { %v2383_v31 = vrot.slane %v2382_v22, 2  ;;  %v2451_v26 = vadd.f32 %v2450_v47, %v2449_v35 }
 0x22f   : > { %v2384_v30 = vadd.f32 %v2383_v31, %v2382_v22  ;;  %v2452_v44 = vrot.slane %v2451_v26, 2 }
 0x231   : > { %v2385_v23 = vrot.slane %v2384_v30, 1  ;;  %v2453_v6 = vadd.f32 %v2452_v44, %v2451_v26 }
 0x233   : > { %v2386_v34 = vadd.f32 %v2385_v23, %v2384_v30  ;;  %v2454_v11 = vrot.slane %v2453_v6, 1 }
 0x235   : > { %v2455_v10 = vadd.f32 %v2454_v11, %v2453_v6  ;;  %2456 = vst [vmem:[%s268_s18] sm:$0xff] %v2386_v34 }
 0x237   : > { %2457 = vst [vmem:[%s272_s23] sm:$0xff] %v2455_v10 }
 0x238 PF: > { %s17_s21 = sadd.s32 1, %s3290_s21  }
 0x239   : > { %p14_p4 = scmp.ge.s32.totalorder %s17_s21, 4  }
 0x23b   :  { %16 = sbr.rel (!%p14_p4) target bundleno = 1 (0x1), region = 91 }

</bundles_post_ra>
